<compile_context>
chip_gen: v7x
topology: tpu7x:2x2x1
jax: 0.10.0
libtpu: 0.0.40
codegen_flags: <defaults>
</compile_context>

<pallas_src>
import functools
import math

import jax
import jax.numpy as jnp
from jax.experimental import pallas as pl
from jax.experimental.pallas import tpu as pltpu

# ----------------------------- hyper-parameters ------------------------------
EMB = 32            # embedding_dim
HEADS = 4           # head_num
QKV = 8             # qkv_dim  (HEADS * QKV == EMB)
LOGIT_CLIP = 10.0   # logit_clipping
SQRT_EMB = math.sqrt(EMB)     # sqrt_embedding_dim
SQRT_QKV = math.sqrt(QKV)     # sqrt_qkv_dim


# ------------------------------ fused kernel ---------------------------------
def _matrix_decoder_kernel(mach_ref, jobs_ref, mask_ref,
                           wq_ref, wk_ref, wv_ref, wc_ref, bc_ref,
                           o_ref, *, bt, m, t):
    """One grid step = `bt` batch elements.

    mach_ref: (bt*m, E) f32   jobs_ref: (bt*t, E) f32   mask_ref: (bt, m, t) f32
    wq/wk/wv: (E, H*d) bf16 (wq pre-scaled by 1/sqrt(d))
    wc:       (H*d, E) bf16 (pre-scaled by 1/sqrt(E))     bc: (1, E) f32 (pre-scaled)
    o_ref:    (bt, m*t) f32  — lane-dense probability slab
    """
    f32, bf16 = jnp.float32, jnp.bfloat16
    heads, d = HEADS, QKV
    hd = heads * d
    emb = EMB

    mach = mach_ref[...].astype(bf16)            # (bt*m, E)
    jobs = jobs_ref[...].astype(bf16)            # (bt*t, E)
    mask3 = mask_ref[...]                        # (bt, m, t)  f32 (-1e9 / 0)

    wq = wq_ref[...]                             # (E, hd) bf16
    wk = wk_ref[...]
    wv = wv_ref[...]
    wc = wc_ref[...]                             # (hd, E) bf16
    bc = bc_ref[...]                             # (1, E)  f32

    # ---- flat Q/K/V projections: one lane-dense MXU matmul each ----
    q = jnp.dot(mach, wq, preferred_element_type=f32)     # (bt*m, hd)
    k = jnp.dot(jobs, wk, preferred_element_type=f32)     # (bt*t, hd)
    v = jnp.dot(jobs, wv, preferred_element_type=f32)     # (bt*t, hd)

    q3 = q.reshape(bt, m, hd).astype(bf16)
    k3 = k.reshape(bt, t, hd).astype(bf16)
    v3 = v.reshape(bt, t, hd).astype(bf16)
    jobs3 = jobs.reshape(bt, t, emb)                       # bf16 (single_head_key)

    # ---- per-head attention with a joint softmax over the m*t logits ----
    head_outs_2d = []
    for hh in range(heads):
        sl = slice(hh * d, (hh + 1) * d)
        s = jnp.einsum('bmd,btd->bmt', q3[:, :, sl], k3[:, :, sl],
                       preferred_element_type=f32)         # (bt, m, t); q pre-scaled
        s = s + mask3
        mx = jnp.max(jnp.max(s, axis=2, keepdims=True), axis=1, keepdims=True)
        ex = jnp.exp(s - mx)
        den = jnp.sum(jnp.sum(ex, axis=2, keepdims=True), axis=1, keepdims=True)
        w = ex * pl.reciprocal(den, approx=True)            # joint softmax weights
        out_h = jnp.einsum('bmt,btd->bmd', w.astype(bf16), v3[:, :, sl],
                           preferred_element_type=f32)      # (bt, m, d)
        head_outs_2d.append(out_h.reshape(bt * m, d).astype(bf16))

    # concat heads along lanes -> (bt*m, hd); single flat combine matmul
    out2 = jnp.concatenate(head_outs_2d, axis=-1)           # (bt*m, hd) bf16

    # ---- multi_head_combine (+ folded 1/sqrt(E) single-head scale) ----
    mh = jnp.dot(out2, wc, preferred_element_type=f32) + bc  # (bt*m, E)
    mh3 = mh.reshape(bt, m, emb).astype(bf16)

    # ---- single-head score against encoded_jobs (single_head_key) ----
    score = jnp.einsum('bme,bte->bmt', mh3, jobs3,
                       preferred_element_type=f32)            # (bt, m, t), pre-scaled
    score = LOGIT_CLIP * jnp.tanh(score) + mask3

    # ---- final softmax over all m*t logits, lane-dense (bt, m*t) store ----
    flat = score.reshape(bt, m * t)
    smx = jnp.max(flat, axis=-1, keepdims=True)
    es = jnp.exp(flat - smx)
    den = jnp.sum(es, axis=-1, keepdims=True)
    o_ref[...] = es / den     # exact divide: emitted rows sum to 1 in f32


# --------------------------- one-time parameter prep ---------------------------
def prepare_params(params):
    """Flat bf16 MXU layouts with the 1/sqrt scales folded into the weights.

    Folding is algebraically identical to the torch divide-after-matmul:
      (x @ Wq) / sqrt(d) == x @ (Wq / sqrt(d)),  (y @ Wc + bc) / sqrt(E) == ...
    Call once; reuse the result for every forward.
    """
    f32, bf16 = jnp.float32, jnp.bfloat16
    return {
        'wq': (params['Wq_3'] * (1.0 / SQRT_QKV)).astype(bf16),   # (E, H*d)
        'wk': params['Wk'].astype(bf16),                          # (E, H*d)
        'wv': params['Wv'].astype(bf16),                          # (E, H*d)
        'wc': (params['Wc'] * (1.0 / SQRT_EMB)).astype(bf16),     # (H*d, E)
        'bc': (params['bc'] * (1.0 / SQRT_EMB)).reshape(1, EMB).astype(f32),
    }


def _choose_block_b(batch, max_block=32):
    """Batch block per grid step: sublane-aligned (multiple of 8) and leaving
    >=2 grid steps when possible (v7x megacore); otherwise the whole batch in
    one step (block dims then equal the full array dims, always legal)."""
    if batch >= 16 and batch % 8 == 0:
        bt = min(max_block, (batch // 2) // 8 * 8)
        while bt > 8 and batch % bt != 0:
            bt -= 8
        if bt >= 8 and batch % bt == 0:
            return bt
    return batch


# --------------------------------- wrapper ------------------------------------
def matrix_decoder_forward(prepped, encoded_machine, encoded_jobs, ninf_mask,
                           block_b=None):
    """encoded_machine: (B,M,EMB), encoded_jobs: (B,T,EMB), ninf_mask: (B,M,T)
       -> probs (B, M*T)."""
    B, M, E = encoded_machine.shape
    T = encoded_jobs.shape[1]
    HD = HEADS * QKV
    assert E == EMB and HD == EMB

    if block_b is None:
        block_b = _choose_block_b(B)
    assert B % block_b == 0
    steps = B // block_b

    # Batch-major 2-D views so each projection is a single flat matmul.
    mach2 = encoded_machine.reshape(B * M, E)
    jobs2 = encoded_jobs.reshape(B * T, E)

    kernel = functools.partial(_matrix_decoder_kernel, bt=block_b, m=M, t=T)

    probs = pl.pallas_call(
        kernel,
        out_shape=jax.ShapeDtypeStruct((B, M * T), jnp.float32),
        grid=(steps,),
        in_specs=[
            pl.BlockSpec((block_b * M, E), lambda i: (i, 0)),
            pl.BlockSpec((block_b * T, E), lambda i: (i, 0)),
            pl.BlockSpec((block_b, M, T), lambda i: (i, 0, 0)),
            pl.BlockSpec((E, HD), lambda i: (0, 0)),
            pl.BlockSpec((E, HD), lambda i: (0, 0)),
            pl.BlockSpec((E, HD), lambda i: (0, 0)),
            pl.BlockSpec((HD, E), lambda i: (0, 0)),
            pl.BlockSpec((1, E), lambda i: (0, 0)),
        ],
        out_specs=pl.BlockSpec((block_b, M * T), lambda i: (i, 0)),
        compiler_params=pltpu.CompilerParams(
            dimension_semantics=("parallel",)),
    )(mach2, jobs2, ninf_mask,
      prepped['wq'], prepped['wk'], prepped['wv'], prepped['wc'], prepped['bc'])

    return probs


# -------------------------- parameter initialization --------------------------
def init_params(key):
    ks = jax.random.split(key, 5)

    def lin_w(k, din, dout):
        bound = 1.0 / math.sqrt(din)
        return jax.random.uniform(k, (din, dout), jnp.float32, -bound, bound)

    params = {}
    params['Wq_3'] = lin_w(ks[0], EMB, HEADS * QKV)          # bias=False
    params['Wk'] = lin_w(ks[1], EMB, HEADS * QKV)            # bias=False
    params['Wv'] = lin_w(ks[2], EMB, HEADS * QKV)            # bias=False
    params['Wc'] = lin_w(ks[3], HEADS * QKV, EMB)            # multi_head_combine
    bound = 1.0 / math.sqrt(HEADS * QKV)
    params['bc'] = jax.random.uniform(ks[4], (EMB,), jnp.float32, -bound, bound)
    return params


# --------------------------- pure-JAX reference -------------------------------
def reference_forward(params, encoded_machine, encoded_jobs, ninf_mask):
    """Mirrors the torch forward (reshape_by_heads, joint softmax, combine,
    single-head score, tanh clip, mask, softmax).  Uses the same prepared
    bf16 / scale-folded weights as the kernel so the comparison is
    precision-matched (the fold is algebraically equal to torch's
    divide-after-matmul)."""
    bf16, f32 = jnp.bfloat16, jnp.float32
    p = prepare_params(params)
    B, M, E = encoded_machine.shape
    T = encoded_jobs.shape[1]
    H, d = HEADS, QKV

    def mm(a, w):
        return jnp.einsum('...ij,jk->...ik', a.astype(bf16), w,
                          preferred_element_type=f32)

    def by_heads(x):             # (B, n, H*d) -> (B, H, n, d)
        return x.reshape(B, -1, H, d).transpose(0, 2, 1, 3)

    q = by_heads(mm(encoded_machine, p['wq']))     # already scaled by 1/sqrt(d)
    k = by_heads(mm(encoded_jobs, p['wk']))
    v = by_heads(mm(encoded_jobs, p['wv']))

    s = jnp.einsum('bhmd,bhtd->bhmt', q.astype(bf16), k.astype(bf16),
                   preferred_element_type=f32)
    s = s + ninf_mask[:, None]
    w = jax.nn.softmax(s.reshape(B, H, M * T), axis=-1).reshape(B, H, M, T)
    out = jnp.einsum('bhmt,bhtd->bhmd', w.astype(bf16), v.astype(bf16),
                     preferred_element_type=f32)
    out_concat = out.transpose(0, 2, 1, 3).reshape(B, M, H * d)
    mh = mm(out_concat, p['wc']) + p['bc']         # already scaled by 1/sqrt(E)
    score = jnp.einsum('bme,bte->bmt', mh.astype(bf16),
                       encoded_jobs.astype(bf16), preferred_element_type=f32)
    score = LOGIT_CLIP * jnp.tanh(score) + ninf_mask
    return jax.nn.softmax(score.reshape(B, M * T), axis=-1)


# ------------------------------------ main -------------------------------------
if __name__ == "__main__":
    B, M, T = 16, 4, 8          # batch, #machines, #jobs (tasks)

    key = jax.random.PRNGKey(0)
    k_param, k_mach, k_jobs, k_mask = jax.random.split(key, 4)

    params = init_params(k_param)
    prepped = prepare_params(params)            # one-time weight prep

    encoded_machine = jax.random.normal(k_mach, (B, M, EMB), jnp.float32)
    encoded_jobs = jax.random.normal(k_jobs, (B, T, EMB), jnp.float32)
    ninf_mask = jnp.where(jax.random.uniform(k_mask, (B, M, T)) < 0.2,
                          -1e9, 0.0).astype(jnp.float32)

    probs = matrix_decoder_forward(prepped, encoded_machine, encoded_jobs,
                                   ninf_mask)
    probs = jax.block_until_ready(probs)

    assert probs.shape == (B, M * T)
    assert bool(jnp.all(jnp.isfinite(probs)))
    row_sums = jnp.sum(probs, axis=1)
    assert bool(jnp.all(jnp.abs(row_sums - 1.0) < 1e-4))

    ref = reference_forward(params, encoded_machine, encoded_jobs, ninf_mask)
    max_err = float(jnp.max(jnp.abs(probs - ref)))
    assert max_err < 5e-3, f"max abs diff vs reference: {max_err}"

    print("KERNEL_OK")
</pallas_src>

<mosaic_0001>
module attributes {stable_mosaic.version = 11 : i64} {
  func.func @_matrix_decoder_kernel(%arg0: i32, %arg1: memref<32x32xf32, #tpu.memory_space<vmem>>, %arg2: memref<64x32xf32, #tpu.memory_space<vmem>>, %arg3: memref<8x4x8xf32, #tpu.memory_space<vmem>>, %arg4: memref<32x32xbf16, #tpu.memory_space<vmem>>, %arg5: memref<32x32xbf16, #tpu.memory_space<vmem>>, %arg6: memref<32x32xbf16, #tpu.memory_space<vmem>>, %arg7: memref<32x32xbf16, #tpu.memory_space<vmem>>, %arg8: memref<1x32xf32, #tpu.memory_space<vmem>>, %arg9: memref<8x32xf32, #tpu.memory_space<vmem>>) attributes {dimension_semantics = [#tpu.dimension_semantics<parallel>], iteration_bounds = array<i64: 2>, scalar_prefetch = 0 : i64, scratch_operands = 0 : i64, tpu.core_type = #tpu.core_type<tc>, window_params = [{transform_indices = @transform_0, window_bounds = array<i64: 32, 32>}, {transform_indices = @transform_1, window_bounds = array<i64: 64, 32>}, {transform_indices = @transform_2, window_bounds = array<i64: 8, 4, 8>}, {pipeline_mode = #tpu.pipeline_mode<synchronous>, transform_indices = @transform_3, window_bounds = array<i64: 32, 32>}, {pipeline_mode = #tpu.pipeline_mode<synchronous>, transform_indices = @transform_4, window_bounds = array<i64: 32, 32>}, {pipeline_mode = #tpu.pipeline_mode<synchronous>, transform_indices = @transform_5, window_bounds = array<i64: 32, 32>}, {pipeline_mode = #tpu.pipeline_mode<synchronous>, transform_indices = @transform_6, window_bounds = array<i64: 32, 32>}, {pipeline_mode = #tpu.pipeline_mode<synchronous>, transform_indices = @transform_7, window_bounds = array<i64: 1, 32>}, {transform_indices = @transform_8, window_bounds = array<i64: 8, 32>}]} {
    %c0 = arith.constant 0 : index
    %c0_0 = arith.constant 0 : index
    %0 = vector.load %arg1[%c0, %c0_0] : memref<32x32xf32, #tpu.memory_space<vmem>>, vector<32x32xf32>
    %1 = arith.truncf %0 : vector<32x32xf32> to vector<32x32xbf16>
    %c0_1 = arith.constant 0 : index
    %c0_2 = arith.constant 0 : index
    %2 = vector.load %arg2[%c0_1, %c0_2] : memref<64x32xf32, #tpu.memory_space<vmem>>, vector<64x32xf32>
    %3 = arith.truncf %2 : vector<64x32xf32> to vector<64x32xbf16>
    %c0_3 = arith.constant 0 : index
    %c0_4 = arith.constant 0 : index
    %c0_5 = arith.constant 0 : index
    %4 = vector.load %arg3[%c0_3, %c0_4, %c0_5] : memref<8x4x8xf32, #tpu.memory_space<vmem>>, vector<8x4x8xf32>
    %c0_6 = arith.constant 0 : index
    %c0_7 = arith.constant 0 : index
    %5 = vector.load %arg4[%c0_6, %c0_7] : memref<32x32xbf16, #tpu.memory_space<vmem>>, vector<32x32xbf16>
    %c0_8 = arith.constant 0 : index
    %c0_9 = arith.constant 0 : index
    %6 = vector.load %arg5[%c0_8, %c0_9] : memref<32x32xbf16, #tpu.memory_space<vmem>>, vector<32x32xbf16>
    %c0_10 = arith.constant 0 : index
    %c0_11 = arith.constant 0 : index
    %7 = vector.load %arg6[%c0_10, %c0_11] : memref<32x32xbf16, #tpu.memory_space<vmem>>, vector<32x32xbf16>
    %c0_12 = arith.constant 0 : index
    %c0_13 = arith.constant 0 : index
    %8 = vector.load %arg7[%c0_12, %c0_13] : memref<32x32xbf16, #tpu.memory_space<vmem>>, vector<32x32xbf16>
    %c0_14 = arith.constant 0 : index
    %c0_15 = arith.constant 0 : index
    %9 = vector.load %arg8[%c0_14, %c0_15] : memref<1x32xf32, #tpu.memory_space<vmem>>, vector<1x32xf32>
    %cst = arith.constant dense<0.000000e+00> : vector<32x32xf32>
    %10 = tpu.matmul %1, %5, %cst {dimension_numbers = #tpu.dot_dimension_numbers<[1], [0], [0], [1], [0, 0, 1, 1], [], []>} : vector<32x32xbf16>, vector<32x32xbf16>, vector<32x32xf32> -> vector<32x32xf32>
    %cst_16 = arith.constant dense<0.000000e+00> : vector<64x32xf32>
    %11 = tpu.matmul %3, %6, %cst_16 {dimension_numbers = #tpu.dot_dimension_numbers<[1], [0], [0], [1], [0, 0, 1, 1], [], []>} : vector<64x32xbf16>, vector<32x32xbf16>, vector<64x32xf32> -> vector<64x32xf32>
    %cst_17 = arith.constant dense<0.000000e+00> : vector<64x32xf32>
    %12 = tpu.matmul %3, %7, %cst_17 {dimension_numbers = #tpu.dot_dimension_numbers<[1], [0], [0], [1], [0, 0, 1, 1], [], []>} : vector<64x32xbf16>, vector<32x32xbf16>, vector<64x32xf32> -> vector<64x32xf32>
    %13 = vector.shape_cast %10 : vector<32x32xf32> to vector<8x4x32xf32>
    %14 = arith.truncf %13 : vector<8x4x32xf32> to vector<8x4x32xbf16>
    %15 = vector.shape_cast %11 : vector<64x32xf32> to vector<8x8x32xf32>
    %16 = arith.truncf %15 : vector<8x8x32xf32> to vector<8x8x32xbf16>
    %17 = vector.shape_cast %12 : vector<64x32xf32> to vector<8x8x32xf32>
    %18 = arith.truncf %17 : vector<8x8x32xf32> to vector<8x8x32xbf16>
    %19 = vector.shape_cast %3 : vector<64x32xbf16> to vector<8x8x32xbf16>
    %20 = vector.extract_strided_slice %14 {offsets = [0, 0, 0], sizes = [8, 4, 8], strides = [1, 1, 1]} : vector<8x4x32xbf16> to vector<8x4x8xbf16>
    %21 = vector.extract_strided_slice %16 {offsets = [0, 0, 0], sizes = [8, 8, 8], strides = [1, 1, 1]} : vector<8x8x32xbf16> to vector<8x8x8xbf16>
    "tpu.trace_start"() <{level = 10 : i32, message = "bmd,btd->bmt"}> : () -> ()
    %cst_18 = arith.constant dense<0.000000e+00> : vector<8x4x8xf32>
    %22 = tpu.matmul %20, %21, %cst_18 {dimension_numbers = #tpu.dot_dimension_numbers<[2], [2], [1], [1], [0, 0, 0, 1, 1, 1], [0], [0]>} : vector<8x4x8xbf16>, vector<8x8x8xbf16>, vector<8x4x8xf32> -> vector<8x4x8xf32>
    "tpu.trace_stop"() : () -> ()
    %23 = arith.addf %22, %4 : vector<8x4x8xf32>
    %cst_19 = arith.constant dense<0xFF800000> : vector<8x4xf32>
    %24 = vector.multi_reduction <maximumf>, %23, %cst_19 [2] : vector<8x4x8xf32> to vector<8x4xf32>
    %25 = vector.shape_cast %24 : vector<8x4xf32> to vector<8x4x1xf32>
    %cst_20 = arith.constant dense<0xFF800000> : vector<8x1xf32>
    %26 = vector.multi_reduction <maximumf>, %25, %cst_20 [1] : vector<8x4x1xf32> to vector<8x1xf32>
    %27 = vector.shape_cast %26 : vector<8x1xf32> to vector<8x1x1xf32>
    %28 = vector.broadcast %27 : vector<8x1x1xf32> to vector<8x4x8xf32>
    %29 = arith.subf %23, %28 : vector<8x4x8xf32>
    %30 = math.exp %29 : vector<8x4x8xf32>
    %cst_21 = arith.constant dense<0.000000e+00> : vector<8x4xf32>
    %31 = vector.multi_reduction <add>, %30, %cst_21 [2] : vector<8x4x8xf32> to vector<8x4xf32>
    %32 = vector.shape_cast %31 : vector<8x4xf32> to vector<8x4x1xf32>
    %cst_22 = arith.constant dense<0.000000e+00> : vector<8x1xf32>
    %33 = vector.multi_reduction <add>, %32, %cst_22 [1] : vector<8x4x1xf32> to vector<8x1xf32>
    %34 = vector.shape_cast %33 : vector<8x1xf32> to vector<8x1x1xf32>
    %35 = tpu.reciprocal %34 {approx = true} : vector<8x1x1xf32> -> vector<8x1x1xf32>
    %36 = vector.broadcast %35 : vector<8x1x1xf32> to vector<8x4x8xf32>
    %37 = arith.mulf %30, %36 : vector<8x4x8xf32>
    %38 = arith.truncf %37 : vector<8x4x8xf32> to vector<8x4x8xbf16>
    %39 = vector.extract_strided_slice %18 {offsets = [0, 0, 0], sizes = [8, 8, 8], strides = [1, 1, 1]} : vector<8x8x32xbf16> to vector<8x8x8xbf16>
    "tpu.trace_start"() <{level = 10 : i32, message = "bmt,btd->bmd"}> : () -> ()
    %cst_23 = arith.constant dense<0.000000e+00> : vector<8x4x8xf32>
    %40 = tpu.matmul %38, %39, %cst_23 {dimension_numbers = #tpu.dot_dimension_numbers<[2], [1], [1], [2], [0, 0, 0, 1, 1, 2], [0], [0]>} : vector<8x4x8xbf16>, vector<8x8x8xbf16>, vector<8x4x8xf32> -> vector<8x4x8xf32>
    "tpu.trace_stop"() : () -> ()
    %41 = vector.shape_cast %40 : vector<8x4x8xf32> to vector<32x8xf32>
    %42 = arith.truncf %41 : vector<32x8xf32> to vector<32x8xbf16>
    %43 = vector.extract_strided_slice %14 {offsets = [0, 0, 8], sizes = [8, 4, 8], strides = [1, 1, 1]} : vector<8x4x32xbf16> to vector<8x4x8xbf16>
    %44 = vector.extract_strided_slice %16 {offsets = [0, 0, 8], sizes = [8, 8, 8], strides = [1, 1, 1]} : vector<8x8x32xbf16> to vector<8x8x8xbf16>
    "tpu.trace_start"() <{level = 10 : i32, message = "bmd,btd->bmt"}> : () -> ()
    %cst_24 = arith.constant dense<0.000000e+00> : vector<8x4x8xf32>
    %45 = tpu.matmul %43, %44, %cst_24 {dimension_numbers = #tpu.dot_dimension_numbers<[2], [2], [1], [1], [0, 0, 0, 1, 1, 1], [0], [0]>} : vector<8x4x8xbf16>, vector<8x8x8xbf16>, vector<8x4x8xf32> -> vector<8x4x8xf32>
    "tpu.trace_stop"() : () -> ()
    %46 = arith.addf %45, %4 : vector<8x4x8xf32>
    %cst_25 = arith.constant dense<0xFF800000> : vector<8x4xf32>
    %47 = vector.multi_reduction <maximumf>, %46, %cst_25 [2] : vector<8x4x8xf32> to vector<8x4xf32>
    %48 = vector.shape_cast %47 : vector<8x4xf32> to vector<8x4x1xf32>
    %cst_26 = arith.constant dense<0xFF800000> : vector<8x1xf32>
    %49 = vector.multi_reduction <maximumf>, %48, %cst_26 [1] : vector<8x4x1xf32> to vector<8x1xf32>
    %50 = vector.shape_cast %49 : vector<8x1xf32> to vector<8x1x1xf32>
    %51 = vector.broadcast %50 : vector<8x1x1xf32> to vector<8x4x8xf32>
    %52 = arith.subf %46, %51 : vector<8x4x8xf32>
    %53 = math.exp %52 : vector<8x4x8xf32>
    %cst_27 = arith.constant dense<0.000000e+00> : vector<8x4xf32>
    %54 = vector.multi_reduction <add>, %53, %cst_27 [2] : vector<8x4x8xf32> to vector<8x4xf32>
    %55 = vector.shape_cast %54 : vector<8x4xf32> to vector<8x4x1xf32>
    %cst_28 = arith.constant dense<0.000000e+00> : vector<8x1xf32>
    %56 = vector.multi_reduction <add>, %55, %cst_28 [1] : vector<8x4x1xf32> to vector<8x1xf32>
    %57 = vector.shape_cast %56 : vector<8x1xf32> to vector<8x1x1xf32>
    %58 = tpu.reciprocal %57 {approx = true} : vector<8x1x1xf32> -> vector<8x1x1xf32>
    %59 = vector.broadcast %58 : vector<8x1x1xf32> to vector<8x4x8xf32>
    %60 = arith.mulf %53, %59 : vector<8x4x8xf32>
    %61 = arith.truncf %60 : vector<8x4x8xf32> to vector<8x4x8xbf16>
    %62 = vector.extract_strided_slice %18 {offsets = [0, 0, 8], sizes = [8, 8, 8], strides = [1, 1, 1]} : vector<8x8x32xbf16> to vector<8x8x8xbf16>
    "tpu.trace_start"() <{level = 10 : i32, message = "bmt,btd->bmd"}> : () -> ()
    %cst_29 = arith.constant dense<0.000000e+00> : vector<8x4x8xf32>
    %63 = tpu.matmul %61, %62, %cst_29 {dimension_numbers = #tpu.dot_dimension_numbers<[2], [1], [1], [2], [0, 0, 0, 1, 1, 2], [0], [0]>} : vector<8x4x8xbf16>, vector<8x8x8xbf16>, vector<8x4x8xf32> -> vector<8x4x8xf32>
    "tpu.trace_stop"() : () -> ()
    %64 = vector.shape_cast %63 : vector<8x4x8xf32> to vector<32x8xf32>
    %65 = arith.truncf %64 : vector<32x8xf32> to vector<32x8xbf16>
    %66 = vector.extract_strided_slice %14 {offsets = [0, 0, 16], sizes = [8, 4, 8], strides = [1, 1, 1]} : vector<8x4x32xbf16> to vector<8x4x8xbf16>
    %67 = vector.extract_strided_slice %16 {offsets = [0, 0, 16], sizes = [8, 8, 8], strides = [1, 1, 1]} : vector<8x8x32xbf16> to vector<8x8x8xbf16>
    "tpu.trace_start"() <{level = 10 : i32, message = "bmd,btd->bmt"}> : () -> ()
    %cst_30 = arith.constant dense<0.000000e+00> : vector<8x4x8xf32>
    %68 = tpu.matmul %66, %67, %cst_30 {dimension_numbers = #tpu.dot_dimension_numbers<[2], [2], [1], [1], [0, 0, 0, 1, 1, 1], [0], [0]>} : vector<8x4x8xbf16>, vector<8x8x8xbf16>, vector<8x4x8xf32> -> vector<8x4x8xf32>
    "tpu.trace_stop"() : () -> ()
    %69 = arith.addf %68, %4 : vector<8x4x8xf32>
    %cst_31 = arith.constant dense<0xFF800000> : vector<8x4xf32>
    %70 = vector.multi_reduction <maximumf>, %69, %cst_31 [2] : vector<8x4x8xf32> to vector<8x4xf32>
    %71 = vector.shape_cast %70 : vector<8x4xf32> to vector<8x4x1xf32>
    %cst_32 = arith.constant dense<0xFF800000> : vector<8x1xf32>
    %72 = vector.multi_reduction <maximumf>, %71, %cst_32 [1] : vector<8x4x1xf32> to vector<8x1xf32>
    %73 = vector.shape_cast %72 : vector<8x1xf32> to vector<8x1x1xf32>
    %74 = vector.broadcast %73 : vector<8x1x1xf32> to vector<8x4x8xf32>
    %75 = arith.subf %69, %74 : vector<8x4x8xf32>
    %76 = math.exp %75 : vector<8x4x8xf32>
    %cst_33 = arith.constant dense<0.000000e+00> : vector<8x4xf32>
    %77 = vector.multi_reduction <add>, %76, %cst_33 [2] : vector<8x4x8xf32> to vector<8x4xf32>
    %78 = vector.shape_cast %77 : vector<8x4xf32> to vector<8x4x1xf32>
    %cst_34 = arith.constant dense<0.000000e+00> : vector<8x1xf32>
    %79 = vector.multi_reduction <add>, %78, %cst_34 [1] : vector<8x4x1xf32> to vector<8x1xf32>
    %80 = vector.shape_cast %79 : vector<8x1xf32> to vector<8x1x1xf32>
    %81 = tpu.reciprocal %80 {approx = true} : vector<8x1x1xf32> -> vector<8x1x1xf32>
    %82 = vector.broadcast %81 : vector<8x1x1xf32> to vector<8x4x8xf32>
    %83 = arith.mulf %76, %82 : vector<8x4x8xf32>
    %84 = arith.truncf %83 : vector<8x4x8xf32> to vector<8x4x8xbf16>
    %85 = vector.extract_strided_slice %18 {offsets = [0, 0, 16], sizes = [8, 8, 8], strides = [1, 1, 1]} : vector<8x8x32xbf16> to vector<8x8x8xbf16>
    "tpu.trace_start"() <{level = 10 : i32, message = "bmt,btd->bmd"}> : () -> ()
    %cst_35 = arith.constant dense<0.000000e+00> : vector<8x4x8xf32>
    %86 = tpu.matmul %84, %85, %cst_35 {dimension_numbers = #tpu.dot_dimension_numbers<[2], [1], [1], [2], [0, 0, 0, 1, 1, 2], [0], [0]>} : vector<8x4x8xbf16>, vector<8x8x8xbf16>, vector<8x4x8xf32> -> vector<8x4x8xf32>
    "tpu.trace_stop"() : () -> ()
    %87 = vector.shape_cast %86 : vector<8x4x8xf32> to vector<32x8xf32>
    %88 = arith.truncf %87 : vector<32x8xf32> to vector<32x8xbf16>
    %89 = vector.extract_strided_slice %14 {offsets = [0, 0, 24], sizes = [8, 4, 8], strides = [1, 1, 1]} : vector<8x4x32xbf16> to vector<8x4x8xbf16>
    %90 = vector.extract_strided_slice %16 {offsets = [0, 0, 24], sizes = [8, 8, 8], strides = [1, 1, 1]} : vector<8x8x32xbf16> to vector<8x8x8xbf16>
    "tpu.trace_start"() <{level = 10 : i32, message = "bmd,btd->bmt"}> : () -> ()
    %cst_36 = arith.constant dense<0.000000e+00> : vector<8x4x8xf32>
    %91 = tpu.matmul %89, %90, %cst_36 {dimension_numbers = #tpu.dot_dimension_numbers<[2], [2], [1], [1], [0, 0, 0, 1, 1, 1], [0], [0]>} : vector<8x4x8xbf16>, vector<8x8x8xbf16>, vector<8x4x8xf32> -> vector<8x4x8xf32>
    "tpu.trace_stop"() : () -> ()
    %92 = arith.addf %91, %4 : vector<8x4x8xf32>
    %cst_37 = arith.constant dense<0xFF800000> : vector<8x4xf32>
    %93 = vector.multi_reduction <maximumf>, %92, %cst_37 [2] : vector<8x4x8xf32> to vector<8x4xf32>
    %94 = vector.shape_cast %93 : vector<8x4xf32> to vector<8x4x1xf32>
    %cst_38 = arith.constant dense<0xFF800000> : vector<8x1xf32>
    %95 = vector.multi_reduction <maximumf>, %94, %cst_38 [1] : vector<8x4x1xf32> to vector<8x1xf32>
    %96 = vector.shape_cast %95 : vector<8x1xf32> to vector<8x1x1xf32>
    %97 = vector.broadcast %96 : vector<8x1x1xf32> to vector<8x4x8xf32>
    %98 = arith.subf %92, %97 : vector<8x4x8xf32>
    %99 = math.exp %98 : vector<8x4x8xf32>
    %cst_39 = arith.constant dense<0.000000e+00> : vector<8x4xf32>
    %100 = vector.multi_reduction <add>, %99, %cst_39 [2] : vector<8x4x8xf32> to vector<8x4xf32>
    %101 = vector.shape_cast %100 : vector<8x4xf32> to vector<8x4x1xf32>
    %cst_40 = arith.constant dense<0.000000e+00> : vector<8x1xf32>
    %102 = vector.multi_reduction <add>, %101, %cst_40 [1] : vector<8x4x1xf32> to vector<8x1xf32>
    %103 = vector.shape_cast %102 : vector<8x1xf32> to vector<8x1x1xf32>
    %104 = tpu.reciprocal %103 {approx = true} : vector<8x1x1xf32> -> vector<8x1x1xf32>
    %105 = vector.broadcast %104 : vector<8x1x1xf32> to vector<8x4x8xf32>
    %106 = arith.mulf %99, %105 : vector<8x4x8xf32>
    %107 = arith.truncf %106 : vector<8x4x8xf32> to vector<8x4x8xbf16>
    %108 = vector.extract_strided_slice %18 {offsets = [0, 0, 24], sizes = [8, 8, 8], strides = [1, 1, 1]} : vector<8x8x32xbf16> to vector<8x8x8xbf16>
    "tpu.trace_start"() <{level = 10 : i32, message = "bmt,btd->bmd"}> : () -> ()
    %cst_41 = arith.constant dense<0.000000e+00> : vector<8x4x8xf32>
    %109 = tpu.matmul %107, %108, %cst_41 {dimension_numbers = #tpu.dot_dimension_numbers<[2], [1], [1], [2], [0, 0, 0, 1, 1, 2], [0], [0]>} : vector<8x4x8xbf16>, vector<8x8x8xbf16>, vector<8x4x8xf32> -> vector<8x4x8xf32>
    "tpu.trace_stop"() : () -> ()
    %110 = vector.shape_cast %109 : vector<8x4x8xf32> to vector<32x8xf32>
    %111 = arith.truncf %110 : vector<32x8xf32> to vector<32x8xbf16>
    %112 = tpu.concatenate %42, %65, %88, %111 in 1 : vector<32x8xbf16>, vector<32x8xbf16>, vector<32x8xbf16>, vector<32x8xbf16> -> vector<32x32xbf16>
    %cst_42 = arith.constant dense<0.000000e+00> : vector<32x32xf32>
    %113 = tpu.matmul %112, %8, %cst_42 {dimension_numbers = #tpu.dot_dimension_numbers<[1], [0], [0], [1], [0, 0, 1, 1], [], []>} : vector<32x32xbf16>, vector<32x32xbf16>, vector<32x32xf32> -> vector<32x32xf32>
    %114 = vector.broadcast %9 : vector<1x32xf32> to vector<32x32xf32>
    %115 = arith.addf %113, %114 : vector<32x32xf32>
    %116 = vector.shape_cast %115 : vector<32x32xf32> to vector<8x4x32xf32>
    %117 = arith.truncf %116 : vector<8x4x32xf32> to vector<8x4x32xbf16>
    "tpu.trace_start"() <{level = 10 : i32, message = "bme,bte->bmt"}> : () -> ()
    %cst_43 = arith.constant dense<0.000000e+00> : vector<8x4x8xf32>
    %118 = tpu.matmul %117, %19, %cst_43 {dimension_numbers = #tpu.dot_dimension_numbers<[2], [2], [1], [1], [0, 0, 0, 1, 1, 1], [0], [0]>} : vector<8x4x32xbf16>, vector<8x8x32xbf16>, vector<8x4x8xf32> -> vector<8x4x8xf32>
    "tpu.trace_stop"() : () -> ()
    %119 = math.tanh %118 : vector<8x4x8xf32>
    %cst_44 = arith.constant 1.000000e+01 : f32
    %120 = vector.broadcast %cst_44 : f32 to vector<8x4x8xf32>
    %121 = arith.mulf %120, %119 : vector<8x4x8xf32>
    %122 = arith.addf %121, %4 : vector<8x4x8xf32>
    %123 = vector.shape_cast %122 : vector<8x4x8xf32> to vector<8x32xf32>
    %cst_45 = arith.constant dense<0xFF800000> : vector<8xf32>
    %124 = vector.multi_reduction <maximumf>, %123, %cst_45 [1] : vector<8x32xf32> to vector<8xf32>
    %125 = vector.shape_cast %124 : vector<8xf32> to vector<8x1xf32>
    %126 = vector.broadcast %125 : vector<8x1xf32> to vector<8x32xf32>
    %127 = arith.subf %123, %126 : vector<8x32xf32>
    %128 = math.exp %127 : vector<8x32xf32>
    %cst_46 = arith.constant dense<0.000000e+00> : vector<8xf32>
    %129 = vector.multi_reduction <add>, %128, %cst_46 [1] : vector<8x32xf32> to vector<8xf32>
    %130 = vector.shape_cast %129 : vector<8xf32> to vector<8x1xf32>
    %131 = vector.broadcast %130 : vector<8x1xf32> to vector<8x32xf32>
    %132 = arith.divf %128, %131 : vector<8x32xf32>
    %c0_47 = arith.constant 0 : index
    %c0_48 = arith.constant 0 : index
    %133 = vector.load %arg9[%c0_47, %c0_48] : memref<8x32xf32, #tpu.memory_space<vmem>>, vector<8x32xf32>
    tpu.vector_store %arg9[%c0_47, %c0_48], %132 {strides = array<i32>} : memref<8x32xf32, #tpu.memory_space<vmem>>, vector<8x32xf32>,
    return
  }
  func.func @transform_0(%arg0: i32) -> (i32, i32) {
    %c0_i32 = arith.constant 0 : i32
    %c0_i32_0 = arith.constant 0 : i32
    return %arg0, %c0_i32 : i32, i32
  }
  func.func @transform_1(%arg0: i32) -> (i32, i32) {
    %c0_i32 = arith.constant 0 : i32
    %c0_i32_0 = arith.constant 0 : i32
    return %arg0, %c0_i32 : i32, i32
  }
  func.func @transform_2(%arg0: i32) -> (i32, i32, i32) {
    %c0_i32 = arith.constant 0 : i32
    %c0_i32_0 = arith.constant 0 : i32
    %c0_i32_1 = arith.constant 0 : i32
    return %arg0, %c0_i32, %c0_i32_0 : i32, i32, i32
  }
  func.func @transform_3(%arg0: i32) -> (i32, i32) {
    %c0_i32 = arith.constant 0 : i32
    %c0_i32_0 = arith.constant 0 : i32
    %c0_i32_1 = arith.constant 0 : i32
    return %c0_i32, %c0_i32_0 : i32, i32
  }
  func.func @transform_4(%arg0: i32) -> (i32, i32) {
    %c0_i32 = arith.constant 0 : i32
    %c0_i32_0 = arith.constant 0 : i32
    %c0_i32_1 = arith.constant 0 : i32
    return %c0_i32, %c0_i32_0 : i32, i32
  }
  func.func @transform_5(%arg0: i32) -> (i32, i32) {
    %c0_i32 = arith.constant 0 : i32
    %c0_i32_0 = arith.constant 0 : i32
    %c0_i32_1 = arith.constant 0 : i32
    return %c0_i32, %c0_i32_0 : i32, i32
  }
  func.func @transform_6(%arg0: i32) -> (i32, i32) {
    %c0_i32 = arith.constant 0 : i32
    %c0_i32_0 = arith.constant 0 : i32
    %c0_i32_1 = arith.constant 0 : i32
    return %c0_i32, %c0_i32_0 : i32, i32
  }
  func.func @transform_7(%arg0: i32) -> (i32, i32) {
    %c0_i32 = arith.constant 0 : i32
    %c0_i32_0 = arith.constant 0 : i32
    %c0_i32_1 = arith.constant 0 : i32
    return %c0_i32, %c0_i32_0 : i32, i32
  }
  func.func @transform_8(%arg0: i32) -> (i32, i32) {
    %c0_i32 = arith.constant 0 : i32
    %c0_i32_0 = arith.constant 0 : i32
    return %arg0, %c0_i32 : i32, i32
  }
}

</mosaic_0001>

<bundles_post_ra>
// kernel: tpu_custom_call.1
= control target key start
LH: loop header
LB: loop body
LE: loop exit
PB: predicated region body
PF: predicated region fallthrough
CT: control target
= control target key end

     0   :  { %13 = vsyncpa [#allocation3], 0  ;;  %s7801_s0 = inlined_call_operand.vmem [shape: f32[64,32], index: 0, kind: input, shape index: {}]   ;;  %s7802_s1 = inlined_call_operand.vmem [shape: f32[128,32], index: 1, kind: input, shape index: {}]   ;;  %s7803_s2 = inlined_call_operand.vmem [shape: f32[16,4,8], index: 2, kind: input, shape index: {}]   ;;  %s7804_s3 = inlined_call_operand.vmem [shape: bf16[32,32], index: 3, kind: input, shape index: {}]   ;;  %s7805_s4 = inlined_call_operand.vmem [shape: bf16[32,32], index: 4, kind: input, shape index: {}]   ;;  %s7806_s5 = inlined_call_operand.vmem [shape: bf16[32,32], index: 5, kind: input, shape index: {}]   ;;  %s7807_s6 = inlined_call_operand.vmem [shape: bf16[32,32], index: 6, kind: input, shape index: {}]   ;;  %s7808_s7 = inlined_call_operand.vmem [shape: f32[1,32], index: 7, kind: input, shape index: {}]   ;;  %s7809_s8 = inlined_call_operand.hbm [shape: f32[16,32], index: 8, kind: output, shape index: {}]  }
   0x1   :  { %15 = vsyncpa [#allocation3 + $0x1], 0  ;;  %s6521_s27 = smov 0   ;;  %s6523_s28 = smov 0  }
   0x2   :  { %s6525_s29 = smov 0   ;;  %s6527_s30 = smov 0  }
   0x3 LB: > { %s6542_s9 = sadd.s32 4294967295, %s6463_s30   ;;  %s5412_s10 = sadd.s32 4294967294, %s6463_s30   ;;  %s6463_s30 = sphi %s6527_s30, %s7818_s30   ;;  %s6459_s29 = sphi %s6525_s29, %s7817_s29   ;;  %s6455_s28 = sphi %s6523_s28, %s7816_s28   ;;  %s6451_s27 = sphi %s6521_s27, %s7815_s27  }
   0x4   : > { %s6546_s11 = sadd.s32 1, %s6463_s30   ;;  %s211_s12 = sadd.s32 1, %s6459_s29 }
   0x5   : > { %s208_s13 = ssub.s32 %s6463_s30, %s6546_s11  ;;  %p221_p0 = scmp.ne.s32.totalorder %s6459_s29, %s6455_s28 }
   0x6   : > { %p209_p1 = scmp.eq.s32.totalorder %s208_s13, 0  ;;  %p222_p2 = scmp.eq.s32.totalorder %s6542_s9, 1 }
   0x7   : > { %p227_p3 = scmp.ne.s32.totalorder %s6455_s28, %s6451_s27  ;;  %p228_p4 = scmp.eq.s32.totalorder %s5412_s10, 1 }
   0x8   : > { %s6557_s14 = scalar_select %p209_p1, %s6459_s29, %s211_s12  }
   0x9   : > { %p6559_p5 = por %p222_p2, %p221_p0  ;;  %p6563_p6 = por %p228_p4, %p227_p3 }
   0xa   : > { %p5415_p7 = scmp.ge.s32.totalorder %s6463_s30, 1  ;;  %p288_p8 = scmp.lt.s32.totalorder %s6463_s30, 3 }
   0xc   : > { %p289_p9 = pnand %p5415_p7, %p288_p8 }
   0xd   : > { %v6221_v0 = vld [vmem:[%s7805_s4] sm:$0xff] (!%p289_p9)   ;;  %s5419_s19 = sshll.u32 (!%p289_p9), %s6542_s9, 3  ;;  %v6222_v1 = vld [vmem:[%s7805_s4 + $0x8] sm:$0xff] (!%p289_p9)   ;;  %s5417_s26 = sshll.u32 (!%p289_p9), %s6542_s9, 2  ;;  %vm406_vm0 = vcmask (!%p289_p9), 261120   ;;  %v7810_v24 = vmov (!%p289_p9), 0.0  }
   0xe   : > { %292 = sbr.rel (%p289_p9) target bundleno = 4110 (0x100e), region = 52  ;;  %p339_p10 = scmp.lt.s32.totalorder (!%p289_p9), %s5419_s19, 15  ;;  %5708 = vmatprep.subr.bf16.mxu1 (!%p289_p9), %v6221_v0  ;;  %v6223_v2 = vld [vmem:[%s7804_s3] sm:$0xff] (!%p289_p9)   ;;  %v6224_v3 = vld [vmem:[%s7804_s3 + $0x8] sm:$0xff] (!%p289_p9)   ;;  %vm6466_vm1 = vmmov (!%p289_p9), 0   ;;  %vm684_vm2 = vcmask (!%p289_p9), 64512  }
   0xf   : > { %5709 = vmatpush3.bf16.msra.mxu1 (!%p289_p9), %v6221_v0  ;;  %5700 = vmatprep.subr.bf16.mxu0 (!%p289_p9), %v6223_v2  ;;  %p333_p11 = scmp.lt.s32.totalorder (!%p289_p9), %s5417_s26, 7  ;;  %v6225_v4 = vld [vmem:[%s7806_s5] sm:$0xff] (!%p289_p9)   ;;  %v6226_v22 = vld [vmem:[%s7806_s5 + $0x8] sm:$0xff] (!%p289_p9)   ;;  %vm1078_vm3 = vcmask (!%p289_p9), 1043456   ;;  %vm1053_vm4 = vcmask (!%p289_p9), 60416   ;;  %s6468_s20 = smov (!%p289_p9), 112  }
  0x10   : > { %5710 = vmatprep.subr.bf16.mxu1 (!%p289_p9), %v6222_v1  ;;  %5701 = vmatpush3.bf16.msra.mxu0 (!%p289_p9), %v6223_v2  ;;  %s6470_s22 = smov (!%p289_p9), 8   ;;  %s6471_s23 = smov (!%p289_p9), 16   ;;  %vm4727_vm5 = vcmask (!%p289_p9), 130048   ;;  %vm4732_vm6 = vcmask (!%p289_p9), 195584  }
  0x11   : > { %5702 = vmatprep.subr.bf16.mxu0 (!%p289_p9), %v6224_v3  ;;  %s6472_s12 = smov (!%p289_p9), 24  }
  0x13   : > { %5711 = vmatpush3.bf16.msra.mxu1 (!%p289_p9), %v6222_v1 }
  0x14   : > { %5703 = vmatpush3.bf16.msra.mxu0 (!%p289_p9), %v6224_v3  ;;  %5732 = vmatprep.subr.bf16.mxu1 (!%p289_p9), %v7810_v24 }
  0x15   : > { %s7820_s19 = smov (!%p339_p10, %s5419_s19), 15  ;;  %s7822_s26 = smov (!%p333_p11, %s5417_s26), 7  ;;  %5720 = vmatprep.subr.bf16.mxu0 %v6225_v4 }
  0x16   : > { %s5420_s10 = sshll.u32 %s7820_s19, 3  ;;  %s5418_s21 = sshll.u32 %s7822_s26, 3 }
  0x17   : > { %s6589_s17 = scalar_lea.vmem %s7802_s1, %s5420_s10  ;;  %s336_s24 = scalar_lea.vmem %s7801_s0, %s5418_s21 }
  0x18   : > { %v357_v5 = vld [vmem:[%s6589_s17] sm:$0xff]  ;;  %v358_v6 = vld [vmem:[%s6589_s17 + $0x8] sm:$0xff]  ;;  %v359_v7 = vld [vmem:[%s6589_s17 + $0x10] sm:$0xff]  ;;  %s5422_s26 = sshll.u32 %s7820_s19, 2  ;;  %s6467_s19 = smov 120  }
  0x19   : > { %v365_v8 = vpack.c.bf16 %v358_v6, %v357_v5  ;;  %v360_v9 = vld [vmem:[%s6589_s17 + $0x18] sm:$0xff]  ;;  %v361_v10 = vld [vmem:[%s6589_s17 + $0x20] sm:$0xff]  ;;  %v362_v11 = vld [vmem:[%s6589_s17 + $0x28] sm:$0xff]  ;;  %s6738_s18 = scalar_lea.vmem %s7803_s2, %s5422_s26  ;;  %s6469_s21 = smov 104  }
  0x1a   : > { %v366_v12 = vpack.c.bf16 %v360_v9, %v359_v7  ;;  %v367_v13 = vpack.c.bf16 %v362_v11, %v361_v10  ;;  %v363_v14 = vld [vmem:[%s6589_s17 + $0x30] sm:$0xff]  ;;  %v364_v15 = vld [vmem:[%s6589_s17 + $0x38] sm:$0xff]  ;;  %v351_v16 = vld [vmem:[%s336_s24] sm:$0xff] }
  0x1b   : > { %5712 = vmatprep.mubr.msk.bf16.mxu1 %vm406_vm0, %v365_v8  ;;  %v352_v17 = vld [vmem:[%s336_s24 + $0x8] sm:$0xff]  ;;  %v353_v18 = vld [vmem:[%s336_s24 + $0x10] sm:$0xff]  ;;  %v354_v20 = vld [vmem:[%s336_s24 + $0x18] sm:$0xff]  ;;  %v368_v23 = vpack.c.bf16 %v364_v15, %v363_v14 }
  0x1c   : > { %5713 = vmatmul.mubr.msk.bf16.vlgmr.msra.gmra.mrb[0].mxu1 %vm406_vm0, %v366_v12  ;;  %v355_v19 = vpack.c.bf16 %v352_v17, %v351_v16  ;;  %v356_v21 = vpack.c.bf16 %v354_v20, %v353_v18  ;;  %v6744_v15 = vld [vmem:[%s6738_s18 + $0x4] sm:$0xf] }
  0x1d   : > { %5716 = vmatprep.mubr.msk.bf16.mxu1 %vm406_vm0, %v367_v13 }
  0x1e   : > { %5704 = vmatprep.mubr.msk.bf16.mxu0 %vm406_vm0, %v355_v19 }
  0x1f   : > { %5705 = vmatmul.mubr.msk.bf16.vlgmr.msra.gmra.mrb[0].mxu0 %vm406_vm0, %v356_v21 }
  0x20   : > { %5721 = vmatpush3.bf16.msra.mxu0 %v6225_v4  ;;  %5724 = vmatprep.mubr.msk.bf16.mxu0 %vm406_vm0, %v365_v8 }
  0x21   : > { %5722 = vmatprep.subr.bf16.mxu0 %v6226_v22 }
  0x24   : > { %5717 = vmatmul.mubr.msk.bf16.gmra.mrb[4].mxu1 %vm406_vm0, %v368_v23  ;;  %5723 = vmatpush3.bf16.msra.mxu0 %v6226_v22 }
  0x25   : > { %5738 = vmatprep.subr.bf16.mxu0 %v7810_v24  ;;  %5734 = vmatprep.mubr.msk.bf16.mxu1 %vm6466_vm1, %v7810_v24 }
  0x27   : > { %5725 = vmatmul.mubr.msk.bf16.vlgmr.msra.gmra.mrb[4].mxu0 %vm406_vm0, %v366_v12 }
  0x28   : > { %5728 = vmatprep.mubr.msk.bf16.mxu0 %vm406_vm0, %v367_v13  ;;  %v6741_v13 = vld [vmem:[%s6738_s18] sm:$0xf] }
  0x2f   : > { %5729 = vmatmul.mubr.msk.bf16.gmra.mrb[8].mxu0 %vm406_vm0, %v368_v23 }
  0x30   : > { %5740 = vmatprep.mubr.msk.bf16.mxu0 %vm6466_vm1, %v7810_v24 }
  0xef   : > { %v5714_v25 = vpop.f32.mrb[0].mxu1 }
  0xf0   : > { %v520_v26 = vpop.f32.mrb[1].mxu1  ;;  %v6633_v37 = vpack.c.bf16 %v5714_v25, %v5714_v25 }
  0xf1   : > { %v6624_v27 = vpack.c.bf16 %v520_v26, %v520_v26  ;;  %v5715_v28 = vpop.f32.mrb[2].mxu1 }
  0xf2   : > { %v523_v29 = vpop.f32.mrb[3].mxu1  ;;  %v5706_v32 = vpop.f32.mrb[0].mxu0  ;;  %v6638_v42 = vpack.c.bf16 %v5715_v28, %v5715_v28  ;;  %v781_v46 = vsel %vm684_vm2, %v6633_v37, 0  ;;  %v6755_v28 = vld [vmem:[%s6738_s18 + $0x8] sm:$0xf] }
  0xf3   : > { %v6626_v30 = vpack.c.bf16 %v523_v29, %v523_v29  ;;  %v689_v31 = vsel %vm684_vm2, %v6624_v27, 0  ;;  %v447_v34 = vpop.f32.mrb[1].mxu0  ;;  %v634_v60 = vcombine.high %v5706_v32, %v5706_v32  ;;  %v6686_v62 = vpack.c.bf16 %v5706_v32, %v5706_v32  ;;  %v6760_v32 = vld [vmem:[%s6738_s18 + $0xc] sm:$0xf] }
  0xf4   : > { %5733 = vmatpush3.bf16.xpose.msra.mxu1 %v689_v31  ;;  %v632_v35 = vcombine.high %v447_v34, %v447_v34  ;;  %v5707_v36 = vpop.f32.mrb[2].mxu0  ;;  %v6635_v38 = vpack.c.bf16 %v447_v34, %v447_v34  ;;  %v827_v48 = vsel %vm684_vm2, %v6638_v42, 0 }
  0xf5   : > { %v735_v33 = vsel %vm684_vm2, %v6626_v30, 0  ;;  %5744 = vmatprep.subr.bf16.mxu1 %v7810_v24  ;;  %v450_v39 = vpop.f32.mrb[3].mxu0  ;;  %v6690_v0 = vpack.c.bf16 %v634_v60, %v634_v60  ;;  %v635_v3 = vcombine.high %v5707_v36, %v5707_v36  ;;  %v6706_v4 = vpack.c.bf16 %v5707_v36, %v5707_v36 }
  0xf6   : > { %5739 = vmatpush3.bf16.xpose.msra.mxu0 %v735_v33  ;;  %v6640_v43 = vpack.c.bf16 %v632_v35, %v632_v35  ;;  %v633_v52 = vcombine.high %v450_v39, %v450_v39  ;;  %v6662_v54 = vpack.c.bf16 %v450_v39, %v450_v39 }
  0xf7   : > { %5750 = vmatprep.subr.bf16.mxu0 %v7810_v24  ;;  %v5718_v40 = vpop.f32.mrb[4].mxu1  ;;  %v6708_v5 = vpack.c.bf16 %v635_v3, %v635_v3 }
  0xf8   : > { %v536_v41 = vpop.f32.mrb[5].mxu1  ;;  %v6668_v57 = vpack.c.bf16 %v633_v52, %v633_v52  ;;  %v6683_v61 = vpack.c.bf16 %v5718_v40, %v5718_v40 }
  0xf9   : > { %v5719_v44 = vpop.f32.mrb[6].mxu1  ;;  %v6654_v49 = vpack.c.bf16 %v536_v41, %v536_v41 }
  0xfa   : > { %v539_v45 = vpop.f32.mrb[7].mxu1  ;;  %v6648_v47 = vpop.f32.mrb[4].mxu0  ;;  %v6688_v63 = vpack.c.bf16 %v5719_v44, %v5719_v44  ;;  %v965_v1 = vsel %vm684_vm2, %v6683_v61, 0 }
  0xfb   : > { %5735 = vmatmul.mubr.msk.bf16.vlgmr.msra.gmra.mrb[8].mxu1 %vm684_vm2, %v6635_v38  ;;  %v597_v50 = vpop.f32.mrb[5].mxu0  ;;  %v6664_v55 = vpack.c.bf16 %v539_v45, %v539_v45  ;;  %v873_v56 = vsel %vm684_vm2, %v6654_v49, 0 }
  0xfc   : > { %5745 = vmatpush3.bf16.xpose.msra.mxu1 %v781_v46  ;;  %5746 = vmatprep.mubr.msk.bf16.mxu1 %vm6466_vm1, %v7810_v24  ;;  %v6659_v51 = vpop.f32.mrb[6].mxu0  ;;  %v1011_v2 = vsel %vm684_vm2, %v6688_v63, 0  ;;  %v6718_v6 = vpack.c.bf16 %v597_v50, %v597_v50 }
  0xfd   : > { %5741 = vmatmul.mubr.msk.bf16.vlgmr.msra.gmra.mrb[12].mxu0 %vm684_vm2, %v6640_v43  ;;  %5756 = vmatprep.subr.bf16.mxu1 %v7810_v24  ;;  %v600_v53 = vpop.f32.mrb[7].mxu0  ;;  %v919_v59 = vsel %vm684_vm2, %v6664_v55, 0 }
  0xfe   : > { %5751 = vmatpush3.bf16.xpose.msra.mxu0 %v827_v48  ;;  %5752 = vmatprep.mubr.msk.bf16.mxu0 %vm6466_vm1, %v7810_v24  ;;  %v6720_v7 = vpack.c.bf16 %v600_v53, %v600_v53  ;;  %v1267_v8 = vsel %vm1078_vm3, %v6718_v6, 0  ;;  %v6771_v48 = vld [vmem:[%s6738_s18 + $0x10] sm:$0xf]  ;;  %v6776_v53 = vld [vmem:[%s6738_s18 + $0x14] sm:$0xf] }
  0xff   : > { %5762 = vmatprep.subr.bf16.mxu0 %v7810_v24 }
 0x100   : > { %v1313_v9 = vsel %vm1078_vm3, %v6720_v7, 0 }
 0x102   : > { %v6674_v58 = vpop.f32.mrb[8].mxu0 }
 0x103   : > { %5747 = vmatmul.mubr.msk.bf16.vlgmr.msra.gmra.mrb[12].mxu1 %vm684_vm2, %v6662_v54  ;;  %v6728_v10 = vpop.f32.mrb[9].mxu0 }
 0x104   : > { %5757 = vmatpush3.bf16.xpose.msra.mxu1 %v873_v56  ;;  %5758 = vmatprep.mubr.msk.bf16.mxu1 %vm6466_vm1, %v7810_v24  ;;  %v6730_v11 = vpop.f32.mrb[10].mxu0 }
 0x105   : > { %5753 = vmatmul.mubr.msk.bf16.vlgmr.msra.gmra.mrb[16].mxu0 %vm684_vm2, %v6668_v57  ;;  %5768 = vmatprep.subr.bf16.mxu1 %v7810_v24  ;;  %v6732_v12 = vpop.f32.mrb[11].mxu0 }
 0x106   : > { %5763 = vmatpush3.bf16.xpose.msra.mxu0 %v919_v59  ;;  %5764 = vmatprep.mubr.msk.bf16.mxu0 %vm6466_vm1, %v7810_v24 }
 0x107   : > { %5774 = vmatprep.subr.bf16.mxu0 %v7810_v24 }
 0x10b   : > { %5759 = vmatmul.mubr.msk.bf16.vlgmr.msra.gmra.mrb[16].mxu1 %vm684_vm2, %v6686_v62 }
 0x10c   : > { %5769 = vmatpush3.bf16.xpose.msra.mxu1 %v965_v1  ;;  %5770 = vmatprep.mubr.msk.bf16.mxu1 %vm6466_vm1, %v7810_v24 }
 0x10d   : > { %5765 = vmatmul.mubr.msk.bf16.vlgmr.msra.gmra.mrb[20].mxu0 %vm684_vm2, %v6690_v0  ;;  %5780 = vmatprep.subr.bf16.mxu1 %v7810_v24 }
 0x10e   : > { %5775 = vmatpush3.bf16.xpose.msra.mxu0 %v1011_v2  ;;  %5776 = vmatprep.mubr.msk.bf16.mxu0 %vm6466_vm1, %v7810_v24 }
 0x10f   : > { %5786 = vmatprep.subr.bf16.mxu0 %v7810_v24 }
 0x113   : > { %5771 = vmatmul.mubr.msk.bf16.vlgmr.msra.gmra.mrb[20].mxu1 %vm684_vm2, %v6706_v4 }
 0x114   : > { %5782 = vmatprep.mubr.msk.bf16.mxu1 %vm6466_vm1, %v7810_v24  ;;  %5781 = vmatpush3.bf16.msra.mxu1 %v1267_v8 }
 0x115   : > { %5777 = vmatmul.mubr.msk.bf16.vlgmr.msra.gmra.mrb[24].mxu0 %vm684_vm2, %v6708_v5  ;;  %5792 = vmatprep.subr.bf16.mxu1 %v7810_v24 }
 0x116   : > { %5788 = vmatprep.mubr.msk.bf16.mxu0 %vm6466_vm1, %v7810_v24  ;;  %5787 = vmatpush3.bf16.msra.mxu0 %v1313_v9 }
 0x117   : > { %5798 = vmatprep.subr.bf16.mxu0 %v7810_v24 }
 0x1ce   : > { %v725_v14 = vpop.f32.mrb[8].mxu1 }
 0x1cf   : > { %v6747_v16 = vadd.f32 %v725_v14, %v6741_v13  ;;  %v5736_v17 = vpop.f32.mrb[9].mxu1 }
 0x1d0   : > { %v771_v18 = vpop.f32.mrb[12].mxu0  ;;  %v728_v19 = vpop.f32.mrb[10].mxu1 }
 0x1d1   : > { %v1054_v20 = vsel %vm1053_vm4, %v6747_v16, -inf  ;;  %v6752_v21 = vadd.f32 %v771_v18, %v6744_v15  ;;  %v5737_v22 = vpop.f32.mrb[11].mxu1  ;;  %v5742_v23 = vpop.f32.mrb[13].mxu0  ;;  %v6789_v19 = vld [vmem:[%s6738_s18 + $0x18] sm:$0xf] }
 0x1d2   : > { %1055 = vmax.xlane.f32.xlu0 %v1054_v20  ;;  %v774_v25 = vpop.f32.mrb[14].mxu0  ;;  %v6792_v22 = vld [vmem:[%s6738_s18 + $0x1c] sm:$0xf] }
 0x1d3   : > { %v5743_v26 = vpop.f32.mrb[15].mxu0  ;;  %v1057_v29 = vsel %vm1053_vm4, %v6752_v21, -inf }
 0x1d6   : > { %v817_v31 = vpop.f32.mrb[12].mxu1  ;;  %1058 = vmax.xlane.f32.xlu0 %v1057_v29 }
 0x1d7   : > { %v6763_v33 = vadd.f32 %v817_v31, %v6755_v28  ;;  %v5748_v34 = vpop.f32.mrb[13].mxu1 }
 0x1d8   : > { %v820_v35 = vpop.f32.mrb[14].mxu1  ;;  %v863_v36 = vpop.f32.mrb[16].mxu0 }
 0x1d9   : > { %v6766_v39 = vadd.f32 %v863_v36, %v6760_v32  ;;  %v5749_v40 = vpop.f32.mrb[15].mxu1  ;;  %v5754_v41 = vpop.f32.mrb[17].mxu0  ;;  %v1060_v44 = vsel %vm1053_vm4, %v6763_v33, -inf }
 0x1da   : > { %1061 = vmax.xlane.f32.xlu1 %v1060_v44  ;;  %v866_v45 = vpop.f32.mrb[18].mxu0 }
 0x1db   : > { %v5755_v46 = vpop.f32.mrb[19].mxu0  ;;  %v1063_v50 = vsel %vm1053_vm4, %v6766_v39, -inf }
 0x1de   : > { %v909_v52 = vpop.f32.mrb[16].mxu1  ;;  %1064 = vmax.xlane.f32.xlu1 %v1063_v50 }
 0x1df   : > { %v6779_v56 = vadd.f32 %v909_v52, %v6771_v48  ;;  %v5760_v59 = vpop.f32.mrb[17].mxu1 }
 0x1e0   : > { %v912_v60 = vpop.f32.mrb[18].mxu1  ;;  %v955_v1 = vpop.f32.mrb[20].mxu0 }
 0x1e1   : > { %v6782_v2 = vadd.f32 %v955_v1, %v6776_v53  ;;  %v5761_v3 = vpop.f32.mrb[19].mxu1  ;;  %v5766_v8 = vpop.f32.mrb[21].mxu0  ;;  %v1066_v9 = vsel %vm1053_vm4, %v6779_v56, -inf }
 0x1e2   : > { %1067 = vmax.xlane.f32.xlu0 %v1066_v9  ;;  %v958_v14 = vpop.f32.mrb[22].mxu0 }
 0x1e3   : > { %v5767_v17 = vpop.f32.mrb[23].mxu0  ;;  %v1069_v18 = vsel %vm1053_vm4, %v6782_v2, -inf }
 0x1e4   : > { %1070 = vmax.xlane.f32.xlu1 %v1069_v18 }
 0x1e6   : > { %v1001_v20 = vpop.f32.mrb[20].mxu1 }
 0x1e7   : > { %v6795_v23 = vadd.f32 %v1001_v20, %v6789_v19  ;;  %v5772_v25 = vpop.f32.mrb[21].mxu1 }
 0x1e8   : > { %v1004_v26 = vpop.f32.mrb[22].mxu1  ;;  %v1047_v29 = vpop.f32.mrb[24].mxu0 }
 0x1e9   : > { %v6798_v31 = vadd.f32 %v1047_v29, %v6792_v22  ;;  %v5773_v34 = vpop.f32.mrb[23].mxu1  ;;  %v5778_v35 = vpop.f32.mrb[25].mxu0  ;;  %v1072_v36 = vsel %vm1053_vm4, %v6795_v23, -inf }
 0x1ea   : > { %1073 = vmax.xlane.f32.xlu0 %v1072_v36  ;;  %v1050_v40 = vpop.f32.mrb[26].mxu0 }
 0x1eb   : > { %v5779_v41 = vpop.f32.mrb[27].mxu0  ;;  %v1075_v44 = vsel %vm1053_vm4, %v6798_v31, -inf }
 0x1ec   : > { %1076 = vmax.xlane.f32.xlu1 %v1075_v44 }
 0x25f   : > { %v1056_v45 = vpop.xlane.xlu0 %1055 }
 0x260   : > { %v1079_v46 = vsel %vm1078_vm3, %v1056_v45, -inf }
 0x261   : > { %v1080_v50 = vrot.slane %v1079_v46, 4 }
 0x263   : > { %v1081_v52 = vmax.f32 %v1079_v46, %v1080_v50  ;;  %v1059_v59 = vpop.xlane.xlu0 %1058 }
 0x264   : > { %v1086_v60 = vsel %vm1078_vm3, %v1059_v59, -inf }
 0x265   : > { %v1082_v1 = vrot.slane %v1081_v52, 2  ;;  %v1087_v3 = vrot.slane %v1086_v60, 4 }
 0x267   : > { %v1083_v8 = vmax.f32 %v1081_v52, %v1082_v1  ;;  %v1088_v9 = vmax.f32 %v1086_v60, %v1087_v3  ;;  %v1062_v14 = vpop.xlane.xlu1 %1061 }
 0x268   : > { %v1093_v17 = vsel %vm1078_vm3, %v1062_v14, -inf }
 0x269   : > { %v1084_v18 = vrot.slane %v1083_v8, 1  ;;  %v1089_v20 = vrot.slane %v1088_v9, 2  ;;  %v1094_v25 = vrot.slane %v1093_v17, 4 }
 0x26b   : > { %v1085_v26 = vmax.f32 %v1083_v8, %v1084_v18  ;;  %v1090_v29 = vmax.f32 %v1088_v9, %v1089_v20  ;;  %v1095_v34 = vmax.f32 %v1093_v17, %v1094_v25  ;;  %v1065_v35 = vpop.xlane.xlu1 %1064 }
 0x26c   : > { %v1100_v36 = vsel %vm1078_vm3, %v1065_v35, -inf }
 0x26d   : > { %v1135_v40 = vsub.f32 %v6747_v16, %v1085_v26  ;;  %v1091_v41 = vrot.slane %v1090_v29, 1  ;;  %v1096_v44 = vrot.slane %v1095_v34, 2  ;;  %v1101_v45 = vrot.slane %v1100_v36, 4 }
 0x26f   : > { %v1143_v46 = vmul.f32 1.442695, %v1135_v40  ;;  %v1092_v50 = vmax.f32 %v1090_v29, %v1091_v41  ;;  %v1097_v52 = vmax.f32 %v1095_v34, %v1096_v44  ;;  %v1102_v59 = vmax.f32 %v1100_v36, %v1101_v45  ;;  %v1068_v60 = vpop.xlane.xlu0 %1067 }
 0x270   : > { %v1107_v1 = vsel %vm1078_vm3, %v1068_v60, -inf }
 0x271   : > { %6229 = vpow2.f32 %v1143_v46  ;;  %v1136_v3 = vsub.f32 %v6752_v21, %v1092_v50  ;;  %v1098_v8 = vrot.slane %v1097_v52, 1  ;;  %v1103_v9 = vrot.slane %v1102_v59, 2  ;;  %v1071_v14 = vpop.xlane.xlu1 %1070 }
 0x272   : > { %v1108_v17 = vrot.slane %v1107_v1, 4  ;;  %v1114_v18 = vsel %vm1078_vm3, %v1071_v14, -inf }
 0x273   : > { %v1145_v16 = vmul.f32 1.442695, %v1136_v3  ;;  %v1099_v20 = vmax.f32 %v1097_v52, %v1098_v8  ;;  %v1104_v25 = vmax.f32 %v1102_v59, %v1103_v9  ;;  %v1115_v26 = vrot.slane %v1114_v18, 4 }
 0x274   : > { %v1109_v35 = vmax.f32 %v1107_v1, %v1108_v17 }
 0x275   : > { %6231 = vpow2.f32 %v1145_v16  ;;  %v1137_v29 = vsub.f32 %v6763_v33, %v1099_v20  ;;  %v1105_v34 = vrot.slane %v1104_v25, 1  ;;  %v1116_v36 = vmax.f32 %v1114_v18, %v1115_v26 }
 0x276   : > { %v1110_v40 = vrot.slane %v1109_v35, 2 }
 0x277   : > { %v1147_v41 = vmul.f32 1.442695, %v1137_v29  ;;  %v1106_v44 = vmax.f32 %v1104_v25, %v1105_v34  ;;  %v1117_v21 = vrot.slane %v1116_v36, 2  ;;  %v1074_v45 = vpop.xlane.xlu0 %1073 }
 0x278   : > { %v1111_v46 = vmax.f32 %v1109_v35, %v1110_v40  ;;  %v1121_v50 = vsel %vm1078_vm3, %v1074_v45, -inf }
 0x279   : > { %6233 = vpow2.f32 %v1147_v41  ;;  %v1138_v60 = vsub.f32 %v6766_v39, %v1106_v44  ;;  %v1118_v52 = vmax.f32 %v1116_v36, %v1117_v21  ;;  %v1122_v59 = vrot.slane %v1121_v50, 4  ;;  %v1077_v3 = vpop.xlane.xlu1 %1076 }
 0x27a   : > { %v1112_v1 = vrot.slane %v1111_v46, 1  ;;  %v1128_v8 = vsel %vm1078_vm3, %v1077_v3, -inf }
 0x27b   : > { %v6816_v33 = vpop.eup %6229  ;;  %v1149_v9 = vmul.f32 1.442695, %v1138_v60  ;;  %v1119_v14 = vrot.slane %v1118_v52, 1  ;;  %v1123_v17 = vmax.f32 %v1121_v50, %v1122_v59  ;;  %v1129_v18 = vrot.slane %v1128_v8, 4 }
 0x27c   : > { %v1113_v16 = vmax.f32 %v1111_v46, %v1112_v1  ;;  %v1159_v20 = vsel %vm1053_vm4, %v6816_v33, 0.0 }
 0x27d   : > { %6235 = vpow2.f32 %v1149_v9  ;;  %v1120_v25 = vmax.f32 %v1118_v52, %v1119_v14  ;;  %v1124_v26 = vrot.slane %v1123_v17, 2  ;;  %v1130_v39 = vmax.f32 %v1128_v8, %v1129_v18  ;;  %1160 = vadd.xlane.f32.xlu0 %v1159_v20 }
 0x27e   : > { %v1139_v35 = vsub.f32 %v6779_v56, %v1113_v16 }
 0x27f   : > { %v6821_v29 = vpop.eup %6231  ;;  %v1140_v34 = vsub.f32 %v6782_v2, %v1120_v25  ;;  %v1125_v36 = vmax.f32 %v1123_v17, %v1124_v26  ;;  %v1131_v40 = vrot.slane %v1130_v39, 2 }
 0x280   : > { %v1151_v41 = vmul.f32 1.442695, %v1139_v35  ;;  %v1162_v44 = vsel %vm1053_vm4, %v6821_v29, 0.0 }
 0x281   : > { %v1153_v21 = vmul.f32 1.442695, %v1140_v34  ;;  %v1126_v45 = vrot.slane %v1125_v36, 1  ;;  %v1132_v46 = vmax.f32 %v1130_v39, %v1131_v40  ;;  %1163 = vadd.xlane.f32.xlu1 %v1162_v44 }
 0x282   : > { %6237 = vpow2.f32 %v1151_v41 }
 0x283   : > { %v6826_v50 = vpop.eup %6233  ;;  %6239 = vpow2.f32 %v1153_v21  ;;  %v1127_v60 = vmax.f32 %v1125_v36, %v1126_v45  ;;  %v1133_v56 = vrot.slane %v1132_v46, 1 }
 0x284   : > { %v1165_v52 = vsel %vm1053_vm4, %v6826_v50, 0.0 }
 0x285   : > { %v1141_v2 = vsub.f32 %v6795_v23, %v1127_v60  ;;  %v1134_v59 = vmax.f32 %v1132_v46, %v1133_v56  ;;  %1166 = vadd.xlane.f32.xlu0 %v1165_v52 }
 0x287   : > { %v6831_v3 = vpop.eup %6235  ;;  %v1155_v1 = vmul.f32 1.442695, %v1141_v2  ;;  %v1142_v8 = vsub.f32 %v6798_v31, %v1134_v59 }
 0x288   : > { %v1168_v9 = vsel %vm1053_vm4, %v6831_v3, 0.0 }
 0x289   : > { %6241 = vpow2.f32 %v1155_v1  ;;  %v1157_v14 = vmul.f32 1.442695, %v1142_v8  ;;  %1169 = vadd.xlane.f32.xlu1 %v1168_v9 }
 0x28b   : > { %6243 = vpow2.f32 %v1157_v14 }
 0x28c   : > { %v6836_v17 = vpop.eup %6237 }
 0x28d   : > { %v6838_v18 = vpop.eup %6239  ;;  %v1171_v23 = vsel %vm1053_vm4, %v6836_v17, 0.0 }
 0x28e   : > { %1172 = vadd.xlane.f32.xlu0 %v1171_v23  ;;  %v1174_v16 = vsel %vm1053_vm4, %v6838_v18, 0.0 }
 0x28f   : > { %1175 = vadd.xlane.f32.xlu1 %v1174_v16 }
 0x293   : > { %v6844_v31 = vpop.eup %6241 }
 0x294   : > { %v1177_v20 = vsel %vm1053_vm4, %v6844_v31, 0.0 }
 0x295   : > { %v6848_v25 = vpop.eup %6243  ;;  %1178 = vadd.xlane.f32.xlu0 %v1177_v20 }
 0x296   : > { %v1180_v26 = vsel %vm1053_vm4, %v6848_v25, 0.0 }
 0x297   : > { %1181 = vadd.xlane.f32.xlu1 %v1180_v26 }
 0x2a8   : > { %1705 = vrot.lane.b32.xlu1 %v6626_v30, %s6467_s19 }
 0x2ab   : > { %1653 = vrot.lane.b32.xlu0 %v6624_v27, %s6467_s19 }
 0x2ac   : > { %1650 = vrot.lane.b32.xlu1 %v6635_v38, %s6467_s19 }
 0x2af   : > { %1757 = vrot.lane.b32.xlu0 %v6633_v37, %s6467_s19 }
 0x2b0   : > { %1702 = vrot.lane.b32.xlu1 %v6640_v43, %s6467_s19 }
 0x2b3   : > { %1754 = vrot.lane.b32.xlu0 %v6662_v54, %s6467_s19 }
 0x2b4   : > { %1809 = vrot.lane.b32.xlu1 %v6638_v42, %s6467_s19 }
 0x2b7   : > { %1861 = vrot.lane.b32.xlu0 %v6654_v49, %s6467_s19 }
 0x2b8   : > { %1806 = vrot.lane.b32.xlu1 %v6668_v57, %s6467_s19 }
 0x2bb   : > { %1858 = vrot.lane.b32.xlu0 %v6686_v62, %s6467_s19 }
 0x2bc   : > { %1913 = vrot.lane.b32.xlu1 %v6664_v55, %s6467_s19 }
 0x2bf   : > { %1965 = vrot.lane.b32.xlu0 %v6683_v61, %s6467_s19 }
 0x2c0   : > { %1910 = vrot.lane.b32.xlu1 %v6690_v0, %s6467_s19 }
 0x2c3   : > { %1962 = vrot.lane.b32.xlu0 %v6706_v4, %s6467_s19 }
 0x2c4   : > { %2017 = vrot.lane.b32.xlu1 %v6688_v63, %s6467_s19 }
 0x2c8   : > { %2014 = vrot.lane.b32.xlu1 %v6708_v5, %s6467_s19 }
 0x30a   : > { %v1161_v39 = vpop.xlane.xlu0 %1160 }
 0x30b   : > { %v1183_v35 = vsel %vm1078_vm3, %v1161_v39, 0.0 }
 0x30c   : > { %v1184_v34 = vrot.slane %v1183_v35, 4 }
 0x30e   : > { %v1185_v36 = vadd.f32 %v1184_v34, %v1183_v35  ;;  %v1164_v40 = vpop.xlane.xlu1 %1163 }
 0x30f   : > { %v1190_v41 = vsel %vm1078_vm3, %v1164_v40, 0.0 }
 0x310   : > { %v1186_v44 = vrot.slane %v1185_v36, 2  ;;  %v1191_v21 = vrot.slane %v1190_v41, 4 }
 0x312   : > { %v1187_v45 = vadd.f32 %v1186_v44, %v1185_v36  ;;  %v1192_v46 = vadd.f32 %v1191_v21, %v1190_v41  ;;  %v1167_v60 = vpop.xlane.xlu0 %1166 }
 0x313   : > { %v1197_v56 = vsel %vm1078_vm3, %v1167_v60, 0.0 }
 0x314   : > { %v1188_v52 = vrot.slane %v1187_v45, 1  ;;  %v1193_v2 = vrot.slane %v1192_v46, 2  ;;  %v1198_v59 = vrot.slane %v1197_v56, 4 }
 0x316   : > { %v1189_v1 = vadd.f32 %v1188_v52, %v1187_v45  ;;  %v1194_v8 = vadd.f32 %v1193_v2, %v1192_v46  ;;  %v1199_v9 = vadd.f32 %v1198_v59, %v1197_v56  ;;  %v1170_v14 = vpop.xlane.xlu1 %1169 }
 0x317   : > { %v1204_v23 = vsel %vm1078_vm3, %v1170_v14, 0.0 }
 0x318   : > { %6245 = vrcp.f32 %v1189_v1  ;;  %v1195_v16 = vrot.slane %v1194_v8, 1  ;;  %v1200_v20 = vrot.slane %v1199_v9, 2  ;;  %v1205_v26 = vrot.slane %v1204_v23, 4 }
 0x31a   : > { %v1196_v39 = vadd.f32 %v1195_v16, %v1194_v8  ;;  %v1201_v35 = vadd.f32 %v1200_v20, %v1199_v9  ;;  %v1206_v34 = vadd.f32 %v1205_v26, %v1204_v23  ;;  %v6892_v20 = vpack.c.bf16 %v6648_v47, %v6648_v47 }
 0x31b   : > { %v1173_v36 = vpop.xlane.xlu0 %1172  ;;  %v6899_v47 = vpack.c.bf16 %v6659_v51, %v6659_v51 }
 0x31c   : > { %6247 = vrcp.f32 %v1196_v39  ;;  %v1202_v40 = vrot.slane %v1201_v35, 1  ;;  %v1207_v41 = vrot.slane %v1206_v34, 2  ;;  %v1211_v44 = vsel %vm1078_vm3, %v1173_v36, 0.0  ;;  %v1176_v21 = vpop.xlane.xlu1 %1175 }
 0x31d   : > { %v1212_v45 = vrot.slane %v1211_v44, 4  ;;  %v1218_v46 = vsel %vm1078_vm3, %v1176_v21, 0.0 }
 0x31e   : > { %v1203_v60 = vadd.f32 %v1202_v40, %v1201_v35  ;;  %v1208_v56 = vadd.f32 %v1207_v41, %v1206_v34  ;;  %v1219_v52 = vrot.slane %v1218_v46, 4 }
 0x31f   : > { %v1213_v2 = vadd.f32 %v1212_v45, %v1211_v44 }
 0x320   : > { %6249 = vrcp.f32 %v1203_v60  ;;  %v1209_v59 = vrot.slane %v1208_v56, 1  ;;  %v1220_v1 = vadd.f32 %v1219_v52, %v1218_v46 }
 0x321   : > { %v1214_v8 = vrot.slane %v1213_v2, 2 }
 0x322   : > { %v6246_v9 = vpop.eup %6245  ;;  %v1210_v14 = vadd.f32 %v1209_v59, %v1208_v56  ;;  %v1221_v23 = vrot.slane %v1220_v1, 2  ;;  %v1179_v16 = vpop.xlane.xlu0 %1178 }
 0x323   : > { %v1215_v26 = vadd.f32 %v1214_v8, %v1213_v2  ;;  %v1225_v39 = vsel %vm1078_vm3, %v1179_v16, 0.0  ;;  %v1247_v35 = vmul.f32 %v6246_v9, %v6816_v33  ;;  %v1359_v33 = vsel %vm1078_vm3, %v6892_v20, 0 }
 0x324   : > { %6251 = vrcp.f32 %v1210_v14  ;;  %v1222_v34 = vadd.f32 %v1221_v23, %v1220_v1  ;;  %v1226_v36 = vrot.slane %v1225_v39, 4  ;;  %v1182_v40 = vpop.xlane.xlu1 %1181  ;;  %v6910_v16 = vpack.c.bf16 %v6728_v10, %v6728_v10 }
 0x325   : > { %v1216_v41 = vrot.slane %v1215_v26, 1  ;;  %v1232_v44 = vsel %vm1078_vm3, %v1182_v40, 0.0  ;;  %v1255_v21 = vpack.c.bf16 %v1247_v35, %v1247_v35 }
 0x326   : > { %v6248_v45 = vpop.eup %6247  ;;  %v1223_v46 = vrot.slane %v1222_v34, 1  ;;  %v1227_v60 = vadd.f32 %v1226_v36, %v1225_v39  ;;  %v1233_v56 = vrot.slane %v1232_v44, 4 }
 0x327   : > { %v1217_v52 = vadd.f32 %v1216_v41, %v1215_v26  ;;  %5783 = vmatmul.mubr.msk.bf16.vlgmr.msra.gmra.mrb[24].mxu1 %vm684_vm2, %v1255_v21  ;;  %v1248_v2 = vmul.f32 %v6248_v45, %v6821_v29  ;;  %v1405_v29 = vsel %vm1078_vm3, %v6899_v47, 0  ;;  %v6921_v41 = vpack.c.bf16 %v6732_v12, %v6732_v12 }
 0x328   : > { %v1224_v59 = vadd.f32 %v1223_v46, %v1222_v34  ;;  %v1228_v1 = vrot.slane %v1227_v60, 2  ;;  %v1234_v8 = vadd.f32 %v1233_v56, %v1232_v44  ;;  %5793 = vmatpush3.bf16.msra.mxu1 %v1359_v33  ;;  %5794 = vmatprep.mubr.msk.bf16.mxu1 %vm6466_vm1, %v7810_v24  ;;  %v1706_v44 = vpop.permute.xlu1 %1705 }
 0x329   : > { %6253 = vrcp.f32 %v1217_v52  ;;  %v1256_v9 = vpack.c.bf16 %v1248_v2, %v1248_v2  ;;  %5804 = vmatprep.subr.bf16.mxu1 %v7810_v24 }
 0x32a   : > { %v6250_v51 = vpop.eup %6249  ;;  %6255 = vrcp.f32 %v1224_v59  ;;  %v1229_v14 = vadd.f32 %v1228_v1, %v1227_v60  ;;  %v1235_v23 = vrot.slane %v1234_v8, 2  ;;  %v1497_v60 = vsel %vm1078_vm3, %v6921_v41, 0 }
 0x32b   : > { %5789 = vmatmul.mubr.msk.bf16.vlgmr.msra.gmra.mrb[28].mxu0 %vm684_vm2, %v1256_v9  ;;  %v1249_v26 = vmul.f32 %v6250_v51, %v6826_v50  ;;  %v1451_v50 = vsel %vm1078_vm3, %v6910_v16, 0  ;;  %v6944_v1 = vpack.c.bf16 %v6730_v11, %v6730_v11 }
 0x32c   : > { %v1230_v39 = vrot.slane %v1229_v14, 1  ;;  %v1236_v35 = vadd.f32 %v1235_v23, %v1234_v8  ;;  %5799 = vmatpush3.bf16.msra.mxu0 %v1405_v29  ;;  %5800 = vmatprep.mubr.msk.bf16.mxu0 %vm6466_vm1, %v7810_v24  ;;  %v1651_v33 = vpop.permute.xlu1 %1650  ;;  %v1654_v8 = vpop.permute.xlu0 %1653 }
 0x32d   : > { %v1257_v34 = vpack.c.bf16 %v1249_v26, %v1249_v26  ;;  %5810 = vmatprep.subr.bf16.mxu0 %v7810_v24  ;;  %v1589_v11 = vsel %vm1078_vm3, %v6944_v1, 0 }
 0x32e   : > { %v6252_v36 = vpop.eup %6251  ;;  %v1231_v40 = vadd.f32 %v1230_v39, %v1229_v14  ;;  %v1237_v10 = vrot.slane %v1236_v35, 1  ;;  %v1659_v39 = vsel %vm684_vm2, %v1654_v8, 0 }
 0x32f   : > { %5795 = vmatmul.mubr.msk.bf16.vlgmr.msra.gmra.mrb[28].mxu1 %vm684_vm2, %v1257_v34  ;;  %v1250_v21 = vmul.f32 %v6252_v36, %v6831_v3  ;;  %v6935_v3 = vpack.c.bf16 %v6674_v58, %v6674_v58 }
 0x330   : > { %6257 = vrcp.f32 %v1231_v40  ;;  %v1238_v45 = vadd.f32 %v1237_v10, %v1236_v35  ;;  %5805 = vmatpush3.bf16.msra.mxu1 %v1451_v50  ;;  %5806 = vmatprep.mubr.msk.bf16.mxu1 %vm6466_vm1, %v7810_v24  ;;  %v1758_v26 = vpop.permute.xlu0 %1757 }
 0x331   : > { %v1258_v46 = vpack.c.bf16 %v1250_v21, %v1250_v21  ;;  %5816 = vmatprep.subr.bf16.mxu1 %v7810_v24  ;;  %v1543_v58 = vsel %vm1078_vm3, %v6935_v3, 0  ;;  %v1763_v40 = vsel %vm684_vm2, %v1758_v26, 0 }
 0x332   : > { %6259 = vrcp.f32 %v1238_v45 }
 0x333   : > { %v6254_v12 = vpop.eup %6253  ;;  %5801 = vmatmul.mubr.msk.bf16.vlgmr.msra.gmra.mrb[32].mxu0 %vm684_vm2, %v1258_v46 }
 0x334   : > { %v6256_v56 = vpop.eup %6255  ;;  %5811 = vmatpush3.bf16.msra.mxu0 %v1497_v60  ;;  %v1251_v52 = vmul.f32 %v6254_v12, %v6836_v17  ;;  %5812 = vmatprep.mubr.msk.bf16.mxu0 %vm6466_vm1, %v7810_v24 }
 0x335   : > { %5822 = vmatprep.subr.bf16.mxu0 %v7810_v24  ;;  %v1252_v2 = vmul.f32 %v6256_v56, %v6838_v18  ;;  %v1703_v18 = vpop.permute.xlu1 %1702 }
 0x336   : > { %v1259_v59 = vpack.c.bf16 %v1251_v52, %v1251_v52 }
 0x337   : > { %v1260_v17 = vpack.c.bf16 %v1252_v2, %v1252_v2 }
 0x338   : > { %5807 = vmatmul.mubr.msk.bf16.vlgmr.msra.gmra.mrb[32].mxu1 %vm684_vm2, %v1259_v59 }
 0x339   : > { %5817 = vmatpush3.bf16.msra.mxu1 %v1543_v58  ;;  %5818 = vmatprep.mubr.msk.bf16.mxu1 %vm6466_vm1, %v7810_v24  ;;  %v1810_v35 = vpop.permute.xlu1 %1809 }
 0x33a   : > { %v6258_v9 = vpop.eup %6257  ;;  %5828 = vmatprep.subr.bf16.mxu1 %v7810_v24 }
 0x33b   : > { %5813 = vmatmul.mubr.msk.bf16.vlgmr.msra.gmra.mrb[36].mxu0 %vm684_vm2, %v1260_v17  ;;  %v1253_v51 = vmul.f32 %v6258_v9, %v6844_v31  ;;  %v1711_v31 = vsel %vm684_vm2, %v1706_v44, 0  ;;  %v1815_v44 = vsel %vm684_vm2, %v1810_v35, 0 }
 0x33c   : > { %v6260_v14 = vpop.eup %6259  ;;  %5823 = vmatpush3.bf16.msra.mxu0 %v1589_v11  ;;  %5824 = vmatprep.mubr.msk.bf16.mxu0 %vm6466_vm1, %v7810_v24 }
 0x33d   : > { %v1261_v23 = vpack.c.bf16 %v1253_v51, %v1253_v51  ;;  %v1254_v29 = vmul.f32 %v6260_v14, %v6848_v25  ;;  %5834 = vmatprep.subr.bf16.mxu0 %v7810_v24  ;;  %v1755_v25 = vpop.permute.xlu0 %1754  ;;  %v1807_v36 = vpop.permute.xlu1 %1806 }
 0x33f   : > { %v1262_v34 = vpack.c.bf16 %v1254_v29, %v1254_v29 }
 0x340   : > { %5819 = vmatmul.mubr.msk.bf16.vlgmr.msra.gmra.mrb[36].mxu1 %vm684_vm2, %v1261_v23 }
 0x341   : > { %5830 = vmatprep.mubr.msk.bf16.mxu1 %vm6466_vm1, %v7810_v24  ;;  %v1862_v10 = vpop.permute.xlu0 %1861  ;;  %v1914_v50 = vpop.permute.xlu1 %1913 }
 0x342   : > { %5829 = vmatpush3.bf16.xpose.msra.mxu1 %v1659_v39  ;;  %v1867_v45 = vsel %vm684_vm2, %v1862_v10, 0  ;;  %v1919_v12 = vsel %vm684_vm2, %v1914_v50, 0 }
 0x343   : > { %5825 = vmatmul.mubr.msk.bf16.vlgmr.msra.gmra.mrb[40].mxu0 %vm684_vm2, %v1262_v34  ;;  %5840 = vmatprep.subr.bf16.mxu1 %v7810_v24 }
 0x344   : > { %5836 = vmatprep.mubr.msk.bf16.mxu0 %vm6466_vm1, %v7810_v24 }
 0x345   : > { %5835 = vmatpush3.bf16.xpose.msra.mxu0 %v1711_v31  ;;  %v1859_v21 = vpop.permute.xlu0 %1858  ;;  %v1911_v46 = vpop.permute.xlu1 %1910 }
 0x346   : > { %5846 = vmatprep.subr.bf16.mxu0 %v7810_v24 }
 0x349   : > { %5831 = vmatmul.mubr.msk.bf16.vlgmr.msra.gmra.mrb[40].mxu1 %vm684_vm2, %v1651_v33  ;;  %v1966_v60 = vpop.permute.xlu0 %1965  ;;  %v2018_v52 = vpop.permute.xlu1 %2017 }
 0x34a   : > { %5841 = vmatpush3.bf16.xpose.msra.mxu1 %v1763_v40  ;;  %5842 = vmatprep.mubr.msk.bf16.mxu1 %vm6466_vm1, %v7810_v24  ;;  %v1971_v56 = vsel %vm684_vm2, %v1966_v60, 0  ;;  %v2023_v33 = vsel %vm684_vm2, %v2018_v52, 0 }
 0x34b   : > { %5852 = vmatprep.subr.bf16.mxu1 %v7810_v24 }
 0x34c   : > { %5837 = vmatmul.mubr.msk.bf16.vlgmr.msra.gmra.mrb[44].mxu0 %vm684_vm2, %v1703_v18 }
 0x34d   : > { %5847 = vmatpush3.bf16.xpose.msra.mxu0 %v1815_v44  ;;  %5848 = vmatprep.mubr.msk.bf16.mxu0 %vm6466_vm1, %v7810_v24  ;;  %v1963_v2 = vpop.permute.xlu0 %1962  ;;  %v2015_v59 = vpop.permute.xlu1 %2014 }
 0x34e   : > { %5858 = vmatprep.subr.bf16.mxu0 %v7810_v24 }
 0x351   : > { %5843 = vmatmul.mubr.msk.bf16.vlgmr.msra.gmra.mrb[44].mxu1 %vm684_vm2, %v1755_v25 }
 0x352   : > { %5853 = vmatpush3.bf16.xpose.msra.mxu1 %v1867_v45  ;;  %5854 = vmatprep.mubr.msk.bf16.mxu1 %vm6466_vm1, %v7810_v24 }
 0x353   : > { %5864 = vmatprep.subr.bf16.mxu1 %v7810_v24 }
 0x354   : > { %5849 = vmatmul.mubr.msk.bf16.vlgmr.msra.gmra.mrb[48].mxu0 %vm684_vm2, %v1807_v36 }
 0x355   : > { %5859 = vmatpush3.bf16.xpose.msra.mxu0 %v1919_v12  ;;  %5860 = vmatprep.mubr.msk.bf16.mxu0 %vm6466_vm1, %v7810_v24 }
 0x356   : > { %5870 = vmatprep.subr.bf16.mxu0 %v7810_v24 }
 0x359   : > { %5855 = vmatmul.mubr.msk.bf16.vlgmr.msra.gmra.mrb[48].mxu1 %vm684_vm2, %v1859_v21 }
 0x35a   : > { %5865 = vmatpush3.bf16.xpose.msra.mxu1 %v1971_v56  ;;  %5866 = vmatprep.mubr.msk.bf16.mxu1 %vm6466_vm1, %v7810_v24 }
 0x35b   : > { %5876 = vmatprep.subr.bf16.mxu1 %v7810_v24 }
 0x35c   : > { %5861 = vmatmul.mubr.msk.bf16.vlgmr.msra.gmra.mrb[52].mxu0 %vm684_vm2, %v1911_v46 }
 0x35d   : > { %5871 = vmatpush3.bf16.xpose.msra.mxu0 %v2023_v33  ;;  %5872 = vmatprep.mubr.msk.bf16.mxu0 %vm6466_vm1, %v7810_v24 }
 0x35e   : > { %5882 = vmatprep.subr.bf16.mxu0 %v7810_v24 }
 0x361   : > { %5867 = vmatmul.mubr.msk.bf16.vlgmr.msra.gmra.mrb[52].mxu1 %vm684_vm2, %v1963_v2 }
 0x362   : > { %5878 = vmatprep.mubr.msk.bf16.mxu1 %vm6466_vm1, %v7810_v24 }
 0x364   : > { %5873 = vmatmul.mubr.msk.bf16.vlgmr.msra.gmra.mrb[56].mxu0 %vm684_vm2, %v2015_v59 }
 0x365   : > { %5884 = vmatprep.mubr.msk.bf16.mxu0 %vm6466_vm1, %v7810_v24 }
 0x3fa   : > { %v1303_v8 = vpop.f32.mrb[24].mxu1 }
 0x3fb   : > { %v5784_v58 = vpop.f32.mrb[25].mxu1 }
 0x3fc   : > { %v1306_v17 = vpop.f32.mrb[26].mxu1 }
 0x3fd   : > { %v5785_v9 = vpop.f32.mrb[27].mxu1 }
 0x3fe   : > { %v1349_v18 = vpop.f32.mrb[28].mxu0 }
 0x3ff   : > { %v1639_v11 = vcombine.low %v1303_v8, %v1349_v18  ;;  %v5790_v51 = vpop.f32.mrb[29].mxu0 }
 0x400   : > { %v1352_v14 = vpop.f32.mrb[30].mxu0 }
 0x401   : > { %v5791_v23 = vpop.f32.mrb[31].mxu0 }
 0x402   : > { %v1395_v29 = vpop.f32.mrb[28].mxu1 }
 0x403   : > { %v5796_v26 = vpop.f32.mrb[29].mxu1 }
 0x404   : > { %v1398_v39 = vpop.f32.mrb[30].mxu1 }
 0x405   : > { %v5797_v35 = vpop.f32.mrb[31].mxu1 }
 0x406   : > { %v1441_v34 = vpop.f32.mrb[32].mxu0 }
 0x407   : > { %v1640_v31 = vcombine.low %v1395_v29, %v1441_v34  ;;  %v5802_v25 = vpop.f32.mrb[33].mxu0 }
 0x408   : > { %v1444_v36 = vpop.f32.mrb[34].mxu0 }
 0x409   : > { %v7006_v40 = vpack.c.bf16 %v1640_v31, %v1639_v11  ;;  %v5803_v10 = vpop.f32.mrb[35].mxu0 }
 0x40b   : > { %v1487_v44 = vpop.f32.mrb[32].mxu1 }
 0x40c   : > { %v5808_v50 = vpop.f32.mrb[33].mxu1 }
 0x40d   : > { %v1490_v21 = vpop.f32.mrb[34].mxu1 }
 0x40e   : > { %v5809_v45 = vpop.f32.mrb[35].mxu1  ;;  %v1533_v46 = vpop.f32.mrb[36].mxu0 }
 0x40f   : > { %v1641_v12 = vcombine.low %v1487_v44, %v1533_v46  ;;  %v5814_v60 = vpop.f32.mrb[37].mxu0 }
 0x410   : > { %v1536_v56 = vpop.f32.mrb[38].mxu0 }
 0x411   : > { %v5815_v52 = vpop.f32.mrb[39].mxu0 }
 0x413   : > { %v1579_v33 = vpop.f32.mrb[36].mxu1 }
 0x414   : > { %v5820_v2 = vpop.f32.mrb[37].mxu1 }
 0x415   : > { %v1582_v59 = vpop.f32.mrb[38].mxu1 }
 0x416   : > { %v5821_v8 = vpop.f32.mrb[39].mxu1  ;;  %v1625_v58 = vpop.f32.mrb[40].mxu0 }
 0x417   : > { %v1642_v17 = vcombine.low %v1579_v33, %v1625_v58  ;;  %v5826_v9 = vpop.f32.mrb[41].mxu0 }
 0x418   : > { %v1628_v18 = vpop.f32.mrb[42].mxu0 }
 0x419   : > { %v7008_v11 = vpack.c.bf16 %v1642_v17, %v1641_v12  ;;  %v5827_v51 = vpop.f32.mrb[43].mxu0 }
 0x41c   : > { %v1695_v14 = vpop.f32.mrb[40].mxu1 }
 0x41d   : > { %v7011_v23 = vadd.f32 %v1695_v14, %v6741_v13  ;;  %v5832_v29 = vpop.f32.mrb[41].mxu1 }
 0x41e   : > { %v1698_v26 = vpop.f32.mrb[42].mxu1 }
 0x41f   : > { %v5833_v39 = vpop.f32.mrb[43].mxu1  ;;  %v2065_v35 = vsel %vm1053_vm4, %v7011_v23, -inf  ;;  %v1747_v34 = vpop.f32.mrb[44].mxu0 }
 0x420   : > { %2066 = vmax.xlane.f32.xlu0 %v2065_v35  ;;  %v7016_v31 = vadd.f32 %v1747_v34, %v6744_v15  ;;  %v5838_v25 = vpop.f32.mrb[45].mxu0 }
 0x421   : > { %v1750_v36 = vpop.f32.mrb[46].mxu0 }
 0x422   : > { %v5839_v10 = vpop.f32.mrb[47].mxu0  ;;  %v2068_v44 = vsel %vm1053_vm4, %v7016_v31, -inf }
 0x423   : > { %2069 = vmax.xlane.f32.xlu1 %v2068_v44 }
 0x424   : > { %v1799_v13 = vpop.f32.mrb[44].mxu1 }
 0x425   : > { %v7021_v50 = vadd.f32 %v1799_v13, %v6755_v28  ;;  %v5844_v21 = vpop.f32.mrb[45].mxu1 }
 0x426   : > { %v1802_v45 = vpop.f32.mrb[46].mxu1 }
 0x427   : > { %v5845_v46 = vpop.f32.mrb[47].mxu1  ;;  %v2071_v12 = vsel %vm1053_vm4, %v7021_v50, -inf  ;;  %v1851_v60 = vpop.f32.mrb[48].mxu0 }
 0x428   : > { %2072 = vmax.xlane.f32.xlu0 %v2071_v12  ;;  %v7026_v15 = vadd.f32 %v1851_v60, %v6760_v32  ;;  %v5850_v56 = vpop.f32.mrb[49].mxu0 }
 0x429   : > { %v1854_v52 = vpop.f32.mrb[50].mxu0 }
 0x42a   : > { %v5851_v33 = vpop.f32.mrb[51].mxu0  ;;  %v2074_v2 = vsel %vm1053_vm4, %v7026_v15, -inf }
 0x42c   : > { %v1903_v59 = vpop.f32.mrb[48].mxu1  ;;  %2075 = vmax.xlane.f32.xlu0 %v2074_v2 }
 0x42d   : > { %v7031_v28 = vadd.f32 %v1903_v59, %v6771_v48  ;;  %v5856_v8 = vpop.f32.mrb[49].mxu1 }
 0x42e   : > { %v1906_v58 = vpop.f32.mrb[50].mxu1 }
 0x42f   : > { %v5857_v17 = vpop.f32.mrb[51].mxu1  ;;  %v2077_v9 = vsel %vm1053_vm4, %v7031_v28, -inf  ;;  %v1955_v18 = vpop.f32.mrb[52].mxu0 }
 0x430   : > { %2078 = vmax.xlane.f32.xlu0 %v2077_v9  ;;  %v7036_v32 = vadd.f32 %v1955_v18, %v6776_v53  ;;  %v5862_v51 = vpop.f32.mrb[53].mxu0 }
 0x431   : > { %v1958_v14 = vpop.f32.mrb[54].mxu0 }
 0x432   : > { %v5863_v29 = vpop.f32.mrb[55].mxu0  ;;  %v2080_v26 = vsel %vm1053_vm4, %v7036_v32, -inf }
 0x433   : > { %2081 = vmax.xlane.f32.xlu1 %v2080_v26 }
 0x434   : > { %v2007_v48 = vpop.f32.mrb[52].mxu1 }
 0x435   : > { %v7041_v39 = vadd.f32 %v2007_v48, %v6789_v19  ;;  %v5868_v35 = vpop.f32.mrb[53].mxu1 }
 0x436   : > { %v2010_v34 = vpop.f32.mrb[54].mxu1 }
 0x437   : > { %v5869_v25 = vpop.f32.mrb[55].mxu1  ;;  %v2083_v36 = vsel %vm1053_vm4, %v7041_v39, -inf  ;;  %v2059_v10 = vpop.f32.mrb[56].mxu0 }
 0x438   : > { %2084 = vmax.xlane.f32.xlu0 %v2083_v36  ;;  %v7046_v53 = vadd.f32 %v2059_v10, %v6792_v22  ;;  %v5874_v44 = vpop.f32.mrb[57].mxu0 }
 0x439   : > { %v2062_v13 = vpop.f32.mrb[58].mxu0 }
 0x43a   : > { %v5875_v21 = vpop.f32.mrb[59].mxu0  ;;  %v2086_v45 = vsel %vm1053_vm4, %v7046_v53, -inf }
 0x43b   : > { %2087 = vmax.xlane.f32.xlu1 %v2086_v45 }
 0x4ad   : > { %v2067_v19 = vpop.xlane.xlu0 %2066 }
 0x4ae   : > { %v2089_v46 = vsel %vm1078_vm3, %v2067_v19, -inf }
 0x4af   : > { %v2090_v12 = vrot.slane %v2089_v46, 4 }
 0x4b0   : > { %v2070_v60 = vpop.xlane.xlu1 %2069 }
 0x4b1   : > { %v2091_v56 = vmax.f32 %v2089_v46, %v2090_v12  ;;  %v2096_v52 = vsel %vm1078_vm3, %v2070_v60, -inf }
 0x4b2   : > { %v2097_v33 = vrot.slane %v2096_v52, 4 }
 0x4b3   : > { %v2092_v2 = vrot.slane %v2091_v56, 2 }
 0x4b4   : > { %v2098_v59 = vmax.f32 %v2096_v52, %v2097_v33 }
 0x4b5   : > { %v2093_v22 = vmax.f32 %v2091_v56, %v2092_v2  ;;  %v2073_v8 = vpop.xlane.xlu0 %2072 }
 0x4b6   : > { %v2099_v58 = vrot.slane %v2098_v59, 2  ;;  %v2103_v17 = vsel %vm1078_vm3, %v2073_v8, -inf }
 0x4b7   : > { %v2094_v9 = vrot.slane %v2093_v22, 1  ;;  %v2104_v18 = vrot.slane %v2103_v17, 4 }
 0x4b8   : > { %v2100_v51 = vmax.f32 %v2098_v59, %v2099_v58 }
 0x4b9   : > { %v2095_v14 = vmax.f32 %v2093_v22, %v2094_v9  ;;  %v2105_v29 = vmax.f32 %v2103_v17, %v2104_v18  ;;  %v2076_v26 = vpop.xlane.xlu0 %2075 }
 0x4ba   : > { %v2101_v48 = vrot.slane %v2100_v51, 1  ;;  %v2110_v35 = vsel %vm1078_vm3, %v2076_v26, -inf }
 0x4bb   : > { %v2145_v34 = vsub.f32 %v7011_v23, %v2095_v14  ;;  %v2106_v25 = vrot.slane %v2105_v29, 2  ;;  %v2111_v36 = vrot.slane %v2110_v35, 4 }
 0x4bc   : > { %v2102_v10 = vmax.f32 %v2100_v51, %v2101_v48 }
 0x4bd   : > { %v2153_v44 = vmul.f32 1.442695, %v2145_v34  ;;  %v2107_v13 = vmax.f32 %v2105_v29, %v2106_v25  ;;  %v2112_v21 = vmax.f32 %v2110_v35, %v2111_v36  ;;  %v2079_v45 = vpop.xlane.xlu0 %2078 }
 0x4be   : > { %v2146_v19 = vsub.f32 %v7016_v31, %v2102_v10  ;;  %v2117_v46 = vsel %vm1078_vm3, %v2079_v45, -inf }
 0x4bf   : > { %6261 = vpow2.f32 %v2153_v44  ;;  %v2108_v12 = vrot.slane %v2107_v13, 1  ;;  %v2113_v60 = vrot.slane %v2112_v21, 2  ;;  %v2118_v56 = vrot.slane %v2117_v46, 4 }
 0x4c0   : > { %v2155_v52 = vmul.f32 1.442695, %v2146_v19  ;;  %v2082_v45 = vpop.xlane.xlu1 %2081 }
 0x4c1   : > { %v2109_v33 = vmax.f32 %v2107_v13, %v2108_v12  ;;  %v2114_v2 = vmax.f32 %v2112_v21, %v2113_v60  ;;  %v2119_v59 = vmax.f32 %v2117_v46, %v2118_v56  ;;  %v2124_v46 = vsel %vm1078_vm3, %v2082_v45, -inf }
 0x4c2   : > { %6263 = vpow2.f32 %v2155_v52  ;;  %v2125_v12 = vrot.slane %v2124_v46, 4 }
 0x4c3   : > { %v2147_v23 = vsub.f32 %v7021_v50, %v2109_v33  ;;  %v2115_v22 = vrot.slane %v2114_v2, 1  ;;  %v2120_v8 = vrot.slane %v2119_v59, 2 }
 0x4c4   : > { %v2126_v56 = vmax.f32 %v2124_v46, %v2125_v12 }
 0x4c5   : > { %v2157_v58 = vmul.f32 1.442695, %v2147_v23  ;;  %v2116_v17 = vmax.f32 %v2114_v2, %v2115_v22  ;;  %v2121_v9 = vmax.f32 %v2119_v59, %v2120_v8  ;;  %v2085_v13 = vpop.xlane.xlu0 %2084 }
 0x4c6   : > { %v2131_v21 = vsel %vm1078_vm3, %v2085_v13, -inf  ;;  %v2127_v33 = vrot.slane %v2126_v56, 2 }
 0x4c7   : > { %6265 = vpow2.f32 %v2157_v58  ;;  %v2148_v31 = vsub.f32 %v7026_v15, %v2116_v17  ;;  %v2122_v18 = vrot.slane %v2121_v9, 1  ;;  %v2132_v19 = vrot.slane %v2131_v21, 4 }
 0x4c8   : > { %v2128_v59 = vmax.f32 %v2126_v56, %v2127_v33 }
 0x4c9   : > { %v7059_v51 = vpop.eup %6261  ;;  %v2159_v14 = vmul.f32 1.442695, %v2148_v31  ;;  %v2123_v29 = vmax.f32 %v2121_v9, %v2122_v18  ;;  %v2133_v60 = vmax.f32 %v2131_v21, %v2132_v19 }
 0x4ca   : > { %v2169_v26 = vsel %vm1053_vm4, %v7059_v51, 0.0  ;;  %v2129_v22 = vrot.slane %v2128_v59, 1 }
 0x4cb   : > { %6267 = vpow2.f32 %v2159_v14  ;;  %v2149_v48 = vsub.f32 %v7031_v28, %v2123_v29  ;;  %2170 = vadd.xlane.f32.xlu0 %v2169_v26  ;;  %v2134_v52 = vrot.slane %v2133_v60, 2 }
 0x4cc   : > { %v7064_v50 = vpop.eup %6263  ;;  %v2130_v58 = vmax.f32 %v2128_v59, %v2129_v22 }
 0x4cd   : > { %v2161_v35 = vmul.f32 1.442695, %v2149_v48  ;;  %v2172_v34 = vsel %vm1053_vm4, %v7064_v50, 0.0  ;;  %v2135_v2 = vmax.f32 %v2133_v60, %v2134_v52 }
 0x4ce   : > { %2173 = vadd.xlane.f32.xlu1 %v2172_v34  ;;  %v2150_v9 = vsub.f32 %v7036_v32, %v2130_v58 }
 0x4cf   : > { %6269 = vpow2.f32 %v2161_v35  ;;  %v2136_v23 = vrot.slane %v2135_v2, 1  ;;  %v2088_v35 = vpop.xlane.xlu1 %2087 }
 0x4d0   : > { %v2163_v18 = vmul.f32 1.442695, %v2150_v9 }
 0x4d1   : > { %v7068_v15 = vpop.eup %6265  ;;  %v2137_v8 = vmax.f32 %v2135_v2, %v2136_v23 }
 0x4d2   : > { %v2175_v25 = vsel %vm1053_vm4, %v7068_v15, 0.0 }
 0x4d3   : > { %2176 = vadd.xlane.f32.xlu0 %v2175_v25  ;;  %v2151_v17 = vsub.f32 %v7041_v39, %v2137_v8  ;;  %v2138_v39 = vsel %vm1078_vm3, %v2088_v35, -inf }
 0x4d4   : > { %v2139_v32 = vrot.slane %v2138_v39, 4 }
 0x4d5   : > { %v7072_v36 = vpop.eup %6267  ;;  %v2165_v31 = vmul.f32 1.442695, %v2151_v17 }
 0x4d6   : > { %v2178_v28 = vsel %vm1053_vm4, %v7072_v36, 0.0  ;;  %v2140_v34 = vmax.f32 %v2138_v39, %v2139_v32 }
 0x4d7   : > { %2179 = vadd.xlane.f32.xlu1 %v2178_v28  ;;  %6271 = vpow2.f32 %v2165_v31 }
 0x4d8   : > { %6273 = vpow2.f32 %v2163_v18  ;;  %v2141_v25 = vrot.slane %v2140_v34, 2 }
 0x4d9   : > { %v7076_v10 = vpop.eup %6269 }
 0x4da   : > { %v2181_v44 = vsel %vm1053_vm4, %v7076_v10, 0.0  ;;  %v2142_v28 = vmax.f32 %v2140_v34, %v2141_v25 }
 0x4db   : > { %2182 = vadd.xlane.f32.xlu0 %v2181_v44 }
 0x4dc   : > { %v2143_v44 = vrot.slane %v2142_v28, 1 }
 0x4de   : > { %v2144_v13 = vmax.f32 %v2142_v28, %v2143_v44 }
 0x4e0   : > { %v2152_v21 = vsub.f32 %v7046_v53, %v2144_v13 }
 0x4e1   : > { %v7092_v14 = vpop.eup %6271 }
 0x4e2   : > { %v2187_v29 = vsel %vm1053_vm4, %v7092_v14, 0.0  ;;  %v7096_v26 = vpop.eup %6273  ;;  %v2167_v45 = vmul.f32 1.442695, %v2152_v21 }
 0x4e3   : > { %v2184_v48 = vsel %vm1053_vm4, %v7096_v26, 0.0 }
 0x4e4   : > { %6275 = vpow2.f32 %v2167_v45 }
 0x4e8   : > { %2323 = vrot.lane.b32.xlu1 %v6720_v7, %s6467_s19 }
 0x4ec   : > { %2372 = vrot.lane.b32.xlu1 %v6892_v20, %s6467_s19 }
 0x4ee   : > { %v7120_v19 = vpop.eup %6275 }
 0x4ef   : > { %v2190_v53 = vsel %vm1053_vm4, %v7120_v19, 0.0 }
 0x4f0   : > { %2421 = vrot.lane.b32.xlu1 %v6899_v47, %s6467_s19 }
 0x4f1   : > { %2274 = vrot.lane.b32.xlu0 %v6718_v6, %s6467_s19 }
 0x510   : > { %2188 = vadd.xlane.f32.xlu0 %v2187_v29 }
 0x514   : > { %2185 = vadd.xlane.f32.xlu1 %v2184_v48 }
 0x525   : > { %2519 = vrot.lane.b32.xlu1 %v6921_v41, %s6467_s19 }
 0x526   : > { %2470 = vrot.lane.b32.xlu0 %v6910_v16, %s6467_s19 }
 0x52a   : > { %2568 = vrot.lane.b32.xlu0 %v6935_v3, %s6467_s19 }
 0x52e   : > { %2685 = vrot.lane.b32.xlu0 %v6624_v27, %s6468_s20 }
 0x532   : > { %2683 = vrot.lane.b32.xlu0 %v6635_v38, %s6468_s20 }
 0x536   : > { %2785 = vrot.lane.b32.xlu0 %v6633_v37, %s6468_s20 }
 0x53a   : > { %2783 = vrot.lane.b32.xlu0 %v6662_v54, %s6468_s20 }
 0x53e   : > { %2885 = vrot.lane.b32.xlu0 %v6654_v49, %s6468_s20 }
 0x542   : > { %2883 = vrot.lane.b32.xlu0 %v6686_v62, %s6468_s20 }
 0x546   : > { %2985 = vrot.lane.b32.xlu0 %v6683_v61, %s6468_s20 }
 0x549   : > { %2191 = vadd.xlane.f32.xlu1 %v2190_v53 }
 0x54a   : > { %2983 = vrot.lane.b32.xlu0 %v6706_v4, %s6468_s20 }
 0x558   : > { %v2171_v46 = vpop.xlane.xlu0 %2170 }
 0x559   : > { %v2193_v12 = vsel %vm1078_vm3, %v2171_v46, 0.0 }
 0x55a   : > { %v2194_v60 = vrot.slane %v2193_v12, 4  ;;  %2617 = vrot.lane.b32.xlu1 %v6944_v1, %s6467_s19 }
 0x55b   : > { %v2174_v56 = vpop.xlane.xlu1 %2173 }
 0x55c   : > { %v2195_v52 = vadd.f32 %v2194_v60, %v2193_v12  ;;  %v2200_v33 = vsel %vm1078_vm3, %v2174_v56, 0.0 }
 0x55d   : > { %v2201_v2 = vrot.slane %v2200_v33, 4 }
 0x55e   : > { %v2196_v59 = vrot.slane %v2195_v52, 2  ;;  %2735 = vrot.lane.b32.xlu1 %v6626_v30, %s6468_s20 }
 0x55f   : > { %v2202_v23 = vadd.f32 %v2201_v2, %v2200_v33 }
 0x560   : > { %v2197_v22 = vadd.f32 %v2196_v59, %v2195_v52  ;;  %v2177_v8 = vpop.xlane.xlu0 %2176 }
 0x561   : > { %v2203_v58 = vrot.slane %v2202_v23, 2  ;;  %v2207_v17 = vsel %vm1078_vm3, %v2177_v8, 0.0 }
 0x562   : > { %v2198_v9 = vrot.slane %v2197_v22, 1  ;;  %v2208_v31 = vrot.slane %v2207_v17, 4  ;;  %2733 = vrot.lane.b32.xlu1 %v6640_v43, %s6468_s20 }
 0x563   : > { %v2204_v18 = vadd.f32 %v2203_v58, %v2202_v23 }
 0x564   : > { %v2199_v29 = vadd.f32 %v2198_v9, %v2197_v22  ;;  %v2209_v48 = vadd.f32 %v2208_v31, %v2207_v17  ;;  %v2180_v35 = vpop.xlane.xlu1 %2179 }
 0x565   : > { %v2205_v39 = vrot.slane %v2204_v18, 1  ;;  %v2214_v32 = vsel %vm1078_vm3, %v2180_v35, 0.0 }
 0x566   : > { %6277 = vrcp.f32 %v2199_v29  ;;  %v2210_v34 = vrot.slane %v2209_v48, 2  ;;  %v2215_v25 = vrot.slane %v2214_v32, 4  ;;  %2835 = vrot.lane.b32.xlu1 %v6638_v42, %s6468_s20 }
 0x567   : > { %v2206_v28 = vadd.f32 %v2205_v39, %v2204_v18 }
 0x568   : > { %v2211_v44 = vadd.f32 %v2210_v34, %v2209_v48  ;;  %v2216_v13 = vadd.f32 %v2215_v25, %v2214_v32  ;;  %v2183_v21 = vpop.xlane.xlu0 %2182  ;;  %v2324_v45 = vpop.permute.xlu1 %2323 }
 0x569   : > { %6279 = vrcp.f32 %v2206_v28  ;;  %v2329_v53 = vsel %vm1078_vm3, %v2324_v45, 0  ;;  %v2221_v48 = vsel %vm1078_vm3, %v2183_v21, 0.0 }
 0x56a   : > { %v2212_v46 = vrot.slane %v2211_v44, 1  ;;  %v2217_v12 = vrot.slane %v2216_v13, 2  ;;  %2833 = vrot.lane.b32.xlu1 %v6668_v57, %s6468_s20  ;;  %5883 = vmatpush3.bf16.msra.mxu0 %v2329_v53  ;;  %v2222_v39 = vrot.slane %v2221_v48, 4 }
 0x56b   : > { %5894 = vmatprep.subr.bf16.mxu0 %v7810_v24 }
 0x56c   : > { %v2213_v60 = vadd.f32 %v2212_v46, %v2211_v44  ;;  %v2218_v56 = vadd.f32 %v2217_v12, %v2216_v13  ;;  %v2275_v52 = vpop.permute.xlu0 %2274  ;;  %v2373_v59 = vpop.permute.xlu1 %2372  ;;  %v2223_v28 = vadd.f32 %v2222_v39, %v2221_v48 }
 0x56d   : > { %v2280_v33 = vsel %vm1078_vm3, %v2275_v52, 0  ;;  %v2378_v31 = vsel %vm1078_vm3, %v2373_v59, 0 }
 0x56e   : > { %6281 = vrcp.f32 %v2213_v60  ;;  %v2219_v2 = vrot.slane %v2218_v56, 1  ;;  %5877 = vmatpush3.bf16.msra.mxu1 %v2280_v33  ;;  %2935 = vrot.lane.b32.xlu1 %v6664_v55, %s6468_s20  ;;  %v2224_v44 = vrot.slane %v2223_v28, 2 }
 0x56f   : > { %5888 = vmatprep.subr.bf16.mxu1 %v7810_v24 }
 0x570   : > { %v6278_v23 = vpop.eup %6277  ;;  %v2220_v22 = vadd.f32 %v2219_v2, %v2218_v56  ;;  %v2422_v18 = vpop.permute.xlu1 %2421  ;;  %v2225_v13 = vadd.f32 %v2224_v44, %v2223_v28 }
 0x571   : > { %v2257_v8 = vmul.f32 %v6278_v23, %v7059_v51 }
 0x572   : > { %6283 = vrcp.f32 %v2220_v22  ;;  %2933 = vrot.lane.b32.xlu1 %v6690_v0, %s6468_s20  ;;  %v2226_v21 = vrot.slane %v2225_v13, 1 }
 0x573   : > { %v6280_v58 = vpop.eup %6279  ;;  %v2265_v17 = vpack.c.bf16 %v2257_v8, %v2257_v8 }
 0x574   : > { %v2258_v9 = vmul.f32 %v6280_v58, %v7064_v50  ;;  %v2427_v50 = vsel %vm1078_vm3, %v2422_v18, 0  ;;  %v2227_v45 = vadd.f32 %v2226_v21, %v2225_v13 }
 0x575   : > { %5879 = vmatmul.mubr.msk.bf16.vlgmr.msra.gmra.mrb[56].mxu1 %vm684_vm2, %v2265_v17 }
 0x576   : > { %5889 = vmatpush3.bf16.msra.mxu1 %v2378_v31  ;;  %3035 = vrot.lane.b32.xlu1 %v6688_v63, %s6468_s20  ;;  %v2266_v29 = vpack.c.bf16 %v2258_v9, %v2258_v9  ;;  %6285 = vrcp.f32 %v2227_v45 }
 0x577   : > { %5890 = vmatprep.mubr.msk.bf16.mxu1 %vm6466_vm1, %v7810_v24  ;;  %5900 = vmatprep.subr.bf16.mxu1 %v7810_v24 }
 0x578   : > { %v6282_v51 = vpop.eup %6281  ;;  %5885 = vmatmul.mubr.msk.bf16.vlgmr.msra.gmra.mrb[60].mxu0 %vm684_vm2, %v2266_v29 }
 0x579   : > { %5895 = vmatpush3.bf16.msra.mxu0 %v2427_v50  ;;  %v2259_v35 = vmul.f32 %v6282_v51, %v7068_v15  ;;  %5896 = vmatprep.mubr.msk.bf16.mxu0 %vm6466_vm1, %v7810_v24 }
 0x57a   : > { %3033 = vrot.lane.b32.xlu1 %v6708_v5, %s6468_s20  ;;  %5906 = vmatprep.subr.bf16.mxu0 %v7810_v24 }
 0x57b   : > { %v2267_v32 = vpack.c.bf16 %v2259_v35, %v2259_v35 }
 0x57c   : > { %v6284_v34 = vpop.eup %6283 }
 0x57d   : > { %5891 = vmatmul.mubr.msk.bf16.vlgmr.msra.gmra.mrb[60].mxu1 %vm684_vm2, %v2267_v32  ;;  %v2260_v25 = vmul.f32 %v6284_v34, %v7072_v36 }
 0x57e   : > { %5902 = vmatprep.mubr.msk.bf16.mxu1 %vm6466_vm1, %v7810_v24 }
 0x57f   : > { %v2268_v15 = vpack.c.bf16 %v2260_v25, %v2260_v25 }
 0x580   : > { %v6286_v53 = vpop.eup %6285 }
 0x581   : > { %5897 = vmatmul.mubr.msk.bf16.vlgmr.msra.gmra.mrb[64].mxu0 %vm684_vm2, %v2268_v15  ;;  %v2261_v60 = vmul.f32 %v6286_v53, %v7076_v10 }
 0x582   : > { %5908 = vmatprep.mubr.msk.bf16.mxu0 %vm6466_vm1, %v7810_v24 }
 0x583   : > { %v2269_v8 = vpack.c.bf16 %v2261_v60, %v2261_v60 }
 0x59d   : > { %v2189_v46 = vpop.xlane.xlu0 %2188 }
 0x59e   : > { %v2235_v12 = vsel %vm1078_vm3, %v2189_v46, 0.0 }
 0x59f   : > { %v2236_v36 = vrot.slane %v2235_v12, 4 }
 0x5a1   : > { %v2237_v56 = vadd.f32 %v2236_v36, %v2235_v12  ;;  %v2471_v52 = vpop.permute.xlu0 %2470  ;;  %v2186_v33 = vpop.xlane.xlu1 %2185 }
 0x5a2   : > { %v2476_v2 = vsel %vm1078_vm3, %v2471_v52, 0  ;;  %v2228_v59 = vsel %vm1078_vm3, %v2186_v33, 0.0 }
 0x5a3   : > { %v2238_v23 = vrot.slane %v2237_v56, 2  ;;  %v2229_v22 = vrot.slane %v2228_v59, 4  ;;  %5901 = vmatpush3.bf16.msra.mxu1 %v2476_v2 }
 0x5a4   : > { %5912 = vmatprep.subr.bf16.mxu1 %v7810_v24 }
 0x5a5   : > { %v2239_v58 = vadd.f32 %v2238_v23, %v2237_v56  ;;  %v2230_v17 = vadd.f32 %v2229_v22, %v2228_v59  ;;  %v2569_v9 = vpop.permute.xlu0 %2568  ;;  %v2520_v31 = vpop.permute.xlu1 %2519 }
 0x5a6   : > { %v2574_v18 = vsel %vm1078_vm3, %v2569_v9, 0  ;;  %v2525_v10 = vsel %vm1078_vm3, %v2520_v31, 0  ;;  %5903 = vmatmul.mubr.msk.bf16.vlgmr.msra.gmra.mrb[64].mxu1 %vm684_vm2, %v2269_v8 }
 0x5a7   : > { %v2240_v29 = vrot.slane %v2239_v58, 1  ;;  %v2231_v51 = vrot.slane %v2230_v17, 2  ;;  %5907 = vmatpush3.bf16.msra.mxu0 %v2525_v10  ;;  %5913 = vmatpush3.bf16.msra.mxu1 %v2574_v18 }
 0x5a8   : > { %5914 = vmatprep.mubr.msk.bf16.mxu1 %vm6466_vm1, %v7810_v24  ;;  %5924 = vmatprep.subr.bf16.mxu1 %v7810_v24 }
 0x5a9   : > { %v2241_v48 = vadd.f32 %v2240_v29, %v2239_v58  ;;  %v2232_v50 = vadd.f32 %v2231_v51, %v2230_v17  ;;  %5918 = vmatprep.subr.bf16.mxu0 %v7810_v24  ;;  %v2686_v39 = vpop.permute.xlu0 %2685 }
 0x5aa   : > { %v2691_v21 = vsel %vm684_vm2, %v2686_v39, 0 }
 0x5ab   : > { %6287 = vrcp.f32 %v2241_v48  ;;  %v2233_v35 = vrot.slane %v2232_v50, 1 }
 0x5ad   : > { %v2234_v32 = vadd.f32 %v2233_v35, %v2232_v50  ;;  %v2684_v34 = vpop.permute.xlu0 %2683 }
 0x5af   : > { %6289 = vrcp.f32 %v2234_v32 }
 0x5b1   : > { %v2786_v15 = vpop.permute.xlu0 %2785 }
 0x5b5   : > { %v6288_v25 = vpop.eup %6287  ;;  %v2784_v46 = vpop.permute.xlu0 %2783 }
 0x5b6   : > { %v2263_v28 = vmul.f32 %v6288_v25, %v7092_v14  ;;  %v2791_v14 = vsel %vm684_vm2, %v2786_v15, 0 }
 0x5b8   : > { %v2271_v44 = vpack.c.bf16 %v2263_v28, %v2263_v28 }
 0x5b9   : > { %v6290_v13 = vpop.eup %6289  ;;  %v2886_v12 = vpop.permute.xlu0 %2885 }
 0x5ba   : > { %5915 = vmatmul.mubr.msk.bf16.vlgmr.msra.gmra.mrb[68].mxu1 %vm684_vm2, %v2271_v44  ;;  %v2262_v45 = vmul.f32 %v6290_v13, %v7096_v26  ;;  %v2891_v36 = vsel %vm684_vm2, %v2886_v12, 0 }
 0x5bb   : > { %5925 = vmatpush3.bf16.xpose.msra.mxu1 %v2691_v21  ;;  %5926 = vmatprep.mubr.msk.bf16.mxu1 %vm6466_vm1, %v7810_v24 }
 0x5bc   : > { %v2270_v53 = vpack.c.bf16 %v2262_v45, %v2262_v45  ;;  %5936 = vmatprep.subr.bf16.mxu1 %v7810_v24 }
 0x5bd   : > { %v2884_v26 = vpop.permute.xlu0 %2883 }
 0x5be   : > { %5909 = vmatmul.mubr.msk.bf16.vlgmr.msra.gmra.mrb[68].mxu0 %vm684_vm2, %v2270_v53 }
 0x5bf   : > { %5920 = vmatprep.mubr.msk.bf16.mxu0 %vm6466_vm1, %v7810_v24 }
 0x5c1   : > { %v2986_v60 = vpop.permute.xlu0 %2985 }
 0x5c2   : > { %5927 = vmatmul.mubr.msk.bf16.vlgmr.msra.gmra.mrb[72].mxu1 %vm684_vm2, %v2684_v34  ;;  %v2991_v56 = vsel %vm684_vm2, %v2986_v60, 0 }
 0x5c3   : > { %5937 = vmatpush3.bf16.xpose.msra.mxu1 %v2791_v14  ;;  %5938 = vmatprep.mubr.msk.bf16.mxu1 %vm6466_vm1, %v7810_v24 }
 0x5c4   : > { %5948 = vmatprep.subr.bf16.mxu1 %v7810_v24 }
 0x5c5   : > { %v2984_v59 = vpop.permute.xlu0 %2983 }
 0x5ca   : > { %5939 = vmatmul.mubr.msk.bf16.vlgmr.msra.gmra.mrb[76].mxu1 %vm684_vm2, %v2784_v46 }
 0x5cb   : > { %5949 = vmatpush3.bf16.xpose.msra.mxu1 %v2891_v36  ;;  %5950 = vmatprep.mubr.msk.bf16.mxu1 %vm6466_vm1, %v7810_v24 }
 0x5cc   : > { %5960 = vmatprep.subr.bf16.mxu1 %v7810_v24 }
 0x5d2   : > { %5951 = vmatmul.mubr.msk.bf16.vlgmr.msra.gmra.mrb[80].mxu1 %vm684_vm2, %v2884_v26 }
 0x5d3   : > { %5961 = vmatpush3.bf16.xpose.msra.mxu1 %v2991_v56  ;;  %5962 = vmatprep.mubr.msk.bf16.mxu1 %vm6466_vm1, %v7810_v24 }
 0x5d4   : > { %5972 = vmatprep.subr.bf16.mxu1 %v7810_v24 }
 0x5d6   : > { %v2192_v52 = vpop.xlane.xlu1 %2191 }
 0x5d7   : > { %v2242_v33 = vsel %vm1078_vm3, %v2192_v52, 0.0 }
 0x5d8   : > { %v2243_v2 = vrot.slane %v2242_v33, 4 }
 0x5da   : > { %v2244_v23 = vadd.f32 %v2243_v2, %v2242_v33  ;;  %5963 = vmatmul.mubr.msk.bf16.vlgmr.msra.gmra.mrb[84].mxu1 %vm684_vm2, %v2984_v59  ;;  %v2618_v22 = vpop.permute.xlu1 %2617 }
 0x5db   : > { %v2623_v8 = vsel %vm1078_vm3, %v2618_v22, 0  ;;  %5974 = vmatprep.mubr.msk.bf16.mxu1 %vm6466_vm1, %v7810_v24 }
 0x5dc   : > { %v2245_v58 = vrot.slane %v2244_v23, 2  ;;  %5919 = vmatpush3.bf16.msra.mxu0 %v2623_v8 }
 0x5dd   : > { %5930 = vmatprep.subr.bf16.mxu0 %v7810_v24 }
 0x5de   : > { %v2246_v17 = vadd.f32 %v2245_v58, %v2244_v23  ;;  %v2736_v18 = vpop.permute.xlu1 %2735 }
 0x5df   : > { %v2741_v35 = vsel %vm684_vm2, %v2736_v18, 0 }
 0x5e0   : > { %v2247_v9 = vrot.slane %v2246_v17, 1 }
 0x5e2   : > { %v2248_v31 = vadd.f32 %v2247_v9, %v2246_v17  ;;  %v2734_v10 = vpop.permute.xlu1 %2733 }
 0x5e4   : > { %6291 = vrcp.f32 %v2248_v31 }
 0x5e6   : > { %v2836_v48 = vpop.permute.xlu1 %2835 }
 0x5e7   : > { %v2841_v32 = vsel %vm684_vm2, %v2836_v48, 0 }
 0x5ea   : > { %v2834_v39 = vpop.permute.xlu1 %2833 }
 0x5ee   : > { %v6292_v29 = vpop.eup %6291  ;;  %v2936_v34 = vpop.permute.xlu1 %2935 }
 0x5ef   : > { %v2264_v51 = vmul.f32 %v6292_v29, %v7120_v19  ;;  %v2941_v25 = vsel %vm684_vm2, %v2936_v34, 0 }
 0x5f1   : > { %v2272_v50 = vpack.c.bf16 %v2264_v51, %v2264_v51 }
 0x5f2   : > { %v2934_v19 = vpop.permute.xlu1 %2933 }
 0x5f3   : > { %5921 = vmatmul.mubr.msk.bf16.vlgmr.msra.gmra.mrb[72].mxu0 %vm684_vm2, %v2272_v50 }
 0x5f4   : > { %5931 = vmatpush3.bf16.xpose.msra.mxu0 %v2741_v35  ;;  %5932 = vmatprep.mubr.msk.bf16.mxu0 %vm6466_vm1, %v7810_v24 }
 0x5f5   : > { %5942 = vmatprep.subr.bf16.mxu0 %v7810_v24 }
 0x5f6   : > { %v3036_v28 = vpop.permute.xlu1 %3035 }
 0x5f7   : > { %v3041_v15 = vsel %vm684_vm2, %v3036_v28, 0 }
 0x5fa   : > { %v3034_v44 = vpop.permute.xlu1 %3033 }
 0x5fb   : > { %5933 = vmatmul.mubr.msk.bf16.vlgmr.msra.gmra.mrb[76].mxu0 %vm684_vm2, %v2734_v10 }
 0x5fc   : > { %5943 = vmatpush3.bf16.xpose.msra.mxu0 %v2841_v32  ;;  %5944 = vmatprep.mubr.msk.bf16.mxu0 %vm6466_vm1, %v7810_v24 }
 0x5fd   : > { %5954 = vmatprep.subr.bf16.mxu0 %v7810_v24 }
 0x603   : > { %5945 = vmatmul.mubr.msk.bf16.vlgmr.msra.gmra.mrb[80].mxu0 %vm684_vm2, %v2834_v39 }
 0x604   : > { %5955 = vmatpush3.bf16.xpose.msra.mxu0 %v2941_v25  ;;  %5956 = vmatprep.mubr.msk.bf16.mxu0 %vm6466_vm1, %v7810_v24  ;;  %v7245_v25 = vld [vmem:[%s6738_s18] sm:$0xf] }
 0x605   : > { %5966 = vmatprep.subr.bf16.mxu0 %v7810_v24 }
 0x60b   : > { %5957 = vmatmul.mubr.msk.bf16.vlgmr.msra.gmra.mrb[84].mxu0 %vm684_vm2, %v2934_v19 }
 0x60c   : > { %5967 = vmatpush3.bf16.xpose.msra.mxu0 %v3041_v15  ;;  %5968 = vmatprep.mubr.msk.bf16.mxu0 %vm6466_vm1, %v7810_v24 }
 0x60d   : > { %5978 = vmatprep.subr.bf16.mxu0 %v7810_v24 }
 0x613   : > { %5969 = vmatmul.mubr.msk.bf16.vlgmr.msra.gmra.mrb[88].mxu0 %vm684_vm2, %v3034_v44 }
 0x614   : > { %5980 = vmatprep.mubr.msk.bf16.mxu0 %vm6466_vm1, %v7810_v24 }
 0x648   : > { %v2316_v13 = vpop.f32.mrb[56].mxu1 }
 0x649   : > { %v5880_v21 = vpop.f32.mrb[57].mxu1 }
 0x64a   : > { %v2319_v45 = vpop.f32.mrb[58].mxu1 }
 0x64b   : > { %v5881_v53 = vpop.f32.mrb[59].mxu1  ;;  %v2365_v46 = vpop.f32.mrb[60].mxu0 }
 0x64c   : > { %v2673_v14 = vcombine.low %v2316_v13, %v2365_v46  ;;  %v5886_v12 = vpop.f32.mrb[61].mxu0  ;;  %v7253_v53 = vld [vmem:[%s6738_s18 + $0x8] sm:$0xf] }
 0x64d   : > { %v2368_v26 = vpop.f32.mrb[62].mxu0 }
 0x64e   : > { %v5887_v36 = vpop.f32.mrb[63].mxu0 }
 0x650   : > { %v2414_v60 = vpop.f32.mrb[60].mxu1 }
 0x651   : > { %v5892_v56 = vpop.f32.mrb[61].mxu1 }
 0x652   : > { %v2417_v52 = vpop.f32.mrb[62].mxu1 }
 0x653   : > { %v5893_v33 = vpop.f32.mrb[63].mxu1 }
 0x654   : > { %v2463_v2 = vpop.f32.mrb[64].mxu0 }
 0x655   : > { %v2674_v59 = vcombine.low %v2414_v60, %v2463_v2  ;;  %v5898_v23 = vpop.f32.mrb[65].mxu0 }
 0x656   : > { %v2466_v22 = vpop.f32.mrb[66].mxu0 }
 0x657   : > { %v7242_v8 = vpack.c.bf16 %v2674_v59, %v2673_v14  ;;  %v5899_v58 = vpop.f32.mrb[67].mxu0 }
 0x679   : > { %v2512_v17 = vpop.f32.mrb[64].mxu1 }
 0x67a   : > { %v5904_v9 = vpop.f32.mrb[65].mxu1 }
 0x67b   : > { %v2515_v31 = vpop.f32.mrb[66].mxu1 }
 0x67c   : > { %v5905_v18 = vpop.f32.mrb[67].mxu1 }
 0x68d   : > { %v2610_v10 = vpop.f32.mrb[68].mxu1 }
 0x68e   : > { %v5916_v29 = vpop.f32.mrb[69].mxu1 }
 0x68f   : > { %v2613_v51 = vpop.f32.mrb[70].mxu1 }
 0x690   : > { %v5917_v48 = vpop.f32.mrb[71].mxu1 }
 0x691   : > { %v2561_v50 = vpop.f32.mrb[68].mxu0  ;;  %v7263_v48 = vld [vmem:[%s6738_s18 + $0x4] sm:$0xf] }
 0x692   : > { %v2675_v35 = vcombine.low %v2512_v17, %v2561_v50  ;;  %v5910_v39 = vpop.f32.mrb[69].mxu0 }
 0x693   : > { %v2564_v32 = vpop.f32.mrb[70].mxu0 }
 0x694   : > { %v5911_v34 = vpop.f32.mrb[71].mxu0 }
 0x695   : > { %v2727_v19 = vpop.f32.mrb[72].mxu1 }
 0x696   : > { %v7248_v28 = vadd.f32 %v7245_v25, %v2727_v19  ;;  %v5928_v15 = vpop.f32.mrb[73].mxu1 }
 0x697   : > { %v2730_v44 = vpop.f32.mrb[74].mxu1  ;;  %v7271_v15 = vld [vmem:[%s6738_s18 + $0xc] sm:$0xf] }
 0x698   : > { %v5929_v13 = vpop.f32.mrb[75].mxu1  ;;  %v3083_v21 = vsel %vm1053_vm4, %v7248_v28, -inf }
 0x699   : > { %3084 = vmax.xlane.f32.xlu0 %v3083_v21  ;;  %v7277_v21 = vld [vmem:[%s6738_s18 + $0x10] sm:$0xf] }
 0x69d   : > { %v2827_v45 = vpop.f32.mrb[76].mxu1 }
 0x69e   : > { %v7256_v46 = vadd.f32 %v7253_v53, %v2827_v45  ;;  %v5940_v14 = vpop.f32.mrb[77].mxu1 }
 0x69f   : > { %v2830_v12 = vpop.f32.mrb[78].mxu1 }
 0x6a0   : > { %v5941_v26 = vpop.f32.mrb[79].mxu1  ;;  %v3089_v36 = vsel %vm1053_vm4, %v7256_v46, -inf }
 0x6a1   : > { %3090 = vmax.xlane.f32.xlu0 %v3089_v36  ;;  %v7285_v26 = vld [vmem:[%s6738_s18 + $0x18] sm:$0xf] }
 0x6a5   : > { %v2927_v60 = vpop.f32.mrb[80].mxu1 }
 0x6a6   : > { %v5952_v56 = vpop.f32.mrb[81].mxu1  ;;  %v7280_v45 = vadd.f32 %v7277_v21, %v2927_v60 }
 0x6a7   : > { %v2930_v52 = vpop.f32.mrb[82].mxu1 }
 0x6a8   : > { %v5953_v33 = vpop.f32.mrb[83].mxu1  ;;  %v3095_v56 = vsel %vm1053_vm4, %v7280_v45, -inf }
 0x6a9   : > { %v7293_v33 = vld [vmem:[%s6738_s18 + $0x14] sm:$0xf] }
 0x6ad   : > { %v3027_v2 = vpop.f32.mrb[84].mxu1 }
 0x6ae   : > { %v5964_v59 = vpop.f32.mrb[85].mxu1  ;;  %v7288_v36 = vadd.f32 %v7285_v26, %v3027_v2 }
 0x6af   : > { %v3030_v23 = vpop.f32.mrb[86].mxu1 }
 0x6b0   : > { %v5965_v22 = vpop.f32.mrb[87].mxu1 }
 0x6c6   : > { %v2659_v58 = vpop.f32.mrb[72].mxu0 }
 0x6c7   : > { %v2676_v17 = vcombine.low %v2610_v10, %v2659_v58  ;;  %v5922_v9 = vpop.f32.mrb[73].mxu0  ;;  %v3101_v58 = vsel %vm1053_vm4, %v7288_v36, -inf }
 0x6c8   : > { %v2662_v31 = vpop.f32.mrb[74].mxu0  ;;  %v7303_v9 = vld [vmem:[%s6738_s18 + $0x1c] sm:$0xf] }
 0x6c9   : > { %v7260_v18 = vpack.c.bf16 %v2676_v17, %v2675_v35  ;;  %v5923_v29 = vpop.f32.mrb[75].mxu0 }
 0x6ce   : > { %v2777_v51 = vpop.f32.mrb[76].mxu0 }
 0x6cf   : > { %v7266_v50 = vadd.f32 %v7263_v48, %v2777_v51  ;;  %v5934_v39 = vpop.f32.mrb[77].mxu0 }
 0x6d0   : > { %v2780_v32 = vpop.f32.mrb[78].mxu0 }
 0x6d1   : > { %v5935_v34 = vpop.f32.mrb[79].mxu0  ;;  %v3086_v19 = vsel %vm1053_vm4, %v7266_v50, -inf }
 0x6d2   : > { %3087 = vmax.xlane.f32.xlu1 %v3086_v19 }
 0x6d6   : > { %v2877_v10 = vpop.f32.mrb[80].mxu0 }
 0x6d7   : > { %v7274_v35 = vadd.f32 %v7271_v15, %v2877_v10  ;;  %v5946_v44 = vpop.f32.mrb[81].mxu0 }
 0x6d8   : > { %v2880_v13 = vpop.f32.mrb[82].mxu0 }
 0x6d9   : > { %v5947_v14 = vpop.f32.mrb[83].mxu0  ;;  %v3092_v12 = vsel %vm1053_vm4, %v7274_v35, -inf }
 0x6da   : > { %3093 = vmax.xlane.f32.xlu0 %v3092_v12 }
 0x6de   : > { %3096 = vmax.xlane.f32.xlu0 %v3095_v56  ;;  %v2977_v52 = vpop.f32.mrb[84].mxu0 }
 0x6df   : > { %v7296_v60 = vadd.f32 %v7293_v33, %v2977_v52  ;;  %v5958_v59 = vpop.f32.mrb[85].mxu0 }
 0x6e0   : > { %v2980_v23 = vpop.f32.mrb[86].mxu0 }
 0x6e1   : > { %v5959_v22 = vpop.f32.mrb[87].mxu0  ;;  %v3098_v2 = vsel %vm1053_vm4, %v7296_v60, -inf }
 0x6e2   : > { %3102 = vmax.xlane.f32.xlu0 %v3101_v58  ;;  %3099 = vmax.xlane.f32.xlu1 %v3098_v2 }
 0x6e6   : > { %v3077_v17 = vpop.f32.mrb[88].mxu0 }
 0x6e7   : > { %v7306_v31 = vadd.f32 %v7303_v9, %v3077_v17  ;;  %v5970_v29 = vpop.f32.mrb[89].mxu0 }
 0x6e8   : > { %v3080_v51 = vpop.f32.mrb[90].mxu0 }
 0x6e9   : > { %v5971_v39 = vpop.f32.mrb[91].mxu0  ;;  %v3104_v32 = vsel %vm1053_vm4, %v7306_v31, -inf }
 0x6ea   : > { %3105 = vmax.xlane.f32.xlu1 %v3104_v32 }
 0x726   : > { %v3085_v34 = vpop.xlane.xlu0 %3084 }
 0x727   : > { %v3107_v19 = vsel %vm1078_vm3, %v3085_v34, -inf }
 0x728   : > { %v3108_v10 = vrot.slane %v3107_v19, 4 }
 0x72a   : > { %v3109_v44 = vmax.f32 %v3107_v19, %v3108_v10 }
 0x72c   : > { %v3110_v13 = vrot.slane %v3109_v44, 2 }
 0x72e   : > { %v3111_v14 = vmax.f32 %v3109_v44, %v3110_v13  ;;  %v3091_v12 = vpop.xlane.xlu0 %3090 }
 0x72f   : > { %v3121_v56 = vsel %vm1078_vm3, %v3091_v12, -inf }
 0x730   : > { %v3112_v52 = vrot.slane %v3111_v14, 1  ;;  %v3122_v59 = vrot.slane %v3121_v56, 4 }
 0x732   : > { %v3113_v23 = vmax.f32 %v3111_v14, %v3112_v52  ;;  %v3123_v22 = vmax.f32 %v3121_v56, %v3122_v59 }
 0x734   : > { %v3163_v58 = vsub.f32 %v7248_v28, %v3113_v23  ;;  %v3124_v2 = vrot.slane %v3123_v22, 2 }
 0x736   : > { %v3171_v17 = vmul.f32 1.442695, %v3163_v58  ;;  %v3125_v29 = vmax.f32 %v3123_v22, %v3124_v2 }
 0x738   : > { %6293 = vpow2.f32 %v3171_v17  ;;  %v3126_v51 = vrot.slane %v3125_v29, 1 }
 0x73a   : > { %v3127_v39 = vmax.f32 %v3125_v29, %v3126_v51 }
 0x73c   : > { %v3165_v32 = vsub.f32 %v7256_v46, %v3127_v39 }
 0x73e   : > { %v3175_v34 = vmul.f32 1.442695, %v3165_v32 }
 0x740   : > { %6295 = vpow2.f32 %v3175_v34 }
 0x742   : > { %v7314_v19 = vpop.eup %6293 }
 0x743   : > { %v3187_v10 = vsel %vm1053_vm4, %v7314_v19, 0.0 }
 0x744   : > { %3188 = vadd.xlane.f32.xlu0 %v3187_v10 }
 0x74a   : > { %v7318_v44 = vpop.eup %6295 }
 0x74b   : > { %v3193_v28 = vsel %vm1053_vm4, %v7318_v44, 0.0 }
 0x74c   : > { %3194 = vadd.xlane.f32.xlu0 %v3193_v28 }
 0x75f   : > { %v3088_v13 = vpop.xlane.xlu1 %3087 }
 0x760   : > { %v3114_v14 = vsel %vm1078_vm3, %v3088_v13, -inf }
 0x761   : > { %v3115_v12 = vrot.slane %v3114_v14, 4 }
 0x763   : > { %v3116_v56 = vmax.f32 %v3114_v14, %v3115_v12 }
 0x765   : > { %v3117_v46 = vrot.slane %v3116_v56, 2 }
 0x767   : > { %v3118_v52 = vmax.f32 %v3116_v56, %v3117_v46  ;;  %v3094_v59 = vpop.xlane.xlu0 %3093 }
 0x768   : > { %v3128_v23 = vsel %vm1078_vm3, %v3094_v59, -inf }
 0x769   : > { %v3119_v22 = vrot.slane %v3118_v52, 1  ;;  %v3129_v58 = vrot.slane %v3128_v23, 4 }
 0x76b   : > { %v3120_v2 = vmax.f32 %v3118_v52, %v3119_v22  ;;  %v3130_v17 = vmax.f32 %v3128_v23, %v3129_v58  ;;  %v3097_v29 = vpop.xlane.xlu0 %3096 }
 0x76c   : > { %v3135_v51 = vsel %vm1078_vm3, %v3097_v29, -inf }
 0x76d   : > { %v3164_v39 = vsub.f32 %v7266_v50, %v3120_v2  ;;  %v3131_v32 = vrot.slane %v3130_v17, 2  ;;  %v3136_v34 = vrot.slane %v3135_v51, 4 }
 0x76f   : > { %v3173_v10 = vmul.f32 1.442695, %v3164_v39  ;;  %v3132_v28 = vmax.f32 %v3130_v17, %v3131_v32  ;;  %v3137_v13 = vmax.f32 %v3135_v51, %v3136_v34  ;;  %v3100_v39 = vpop.xlane.xlu1 %3099 }
 0x770   : > { %v3142_v34 = vsel %vm1078_vm3, %v3100_v39, -inf }
 0x771   : > { %6297 = vpow2.f32 %v3173_v10  ;;  %v3133_v14 = vrot.slane %v3132_v28, 1  ;;  %v3138_v12 = vrot.slane %v3137_v13, 2 }
 0x773   : > { %v3134_v56 = vmax.f32 %v3132_v28, %v3133_v14  ;;  %v3139_v46 = vmax.f32 %v3137_v13, %v3138_v12  ;;  %v3143_v28 = vrot.slane %v3142_v34, 4 }
 0x775   : > { %v3166_v59 = vsub.f32 %v7274_v35, %v3134_v56  ;;  %v3140_v24 = vrot.slane %v3139_v46, 1  ;;  %v3144_v14 = vmax.f32 %v3142_v34, %v3143_v28 }
 0x777   : > { %v3177_v52 = vmul.f32 1.442695, %v3166_v59  ;;  %v3141_v23 = vmax.f32 %v3139_v46, %v3140_v24  ;;  %v3145_v56 = vrot.slane %v3144_v14, 2 }
 0x779   : > { %6299 = vpow2.f32 %v3177_v52  ;;  %v3167_v22 = vsub.f32 %v7280_v45, %v3141_v23  ;;  %v3103_v45 = vpop.xlane.xlu0 %3102  ;;  %v3146_v59 = vmax.f32 %v3144_v14, %v3145_v56 }
 0x77a   : > { %v3149_v51 = vsel %vm1078_vm3, %v3103_v45, -inf }
 0x77b   : > { %v7328_v58 = vpop.eup %6297  ;;  %v3179_v50 = vmul.f32 1.442695, %v3167_v22  ;;  %v3150_v32 = vrot.slane %v3149_v51, 4  ;;  %v3147_v23 = vrot.slane %v3146_v59, 1 }
 0x77c   : > { %v3190_v2 = vsel %vm1053_vm4, %v7328_v58, 0.0 }
 0x77d   : > { %6301 = vpow2.f32 %v3179_v50  ;;  %3191 = vadd.xlane.f32.xlu1 %v3190_v2  ;;  %v3151_v10 = vmax.f32 %v3149_v51, %v3150_v32  ;;  %v3148_v50 = vmax.f32 %v3146_v59, %v3147_v23 }
 0x77f   : > { %v3152_v13 = vrot.slane %v3151_v10, 2 }
 0x781   : > { %v3153_v12 = vmax.f32 %v3151_v10, %v3152_v13 }
 0x783   : > { %v7332_v17 = vpop.eup %6299  ;;  %v3154_v46 = vrot.slane %v3153_v12, 1 }
 0x784   : > { %v3196_v29 = vsel %vm1053_vm4, %v7332_v17, 0.0 }
 0x785   : > { %3197 = vadd.xlane.f32.xlu1 %v3196_v29  ;;  %v3155_v52 = vmax.f32 %v3153_v12, %v3154_v46  ;;  %v3168_v29 = vsub.f32 %v7296_v60, %v3148_v50 }
 0x787   : > { %v7336_v35 = vpop.eup %6301  ;;  %v3169_v22 = vsub.f32 %v7288_v36, %v3155_v52  ;;  %v3106_v36 = vpop.xlane.xlu1 %3105 }
 0x788   : > { %v3199_v24 = vsel %vm1053_vm4, %v7336_v35, 0.0  ;;  %v3156_v34 = vsel %vm1078_vm3, %v3106_v36, -inf }
 0x789   : > { %3200 = vadd.xlane.f32.xlu0 %v3199_v24  ;;  %v3183_v2 = vmul.f32 1.442695, %v3169_v22  ;;  %v3181_v24 = vmul.f32 1.442695, %v3168_v29  ;;  %v3157_v10 = vrot.slane %v3156_v34, 4 }
 0x78b   : > { %6303 = vpow2.f32 %v3183_v2  ;;  %v3158_v60 = vmax.f32 %v3156_v34, %v3157_v10 }
 0x78c   : > { %6305 = vpow2.f32 %v3181_v24 }
 0x78d   : > { %v3159_v28 = vrot.slane %v3158_v60, 2 }
 0x78f   : > { %v3160_v13 = vmax.f32 %v3158_v60, %v3159_v28 }
 0x791   : > { %v3161_v14 = vrot.slane %v3160_v13, 1 }
 0x793   : > { %v3162_v12 = vmax.f32 %v3160_v13, %v3161_v14 }
 0x795   : > { %v7352_v45 = vpop.eup %6303  ;;  %v3170_v56 = vsub.f32 %v7306_v31, %v3162_v12 }
 0x796   : > { %3339 = vrot.lane.b32.xlu1 %v6720_v7, %s6468_s20  ;;  %v3205_v51 = vsel %vm1053_vm4, %v7352_v45, 0.0  ;;  %v7356_v39 = vpop.eup %6305 }
 0x797   : > { %v3202_v32 = vsel %vm1053_vm4, %v7356_v39, 0.0  ;;  %v3185_v46 = vmul.f32 1.442695, %v3170_v56 }
 0x799   : > { %6307 = vpow2.f32 %v3185_v46 }
 0x79a   : > { %3387 = vrot.lane.b32.xlu1 %v6892_v20, %s6468_s20 }
 0x79e   : > { %3435 = vrot.lane.b32.xlu1 %v6899_v47, %s6468_s20 }
 0x79f   : > { %3291 = vrot.lane.b32.xlu0 %v6718_v6, %s6468_s20 }
 0x7be   : > { %3206 = vadd.xlane.f32.xlu0 %v3205_v51 }
 0x7c2   : > { %3203 = vadd.xlane.f32.xlu1 %v3202_v32 }
 0x7d1   : > { %v3189_v59 = vpop.xlane.xlu0 %3188 }
 0x7d3   : > { %3531 = vrot.lane.b32.xlu1 %v6921_v41, %s6468_s20 }
 0x7d4   : > { %3483 = vrot.lane.b32.xlu0 %v6910_v16, %s6468_s20 }
 0x7d8   : > { %3579 = vrot.lane.b32.xlu0 %v6935_v3, %s6468_s20 }
 0x7dc   : > { %3695 = vrot.lane.b32.xlu0 %v6624_v27, %s6469_s21  ;;  %v3211_v27 = vsel %vm1078_vm3, %v3189_v59, 0.0 }
 0x7dd   : > { %v3212_v31 = vrot.slane %v3211_v27, 4 }
 0x7df   : > { %v3213_v52 = vadd.f32 %v3212_v31, %v3211_v27 }
 0x7e0   : > { %3693 = vrot.lane.b32.xlu0 %v6635_v38, %s6469_s21  ;;  %v7381_v38 = vpop.eup %6307 }
 0x7e4   : > { %3795 = vrot.lane.b32.xlu0 %v6633_v37, %s6469_s21  ;;  %v3195_v37 = vpop.xlane.xlu0 %3194 }
 0x7e8   : > { %3793 = vrot.lane.b32.xlu0 %v6662_v54, %s6469_s21  ;;  %v3208_v54 = vsel %vm1053_vm4, %v7381_v38, 0.0 }
 0x7ec   : > { %3895 = vrot.lane.b32.xlu0 %v6654_v49, %s6469_s21  ;;  %v3225_v49 = vsel %vm1078_vm3, %v3195_v37, 0.0 }
 0x7ed   : > { %v3226_v23 = vrot.slane %v3225_v49, 4 }
 0x7ef   : > { %v3227_v50 = vadd.f32 %v3226_v23, %v3225_v49 }
 0x7f0   : > { %3893 = vrot.lane.b32.xlu0 %v6686_v62, %s6469_s21  ;;  %v3214_v62 = vrot.slane %v3213_v52, 2 }
 0x7f1   : > { %v3228_v29 = vrot.slane %v3227_v50, 2 }
 0x7f2   : > { %v3215_v22 = vadd.f32 %v3214_v62, %v3213_v52  ;;  %v7814_v52 = vmov 0.0  }
 0x7f3   : > { %v3229_v51 = vadd.f32 %v3228_v29, %v3227_v50 }
 0x7f4   : > { %3995 = vrot.lane.b32.xlu0 %v6683_v61, %s6469_s21  ;;  %v3216_v2 = vrot.slane %v3215_v22, 1 }
 0x7f5   : > { %v3230_v36 = vrot.slane %v3229_v51, 1 }
 0x7f6   : > { %v3217_v24 = vadd.f32 %v3216_v2, %v3215_v22 }
 0x7f7   : > { %3209 = vadd.xlane.f32.xlu1 %v3208_v54  ;;  %v3231_v10 = vadd.f32 %v3230_v36, %v3229_v51 }
 0x7f8   : > { %3993 = vrot.lane.b32.xlu0 %v6706_v4, %s6469_s21  ;;  %6309 = vrcp.f32 %v3217_v24 }
 0x7f9   : > { %6311 = vrcp.f32 %v3231_v10 }
 0x802   : > { %v6310_v46 = vpop.eup %6309 }
 0x803   : > { %v6312_v2 = vpop.eup %6311 }
 0x808   : > { %3627 = vrot.lane.b32.xlu1 %v6944_v1, %s6468_s20  ;;  %s5525_s20 = sshll.u32 %s6542_s9, 7  ;;  %s6475_s9 = smov [#allocation2]  }
 0x809   : > { %s7758_s25 = scalar_lea.hbm %s7809_s8, %s5525_s20 }
 0x80a   : > { %v3192_v61 = vpop.xlane.xlu1 %3191 }
 0x80b   : > { %v3218_v32 = vsel %vm1078_vm3, %v3192_v61, 0.0 }
 0x80c   : > { %v3219_v34 = vrot.slane %v3218_v32, 4  ;;  %3745 = vrot.lane.b32.xlu1 %v6626_v30, %s6469_s21 }
 0x80e   : > { %v3220_v4 = vadd.f32 %v3219_v34, %v3218_v32 }
 0x810   : > { %v3221_v60 = vrot.slane %v3220_v4, 2  ;;  %3743 = vrot.lane.b32.xlu1 %v6640_v43, %s6469_s21  ;;  %v3275_v43 = vmul.f32 %v6310_v46, %v7314_v19  ;;  %v3277_v19 = vmul.f32 %v6312_v2, %v7318_v44 }
 0x812   : > { %v3222_v28 = vadd.f32 %v3221_v60, %v3220_v4  ;;  %v3198_v13 = vpop.xlane.xlu1 %3197  ;;  %v3283_v50 = vpack.c.bf16 %v3275_v43, %v3275_v43  ;;  %v3285_v32 = vpack.c.bf16 %v3277_v19, %v3277_v19 }
 0x813   : > { %v3232_v14 = vsel %vm1078_vm3, %v3198_v13, 0.0 }
 0x814   : > { %v3223_v12 = vrot.slane %v3222_v28, 1  ;;  %v3233_v56 = vrot.slane %v3232_v14, 4  ;;  %3845 = vrot.lane.b32.xlu1 %v6638_v42, %s6469_s21 }
 0x816   : > { %v3224_v59 = vadd.f32 %v3223_v12, %v3222_v28  ;;  %v3234_v27 = vadd.f32 %v3233_v56, %v3232_v14  ;;  %v3201_v30 = vpop.xlane.xlu0 %3200  ;;  %v3340_v31 = vpop.permute.xlu1 %3339 }
 0x817   : > { %v3345_v37 = vsel %vm1078_vm3, %v3340_v31, 0  ;;  %v3239_v36 = vsel %vm1078_vm3, %v3201_v30, 0.0 }
 0x818   : > { %6313 = vrcp.f32 %v3224_v59  ;;  %v3235_v54 = vrot.slane %v3234_v27, 2  ;;  %3843 = vrot.lane.b32.xlu1 %v6668_v57, %s6469_s21  ;;  %5979 = vmatpush3.bf16.msra.mxu0 %v3345_v37  ;;  %v3240_v44 = vrot.slane %v3239_v36, 4 }
 0x819   : > { %5990 = vmatprep.subr.bf16.mxu0 %v7814_v52 }
 0x81a   : > { %v3236_v49 = vadd.f32 %v3235_v54, %v3234_v27  ;;  %v3292_v62 = vpop.permute.xlu0 %3291  ;;  %v3388_v22 = vpop.permute.xlu1 %3387  ;;  %v3241_v34 = vadd.f32 %v3240_v44, %v3239_v36 }
 0x81b   : > { %v3297_v42 = vsel %vm1078_vm3, %v3292_v62, 0  ;;  %v3393_v29 = vsel %vm1078_vm3, %v3388_v22, 0 }
 0x81c   : > { %v3237_v23 = vrot.slane %v3236_v49, 1  ;;  %5973 = vmatpush3.bf16.msra.mxu1 %v3297_v42  ;;  %3945 = vrot.lane.b32.xlu1 %v6664_v55, %s6469_s21 }
 0x81d   : > { %5984 = vmatprep.subr.bf16.mxu1 %v7814_v52 }
 0x81e   : > { %v3238_v57 = vadd.f32 %v3237_v23, %v3236_v49  ;;  %v3436_v51 = vpop.permute.xlu1 %3435 }
 0x81f   : > { %5975 = vmatmul.mubr.msk.bf16.vlgmr.msra.gmra.mrb[88].mxu1 %vm684_vm2, %v3283_v50 }
 0x820   : > { %6315 = vrcp.f32 %v3238_v57  ;;  %3943 = vrot.lane.b32.xlu1 %v6690_v0, %s6469_s21  ;;  %5985 = vmatpush3.bf16.msra.mxu1 %v3393_v29  ;;  %v3441_v0 = vsel %vm1078_vm3, %v3436_v51, 0 }
 0x821   : > { %5986 = vmatprep.mubr.msk.bf16.mxu1 %vm6466_vm1, %v7814_v52  ;;  %5996 = vmatprep.subr.bf16.mxu1 %v7814_v52 }
 0x822   : > { %v6314_v55 = vpop.eup %6313 }
 0x823   : > { %v3276_v24 = vmul.f32 %v6314_v55, %v7328_v58 }
 0x824   : > { %4045 = vrot.lane.b32.xlu1 %v6688_v63, %s6469_s21 }
 0x825   : > { %v3284_v61 = vpack.c.bf16 %v3276_v24, %v3276_v24 }
 0x827   : > { %5981 = vmatmul.mubr.msk.bf16.vlgmr.msra.gmra.mrb[92].mxu0 %vm684_vm2, %v3284_v61  ;;  %5987 = vmatmul.mubr.msk.bf16.vlgmr.msra.gmra.mrb[92].mxu1 %vm684_vm2, %v3285_v32 }
 0x828   : > { %5991 = vmatpush3.bf16.msra.mxu0 %v3441_v0  ;;  %4043 = vrot.lane.b32.xlu1 %v6708_v5, %s6469_s21  ;;  %v3242_v5 = vrot.slane %v3241_v34, 2 }
 0x829   : > { %5992 = vmatprep.mubr.msk.bf16.mxu0 %vm6466_vm1, %v7814_v52  ;;  %5998 = vmatprep.mubr.msk.bf16.mxu1 %vm6466_vm1, %v7814_v52 }
 0x82a   : > { %v6316_v63 = vpop.eup %6315  ;;  %6002 = vmatprep.subr.bf16.mxu0 %v7814_v52  ;;  %v3243_v10 = vadd.f32 %v3242_v5, %v3241_v34 }
 0x82b   : > { %v3278_v58 = vmul.f32 %v6316_v63, %v7332_v17 }
 0x82c   : > { %v3244_v60 = vrot.slane %v3243_v10, 1 }
 0x82d   : > { %v3286_v4 = vpack.c.bf16 %v3278_v58, %v3278_v58 }
 0x82e   : > { %v3245_v28 = vadd.f32 %v3244_v60, %v3243_v10 }
 0x82f   : > { %5993 = vmatmul.mubr.msk.bf16.vlgmr.msra.gmra.mrb[96].mxu0 %vm684_vm2, %v3286_v4 }
 0x830   : > { %6004 = vmatprep.mubr.msk.bf16.mxu0 %vm6466_vm1, %v7814_v52  ;;  %6317 = vrcp.f32 %v3245_v28 }
 0x83a   : > { %v6318_v13 = vpop.eup %6317 }
 0x83b   : > { %v3279_v46 = vmul.f32 %v6318_v13, %v7336_v35 }
 0x83d   : > { %v3287_v43 = vpack.c.bf16 %v3279_v46, %v3279_v46 }
 0x84b   : > { %v3207_v14 = vpop.xlane.xlu0 %3206 }
 0x84c   : > { %v3253_v12 = vsel %vm1078_vm3, %v3207_v14, 0.0 }
 0x84d   : > { %v3254_v56 = vrot.slane %v3253_v12, 4 }
 0x84f   : > { %v3255_v17 = vadd.f32 %v3254_v56, %v3253_v12  ;;  %v3484_v59 = vpop.permute.xlu0 %3483  ;;  %v3204_v27 = vpop.xlane.xlu1 %3203 }
 0x850   : > { %v3489_v30 = vsel %vm1078_vm3, %v3484_v59, 0  ;;  %v3246_v31 = vsel %vm1078_vm3, %v3204_v27, 0.0 }
 0x851   : > { %v3256_v37 = vrot.slane %v3255_v17, 2  ;;  %v3247_v54 = vrot.slane %v3246_v31, 4  ;;  %5997 = vmatpush3.bf16.msra.mxu1 %v3489_v30 }
 0x852   : > { %6008 = vmatprep.subr.bf16.mxu1 %v7814_v52 }
 0x853   : > { %v3257_v49 = vadd.f32 %v3256_v37, %v3255_v17  ;;  %v3248_v62 = vadd.f32 %v3247_v54, %v3246_v31  ;;  %v3580_v42 = vpop.permute.xlu0 %3579  ;;  %v3532_v23 = vpop.permute.xlu1 %3531 }
 0x854   : > { %v3585_v22 = vsel %vm1078_vm3, %v3580_v42, 0  ;;  %v3537_v35 = vsel %vm1078_vm3, %v3532_v23, 0  ;;  %5999 = vmatmul.mubr.msk.bf16.vlgmr.msra.gmra.mrb[96].mxu1 %vm684_vm2, %v3287_v43 }
 0x855   : > { %v3258_v50 = vrot.slane %v3257_v49, 1  ;;  %v3249_v2 = vrot.slane %v3248_v62, 2  ;;  %6003 = vmatpush3.bf16.msra.mxu0 %v3537_v35  ;;  %6009 = vmatpush3.bf16.msra.mxu1 %v3585_v22 }
 0x856   : > { %6010 = vmatprep.mubr.msk.bf16.mxu1 %vm6466_vm1, %v7814_v52  ;;  %6020 = vmatprep.subr.bf16.mxu1 %v7814_v52 }
 0x857   : > { %v3259_v57 = vadd.f32 %v3258_v50, %v3257_v49  ;;  %v3250_v29 = vadd.f32 %v3249_v2, %v3248_v62  ;;  %6014 = vmatprep.subr.bf16.mxu0 %v7814_v52  ;;  %v3696_v55 = vpop.permute.xlu0 %3695 }
 0x858   : > { %v3701_v63 = vsel %vm684_vm2, %v3696_v55, 0 }
 0x859   : > { %6319 = vrcp.f32 %v3259_v57  ;;  %v3251_v19 = vrot.slane %v3250_v29, 1 }
 0x85b   : > { %v3252_v24 = vadd.f32 %v3251_v19, %v3250_v29  ;;  %v3694_v51 = vpop.permute.xlu0 %3693 }
 0x85d   : > { %6321 = vrcp.f32 %v3252_v24 }
 0x85f   : > { %v3796_v36 = vpop.permute.xlu0 %3795 }
 0x863   : > { %v6320_v61 = vpop.eup %6319  ;;  %v3794_v4 = vpop.permute.xlu0 %3793 }
 0x864   : > { %v3281_v32 = vmul.f32 %v6320_v61, %v7352_v45  ;;  %v3801_v45 = vsel %vm684_vm2, %v3796_v36, 0 }
 0x866   : > { %v3289_v0 = vpack.c.bf16 %v3281_v32, %v3281_v32 }
 0x867   : > { %v6322_v44 = vpop.eup %6321  ;;  %v3896_v5 = vpop.permute.xlu0 %3895 }
 0x868   : > { %6011 = vmatmul.mubr.msk.bf16.vlgmr.msra.gmra.mrb[100].mxu1 %vm684_vm2, %v3289_v0  ;;  %v3280_v58 = vmul.f32 %v6322_v44, %v7356_v39  ;;  %v3901_v10 = vsel %vm684_vm2, %v3896_v5, 0 }
 0x869   : > { %6021 = vmatpush3.bf16.xpose.msra.mxu1 %v3701_v63  ;;  %6022 = vmatprep.mubr.msk.bf16.mxu1 %vm6466_vm1, %v7814_v52 }
 0x86a   : > { %v3288_v34 = vpack.c.bf16 %v3280_v58, %v3280_v58  ;;  %6032 = vmatprep.subr.bf16.mxu1 %v7814_v52 }
 0x86b   : > { %v3894_v39 = vpop.permute.xlu0 %3893 }
 0x86c   : > { %6005 = vmatmul.mubr.msk.bf16.vlgmr.msra.gmra.mrb[100].mxu0 %vm684_vm2, %v3288_v34 }
 0x86d   : > { %6016 = vmatprep.mubr.msk.bf16.mxu0 %vm6466_vm1, %v7814_v52 }
 0x86f   : > { %v3996_v60 = vpop.permute.xlu0 %3995 }
 0x870   : > { %6023 = vmatmul.mubr.msk.bf16.vlgmr.msra.gmra.mrb[104].mxu1 %vm684_vm2, %v3694_v51  ;;  %v4001_v28 = vsel %vm684_vm2, %v3996_v60, 0 }
 0x871   : > { %6033 = vmatpush3.bf16.xpose.msra.mxu1 %v3801_v45  ;;  %6034 = vmatprep.mubr.msk.bf16.mxu1 %vm6466_vm1, %v7814_v52 }
 0x872   : > { %6044 = vmatprep.subr.bf16.mxu1 %v7814_v52 }
 0x873   : > { %v3994_v56 = vpop.permute.xlu0 %3993 }
 0x878   : > { %6035 = vmatmul.mubr.msk.bf16.vlgmr.msra.gmra.mrb[108].mxu1 %vm684_vm2, %v3794_v4 }
 0x879   : > { %6045 = vmatpush3.bf16.xpose.msra.mxu1 %v3901_v10  ;;  %6046 = vmatprep.mubr.msk.bf16.mxu1 %vm6466_vm1, %v7814_v52 }
 0x87a   : > { %6056 = vmatprep.subr.bf16.mxu1 %v7814_v52 }
 0x880   : > { %6047 = vmatmul.mubr.msk.bf16.vlgmr.msra.gmra.mrb[112].mxu1 %vm684_vm2, %v3894_v39 }
 0x881   : > { %6057 = vmatpush3.bf16.xpose.msra.mxu1 %v4001_v28  ;;  %6058 = vmatprep.mubr.msk.bf16.mxu1 %vm6466_vm1, %v7814_v52 }
 0x882   : > { %6068 = vmatprep.subr.bf16.mxu1 %v7814_v52 }
 0x884   : > { %v3210_v13 = vpop.xlane.xlu1 %3209 }
 0x885   : > { %v3260_v14 = vsel %vm1078_vm3, %v3210_v13, 0.0 }
 0x886   : > { %v3261_v12 = vrot.slane %v3260_v14, 4 }
 0x888   : > { %v3262_v46 = vadd.f32 %v3261_v12, %v3260_v14  ;;  %6059 = vmatmul.mubr.msk.bf16.vlgmr.msra.gmra.mrb[116].mxu1 %vm684_vm2, %v3994_v56  ;;  %v3628_v17 = vpop.permute.xlu1 %3627 }
 0x889   : > { %v3633_v59 = vsel %vm1078_vm3, %v3628_v17, 0  ;;  %6070 = vmatprep.mubr.msk.bf16.mxu1 %vm6466_vm1, %v7814_v52 }
 0x88a   : > { %v3263_v27 = vrot.slane %v3262_v46, 2  ;;  %6015 = vmatpush3.bf16.msra.mxu0 %v3633_v59 }
 0x88b   : > { %6026 = vmatprep.subr.bf16.mxu0 %v7814_v52 }
 0x88c   : > { %v3264_v30 = vadd.f32 %v3263_v27, %v3262_v46  ;;  %v3746_v54 = vpop.permute.xlu1 %3745 }
 0x88d   : > { %v3751_v22 = vsel %vm684_vm2, %v3746_v54, 0 }
 0x88e   : > { %v3265_v31 = vrot.slane %v3264_v30, 1 }
 0x890   : > { %v3266_v37 = vadd.f32 %v3265_v31, %v3264_v30  ;;  %v3744_v43 = vpop.permute.xlu1 %3743 }
 0x892   : > { %6323 = vrcp.f32 %v3266_v37 }
 0x894   : > { %v3846_v42 = vpop.permute.xlu1 %3845 }
 0x895   : > { %v3851_v50 = vsel %vm684_vm2, %v3846_v42, 0 }
 0x898   : > { %v3844_v35 = vpop.permute.xlu1 %3843 }
 0x89c   : > { %v6324_v49 = vpop.eup %6323  ;;  %v3946_v2 = vpop.permute.xlu1 %3945 }
 0x89d   : > { %v3282_v62 = vmul.f32 %v6324_v49, %v7381_v38  ;;  %v3951_v57 = vsel %vm684_vm2, %v3946_v2, 0 }
 0x89f   : > { %v3290_v23 = vpack.c.bf16 %v3282_v62, %v3282_v62 }
 0x8a0   : > { %v3944_v38 = vpop.permute.xlu1 %3943 }
 0x8a1   : > { %6017 = vmatmul.mubr.msk.bf16.vlgmr.msra.gmra.mrb[104].mxu0 %vm684_vm2, %v3290_v23 }
 0x8a2   : > { %6027 = vmatpush3.bf16.xpose.msra.mxu0 %v3751_v22  ;;  %6028 = vmatprep.mubr.msk.bf16.mxu0 %vm6466_vm1, %v7814_v52 }
 0x8a3   : > { %6038 = vmatprep.subr.bf16.mxu0 %v7814_v52 }
 0x8a4   : > { %v4046_v29 = vpop.permute.xlu1 %4045 }
 0x8a5   : > { %v4051_v19 = vsel %vm684_vm2, %v4046_v29, 0 }
 0x8a8   : > { %v4044_v55 = vpop.permute.xlu1 %4043 }
 0x8a9   : > { %6029 = vmatmul.mubr.msk.bf16.vlgmr.msra.gmra.mrb[108].mxu0 %vm684_vm2, %v3744_v43 }
 0x8aa   : > { %6039 = vmatpush3.bf16.xpose.msra.mxu0 %v3851_v50  ;;  %6040 = vmatprep.mubr.msk.bf16.mxu0 %vm6466_vm1, %v7814_v52 }
 0x8ab   : > { %6050 = vmatprep.subr.bf16.mxu0 %v7814_v52 }
 0x8b1   : > { %6041 = vmatmul.mubr.msk.bf16.vlgmr.msra.gmra.mrb[112].mxu0 %vm684_vm2, %v3844_v35 }
 0x8b2   : > { %6051 = vmatpush3.bf16.xpose.msra.mxu0 %v3951_v57  ;;  %6052 = vmatprep.mubr.msk.bf16.mxu0 %vm6466_vm1, %v7814_v52 }
 0x8b3   : > { %6062 = vmatprep.subr.bf16.mxu0 %v7814_v52 }
 0x8b9   : > { %6053 = vmatmul.mubr.msk.bf16.vlgmr.msra.gmra.mrb[116].mxu0 %vm684_vm2, %v3944_v38 }
 0x8ba   : > { %6063 = vmatpush3.bf16.xpose.msra.mxu0 %v4051_v19  ;;  %6064 = vmatprep.mubr.msk.bf16.mxu0 %vm6466_vm1, %v7814_v52 }
 0x8bb   : > { %6074 = vmatprep.subr.bf16.mxu0 %v7814_v52 }
 0x8c1   : > { %6065 = vmatmul.mubr.msk.bf16.vlgmr.msra.gmra.mrb[120].mxu0 %vm684_vm2, %v4044_v55 }
 0x8c2   : > { %6076 = vmatprep.mubr.msk.bf16.mxu0 %vm6466_vm1, %v7814_v52 }
 0x8f2   : > { %v3333_v24 = vpop.f32.mrb[88].mxu1 }
 0x8f3   : > { %v5976_v51 = vpop.f32.mrb[89].mxu1 }
 0x8f4   : > { %v3336_v61 = vpop.f32.mrb[90].mxu1 }
 0x8f5   : > { %v5977_v32 = vpop.f32.mrb[91].mxu1 }
 0x8fa   : > { %v3381_v36 = vpop.f32.mrb[92].mxu0  ;;  %v3429_v0 = vpop.f32.mrb[92].mxu1 }
 0x8fb   : > { %v3683_v44 = vcombine.low %v3333_v24, %v3381_v36  ;;  %v5982_v63 = vpop.f32.mrb[93].mxu0  ;;  %v5988_v58 = vpop.f32.mrb[93].mxu1 }
 0x8fc   : > { %v3384_v34 = vpop.f32.mrb[94].mxu0  ;;  %v3432_v4 = vpop.f32.mrb[94].mxu1 }
 0x8fd   : > { %v5983_v45 = vpop.f32.mrb[95].mxu0  ;;  %v5989_v5 = vpop.f32.mrb[95].mxu1 }
 0x902   : > { %v3477_v39 = vpop.f32.mrb[96].mxu0 }
 0x903   : > { %v3684_v10 = vcombine.low %v3429_v0, %v3477_v39  ;;  %v5994_v60 = vpop.f32.mrb[97].mxu0 }
 0x904   : > { %v3480_v28 = vpop.f32.mrb[98].mxu0 }
 0x905   : > { %v7502_v13 = vpack.c.bf16 %v3684_v10, %v3683_v44  ;;  %v5995_v14 = vpop.f32.mrb[99].mxu0 }
 0x927   : > { %v3525_v12 = vpop.f32.mrb[96].mxu1 }
 0x928   : > { %v6000_v56 = vpop.f32.mrb[97].mxu1 }
 0x929   : > { %v3528_v46 = vpop.f32.mrb[98].mxu1 }
 0x92a   : > { %v6001_v17 = vpop.f32.mrb[99].mxu1 }
 0x93b   : > { %v3621_v59 = vpop.f32.mrb[100].mxu1 }
 0x93c   : > { %v6012_v27 = vpop.f32.mrb[101].mxu1 }
 0x93d   : > { %v3624_v30 = vpop.f32.mrb[102].mxu1 }
 0x93e   : > { %v6013_v31 = vpop.f32.mrb[103].mxu1 }
 0x93f   : > { %v3573_v37 = vpop.f32.mrb[100].mxu0 }
 0x940   : > { %v3685_v54 = vcombine.low %v3525_v12, %v3573_v37  ;;  %v6006_v43 = vpop.f32.mrb[101].mxu0 }
 0x941   : > { %v3576_v49 = vpop.f32.mrb[102].mxu0 }
 0x942   : > { %v6007_v62 = vpop.f32.mrb[103].mxu0 }
 0x943   : > { %v3737_v42 = vpop.f32.mrb[104].mxu1 }
 0x944   : > { %v7505_v23 = vadd.f32 %v7245_v25, %v3737_v42  ;;  %v6024_v22 = vpop.f32.mrb[105].mxu1 }
 0x945   : > { %v3740_v35 = vpop.f32.mrb[106].mxu1 }
 0x946   : > { %v6025_v50 = vpop.f32.mrb[107].mxu1  ;;  %v4093_v2 = vsel %vm1053_vm4, %v7505_v23, -inf }
 0x947   : > { %4094 = vmax.xlane.f32.xlu0 %v4093_v2 }
 0x94b   : > { %v3837_v38 = vpop.f32.mrb[108].mxu1 }
 0x94c   : > { %v7510_v57 = vadd.f32 %v7253_v53, %v3837_v38  ;;  %v6036_v29 = vpop.f32.mrb[109].mxu1 }
 0x94d   : > { %v3840_v19 = vpop.f32.mrb[110].mxu1 }
 0x94e   : > { %v6037_v55 = vpop.f32.mrb[111].mxu1  ;;  %v4099_v24 = vsel %vm1053_vm4, %v7510_v57, -inf }
 0x94f   : > { %4100 = vmax.xlane.f32.xlu0 %v4099_v24 }
 0x953   : > { %v3937_v25 = vpop.f32.mrb[112].mxu1 }
 0x954   : > { %v6048_v51 = vpop.f32.mrb[113].mxu1  ;;  %v7525_v27 = vadd.f32 %v7277_v21, %v3937_v25 }
 0x955   : > { %v3940_v61 = vpop.f32.mrb[114].mxu1 }
 0x956   : > { %v6049_v32 = vpop.f32.mrb[115].mxu1  ;;  %v4105_v37 = vsel %vm1053_vm4, %v7525_v27, -inf }
 0x95b   : > { %v4037_v36 = vpop.f32.mrb[116].mxu1 }
 0x95c   : > { %v6060_v0 = vpop.f32.mrb[117].mxu1  ;;  %v7530_v31 = vadd.f32 %v7285_v26, %v4037_v36 }
 0x95d   : > { %v4040_v44 = vpop.f32.mrb[118].mxu1 }
 0x95e   : > { %v6061_v63 = vpop.f32.mrb[119].mxu1  ;;  %v4111_v62 = vsel %vm1053_vm4, %v7530_v31, -inf }
 0x974   : > { %v3669_v58 = vpop.f32.mrb[104].mxu0 }
 0x975   : > { %v3686_v34 = vcombine.low %v3621_v59, %v3669_v58  ;;  %v6018_v4 = vpop.f32.mrb[105].mxu0 }
 0x976   : > { %v3672_v53 = vpop.f32.mrb[106].mxu0 }
 0x977   : > { %v7514_v45 = vpack.c.bf16 %v3686_v34, %v3685_v54  ;;  %v6019_v5 = vpop.f32.mrb[107].mxu0 }
 0x97c   : > { %v3787_v39 = vpop.f32.mrb[108].mxu0 }
 0x97d   : > { %v7517_v10 = vadd.f32 %v7263_v48, %v3787_v39  ;;  %v6030_v60 = vpop.f32.mrb[109].mxu0 }
 0x97e   : > { %v3790_v28 = vpop.f32.mrb[110].mxu0 }
 0x97f   : > { %v6031_v14 = vpop.f32.mrb[111].mxu0  ;;  %v4096_v12 = vsel %vm1053_vm4, %v7517_v10, -inf }
 0x980   : > { %4097 = vmax.xlane.f32.xlu1 %v4096_v12 }
 0x984   : > { %v3887_v56 = vpop.f32.mrb[112].mxu0 }
 0x985   : > { %v7522_v46 = vadd.f32 %v7271_v15, %v3887_v56  ;;  %v6042_v17 = vpop.f32.mrb[113].mxu0 }
 0x986   : > { %v3890_v59 = vpop.f32.mrb[114].mxu0 }
 0x987   : > { %v6043_v30 = vpop.f32.mrb[115].mxu0  ;;  %v4102_v48 = vsel %vm1053_vm4, %v7522_v46, -inf }
 0x988   : > { %4103 = vmax.xlane.f32.xlu0 %v4102_v48 }
 0x98c   : > { %4106 = vmax.xlane.f32.xlu0 %v4105_v37  ;;  %v3987_v54 = vpop.f32.mrb[116].mxu0 }
 0x98d   : > { %v7535_v15 = vadd.f32 %v7293_v33, %v3987_v54  ;;  %v6054_v43 = vpop.f32.mrb[117].mxu0 }
 0x98e   : > { %v3990_v49 = vpop.f32.mrb[118].mxu0 }
 0x98f   : > { %v6055_v21 = vpop.f32.mrb[119].mxu0  ;;  %v4108_v42 = vsel %vm1053_vm4, %v7535_v15, -inf }
 0x990   : > { %4112 = vmax.xlane.f32.xlu0 %v4111_v62  ;;  %4109 = vmax.xlane.f32.xlu1 %v4108_v42 }
 0x994   : > { %v4087_v26 = vpop.f32.mrb[120].mxu0 }
 0x995   : > { %v7542_v22 = vadd.f32 %v7303_v9, %v4087_v26  ;;  %v6066_v35 = vpop.f32.mrb[121].mxu0 }
 0x996   : > { %v4090_v50 = vpop.f32.mrb[122].mxu0 }
 0x997   : > { %v6067_v2 = vpop.f32.mrb[123].mxu0  ;;  %v4114_v33 = vsel %vm1053_vm4, %v7542_v22, -inf }
 0x998   : > { %4115 = vmax.xlane.f32.xlu1 %v4114_v33 }
 0x9d4   : > { %v4095_v38 = vpop.xlane.xlu0 %4094 }
 0x9d5   : > { %v4117_v29 = vsel %vm1078_vm3, %v4095_v38, -inf }
 0x9d6   : > { %v4118_v19 = vrot.slane %v4117_v29, 4 }
 0x9d8   : > { %v4119_v55 = vmax.f32 %v4117_v29, %v4118_v19 }
 0x9da   : > { %v4120_v24 = vrot.slane %v4119_v55, 2 }
 0x9dc   : > { %v4121_v25 = vmax.f32 %v4119_v55, %v4120_v24  ;;  %v4101_v51 = vpop.xlane.xlu0 %4100 }
 0x9dd   : > { %v4131_v61 = vsel %vm1078_vm3, %v4101_v51, -inf }
 0x9de   : > { %v4122_v32 = vrot.slane %v4121_v25, 1  ;;  %v4132_v9 = vrot.slane %v4131_v61, 4 }
 0x9e0   : > { %v4123_v36 = vmax.f32 %v4121_v25, %v4122_v32  ;;  %v4133_v0 = vmax.f32 %v4131_v61, %v4132_v9 }
 0x9e2   : > { %v4173_v44 = vsub.f32 %v7505_v23, %v4123_v36  ;;  %v4134_v63 = vrot.slane %v4133_v0, 2 }
 0x9e4   : > { %v4181_v58 = vmul.f32 1.442695, %v4173_v44  ;;  %v4135_v34 = vmax.f32 %v4133_v0, %v4134_v63 }
 0x9e6   : > { %6325 = vpow2.f32 %v4181_v58  ;;  %v4136_v4 = vrot.slane %v4135_v34, 1 }
 0x9e8   : > { %v4137_v53 = vmax.f32 %v4135_v34, %v4136_v4 }
 0x9ea   : > { %v4175_v5 = vsub.f32 %v7510_v57, %v4137_v53 }
 0x9ec   : > { %v4185_v39 = vmul.f32 1.442695, %v4175_v5 }
 0x9ee   : > { %6327 = vpow2.f32 %v4185_v39 }
 0x9f0   : > { %v7550_v60 = vpop.eup %6325 }
 0x9f1   : > { %v4197_v28 = vsel %vm1053_vm4, %v7550_v60, 0.0 }
 0x9f2   : > { %4198 = vadd.xlane.f32.xlu0 %v4197_v28 }
 0x9f8   : > { %v7554_v14 = vpop.eup %6327 }
 0x9f9   : > { %v4203_v23 = vsel %vm1053_vm4, %v7554_v14, 0.0 }
 0x9fa   : > { %4204 = vadd.xlane.f32.xlu0 %v4203_v23 }
 0xa0d   : > { %v4098_v12 = vpop.xlane.xlu1 %4097 }
 0xa0e   : > { %v4124_v56 = vsel %vm1078_vm3, %v4098_v12, -inf }
 0xa0f   : > { %v4125_v17 = vrot.slane %v4124_v56, 4 }
 0xa11   : > { %v4126_v59 = vmax.f32 %v4124_v56, %v4125_v17 }
 0xa13   : > { %v4127_v57 = vrot.slane %v4126_v59, 2 }
 0xa15   : > { %v4128_v30 = vmax.f32 %v4126_v59, %v4127_v57  ;;  %v4104_v48 = vpop.xlane.xlu0 %4103 }
 0xa16   : > { %v4138_v37 = vsel %vm1078_vm3, %v4104_v48, -inf }
 0xa17   : > { %v4129_v54 = vrot.slane %v4128_v30, 1  ;;  %v4139_v43 = vrot.slane %v4138_v37, 4 }
 0xa19   : > { %v4130_v49 = vmax.f32 %v4128_v30, %v4129_v54  ;;  %v4140_v21 = vmax.f32 %v4138_v37, %v4139_v43  ;;  %v4107_v62 = vpop.xlane.xlu0 %4106 }
 0xa1a   : > { %v4145_v42 = vsel %vm1078_vm3, %v4107_v62, -inf }
 0xa1b   : > { %v4174_v26 = vsub.f32 %v7517_v10, %v4130_v49  ;;  %v4141_v35 = vrot.slane %v4140_v21, 2  ;;  %v4146_v50 = vrot.slane %v4145_v42, 4 }
 0xa1d   : > { %v4183_v2 = vmul.f32 1.442695, %v4174_v26  ;;  %v4142_v33 = vmax.f32 %v4140_v21, %v4141_v35  ;;  %v4147_v38 = vmax.f32 %v4145_v42, %v4146_v50  ;;  %v4110_v4 = vpop.xlane.xlu1 %4109 }
 0xa1e   : > { %v4152_v5 = vsel %vm1078_vm3, %v4110_v4, -inf }
 0xa1f   : > { %6329 = vpow2.f32 %v4183_v2  ;;  %v4143_v29 = vrot.slane %v4142_v33, 1  ;;  %v4148_v19 = vrot.slane %v4147_v38, 2  ;;  %v4153_v23 = vrot.slane %v4152_v5, 4 }
 0xa21   : > { %v4144_v55 = vmax.f32 %v4142_v33, %v4143_v29  ;;  %v4149_v24 = vmax.f32 %v4147_v38, %v4148_v19  ;;  %v4154_v17 = vmax.f32 %v4152_v5, %v4153_v23 }
 0xa23   : > { %v4176_v25 = vsub.f32 %v7522_v46, %v4144_v55  ;;  %v4150_v51 = vrot.slane %v4149_v24, 1  ;;  %v4155_v30 = vrot.slane %v4154_v17, 2 }
 0xa25   : > { %v4187_v61 = vmul.f32 1.442695, %v4176_v25  ;;  %v4151_v32 = vmax.f32 %v4149_v24, %v4150_v51  ;;  %v4116_v39 = vpop.xlane.xlu1 %4115  ;;  %v4156_v54 = vmax.f32 %v4154_v17, %v4155_v30 }
 0xa26   : > { %v4166_v12 = vsel %vm1078_vm3, %v4116_v39, -inf }
 0xa27   : > { %6331 = vpow2.f32 %v4187_v61  ;;  %v4177_v9 = vsub.f32 %v7525_v27, %v4151_v32  ;;  %v4113_v27 = vpop.xlane.xlu0 %4112  ;;  %v4167_v59 = vrot.slane %v4166_v12, 4 }
 0xa28   : > { %v4159_v34 = vsel %vm1078_vm3, %v4113_v27, -inf }
 0xa29   : > { %v7564_v36 = vpop.eup %6329  ;;  %v4189_v10 = vmul.f32 1.442695, %v4177_v9  ;;  %v4160_v53 = vrot.slane %v4159_v34, 4  ;;  %v4168_v48 = vmax.f32 %v4166_v12, %v4167_v59 }
 0xa2a   : > { %v4200_v0 = vsel %vm1053_vm4, %v7564_v36, 0.0 }
 0xa2b   : > { %6333 = vpow2.f32 %v4189_v10  ;;  %4201 = vadd.xlane.f32.xlu1 %v4200_v0  ;;  %v4161_v28 = vmax.f32 %v4159_v34, %v4160_v53  ;;  %v4169_v43 = vrot.slane %v4168_v48, 2 }
 0xa2d   : > { %v4162_v56 = vrot.slane %v4161_v28, 2  ;;  %v4170_v21 = vmax.f32 %v4168_v48, %v4169_v43 }
 0xa2f   : > { %v4163_v57 = vmax.f32 %v4161_v28, %v4162_v56  ;;  %v4171_v26 = vrot.slane %v4170_v21, 1 }
 0xa31   : > { %v7568_v44 = vpop.eup %6331  ;;  %v4164_v37 = vrot.slane %v4163_v57, 1  ;;  %v4172_v50 = vmax.f32 %v4170_v21, %v4171_v26 }
 0xa32   : > { %v4206_v63 = vsel %vm1053_vm4, %v7568_v44, 0.0 }
 0xa33   : > { %4207 = vadd.xlane.f32.xlu1 %v4206_v63  ;;  %v4165_v49 = vmax.f32 %v4163_v57, %v4164_v37 }
 0xa35   : > { %v7572_v46 = vpop.eup %6333  ;;  %v4179_v62 = vsub.f32 %v7530_v31, %v4165_v49 }
 0xa36   : > { %v4209_v58 = vsel %vm1053_vm4, %v7572_v46, 0.0 }
 0xa37   : > { %4210 = vadd.xlane.f32.xlu0 %v4209_v58 }
 0xa44   : > { %4349 = vrot.lane.b32.xlu1 %v6720_v7, %s6469_s21  ;;  %v4157_v7 = vrot.slane %v4156_v54, 1 }
 0xa46   : > { %v4158_v42 = vmax.f32 %v4156_v54, %v4157_v7 }
 0xa48   : > { %4397 = vrot.lane.b32.xlu1 %v6892_v20, %s6469_s21  ;;  %v4193_v20 = vmul.f32 1.442695, %v4179_v62  ;;  %v4178_v35 = vsub.f32 %v7535_v15, %v4158_v42 }
 0xa4a   : > { %6335 = vpow2.f32 %v4193_v20  ;;  %v4191_v2 = vmul.f32 1.442695, %v4178_v35 }
 0xa4c   : > { %4445 = vrot.lane.b32.xlu1 %v6899_v47, %s6469_s21  ;;  %v4180_v47 = vsub.f32 %v7542_v22, %v4172_v50  ;;  %6337 = vpow2.f32 %v4191_v2 }
 0xa4d   : > { %4301 = vrot.lane.b32.xlu0 %v6718_v6, %s6469_s21 }
 0xa4e   : > { %v4195_v6 = vmul.f32 1.442695, %v4180_v47 }
 0xa50   : > { %6339 = vpow2.f32 %v4195_v6 }
 0xa54   : > { %v7590_v33 = vpop.eup %6335 }
 0xa55   : > { %v4215_v38 = vsel %vm1053_vm4, %v7590_v33, 0.0 }
 0xa56   : > { %v7594_v29 = vpop.eup %6337 }
 0xa57   : > { %v4212_v31 = vsel %vm1053_vm4, %v7594_v29, 0.0 }
 0xa5a   : > { %v7598_v15 = vpop.eup %6339 }
 0xa5b   : > { %v4218_v22 = vsel %vm1053_vm4, %v7598_v15, 0.0 }
 0xa6c   : > { %4216 = vadd.xlane.f32.xlu0 %v4215_v38 }
 0xa70   : > { %4213 = vadd.xlane.f32.xlu1 %v4212_v31 }
 0xa74   : > { %4219 = vadd.xlane.f32.xlu1 %v4218_v22 }
 0xa82   : > { %4493 = vrot.lane.b32.xlu0 %v6910_v16, %s6469_s21  ;;  %v4199_v16 = vpop.xlane.xlu0 %4198 }
 0xa85   : > { %4541 = vrot.lane.b32.xlu1 %v6921_v41, %s6469_s21  ;;  %v4221_v41 = vsel %vm1078_vm3, %v4199_v16, 0.0 }
 0xa86   : > { %4589 = vrot.lane.b32.xlu0 %v6935_v3, %s6469_s21  ;;  %v4222_v3 = vrot.slane %v4221_v41, 4 }
 0xa87   : > { %v4205_v19 = vpop.xlane.xlu0 %4204 }
 0xa88   : > { %v4235_v55 = vsel %vm1078_vm3, %v4205_v19, 0.0 }
 0xa89   : > { %4637 = vrot.lane.b32.xlu1 %v6944_v1, %s6469_s21  ;;  %v4223_v1 = vadd.f32 %v4222_v3, %v4221_v41 }
 0xa8a   : > { %4705 = vrot.lane.b32.xlu0 %v7242_v8, %s6470_s22  ;;  %v4236_v8 = vrot.slane %v4235_v55, 4 }
 0xa8b   : > { %v4224_v24 = vrot.slane %v4223_v1, 2 }
 0xa8c   : > { %v4237_v51 = vadd.f32 %v4236_v8, %v4235_v55 }
 0xa8d   : > { %4707 = vrot.lane.b32.xlu1 %v7260_v18, %s6470_s22  ;;  %v4225_v25 = vadd.f32 %v4224_v24, %v4223_v1 }
 0xa8e   : > { %4711 = vrot.lane.b32.xlu0 %v7502_v13, %s6471_s23  ;;  %v4238_v61 = vrot.slane %v4237_v51, 2 }
 0xa8f   : > { %v4226_v18 = vrot.slane %v4225_v25, 1 }
 0xa90   : > { %v4239_v9 = vadd.f32 %v4238_v61, %v4237_v51 }
 0xa91   : > { %4713 = vrot.lane.b32.xlu1 %v7514_v45, %s6471_s23  ;;  %v4227_v32 = vadd.f32 %v4226_v18, %v4225_v25 }
 0xa92   : > { %v4240_v45 = vrot.slane %v4239_v9, 1 }
 0xa93   : > { %6341 = vrcp.f32 %v4227_v32 }
 0xa94   : > { %v4241_v58 = vadd.f32 %v4240_v45, %v4239_v9 }
 0xa96   : > { %6343 = vrcp.f32 %v4241_v58 }
 0xa9d   : > { %v6342_v28 = vpop.eup %6341 }
 0xa9e   : > { %v4285_v30 = vmul.f32 %v6342_v28, %v7550_v60 }
 0xaa0   : > { %v4293_v7 = vpack.c.bf16 %v4285_v30, %v4285_v30  ;;  %v6344_v21 = vpop.eup %6343 }
 0xaa1   : > { %v4287_v60 = vmul.f32 %v6344_v21, %v7554_v14 }
 0xaa3   : > { %v4295_v2 = vpack.c.bf16 %v4287_v60, %v4287_v60 }
 0xab8   : > { %v4202_v13 = vpop.xlane.xlu1 %4201 }
 0xab9   : > { %v4228_v10 = vsel %vm1078_vm3, %v4202_v13, 0.0 }
 0xaba   : > { %v4229_v0 = vrot.slane %v4228_v10, 4 }
 0xabc   : > { %v4230_v63 = vadd.f32 %v4229_v0, %v4228_v10 }
 0xabe   : > { %v4231_v27 = vrot.slane %v4230_v63, 2 }
 0xac0   : > { %v4232_v34 = vadd.f32 %v4231_v27, %v4230_v63  ;;  %v4208_v4 = vpop.xlane.xlu1 %4207 }
 0xac1   : > { %v4242_v53 = vsel %vm1078_vm3, %v4208_v4, 0.0 }
 0xac2   : > { %v4233_v5 = vrot.slane %v4232_v34, 1  ;;  %v4243_v39 = vrot.slane %v4242_v53, 4 }
 0xac4   : > { %v4234_v23 = vadd.f32 %v4233_v5, %v4232_v34  ;;  %v4244_v12 = vadd.f32 %v4243_v39, %v4242_v53  ;;  %v4211_v56 = vpop.xlane.xlu0 %4210  ;;  %v4350_v17 = vpop.permute.xlu1 %4349 }
 0xac5   : > { %v4355_v59 = vsel %vm1078_vm3, %v4350_v17, 0  ;;  %v4249_v47 = vsel %vm1078_vm3, %v4211_v56, 0.0 }
 0xac6   : > { %6345 = vrcp.f32 %v4234_v23  ;;  %v4245_v57 = vrot.slane %v4244_v12, 2  ;;  %6075 = vmatpush3.bf16.msra.mxu0 %v4355_v59  ;;  %v4250_v14 = vrot.slane %v4249_v47, 4 }
 0xac7   : > { %6086 = vmatprep.subr.bf16.mxu0 %v7814_v52 }
 0xac8   : > { %v4246_v48 = vadd.f32 %v4245_v57, %v4244_v12  ;;  %v4302_v37 = vpop.permute.xlu0 %4301  ;;  %v4398_v49 = vpop.permute.xlu1 %4397  ;;  %v4251_v31 = vadd.f32 %v4250_v14, %v4249_v47 }
 0xac9   : > { %v4307_v54 = vsel %vm1078_vm3, %v4302_v37, 0  ;;  %v4403_v42 = vsel %vm1078_vm3, %v4398_v49, 0 }
 0xaca   : > { %v4247_v43 = vrot.slane %v4246_v48, 1  ;;  %6069 = vmatpush3.bf16.msra.mxu1 %v4307_v54  ;;  %v4252_v16 = vrot.slane %v4251_v31, 2 }
 0xacb   : > { %6080 = vmatprep.subr.bf16.mxu1 %v7814_v52 }
 0xacc   : > { %v4248_v62 = vadd.f32 %v4247_v43, %v4246_v48  ;;  %v4446_v35 = vpop.permute.xlu1 %4445  ;;  %v4253_v41 = vadd.f32 %v4252_v16, %v4251_v31 }
 0xacd   : > { %6071 = vmatmul.mubr.msk.bf16.vlgmr.msra.gmra.mrb[120].mxu1 %vm684_vm2, %v4293_v7  ;;  %v4451_v6 = vsel %vm1078_vm3, %v4446_v35, 0 }
 0xace   : > { %6347 = vrcp.f32 %v4248_v62  ;;  %6081 = vmatpush3.bf16.msra.mxu1 %v4403_v42  ;;  %6082 = vmatprep.mubr.msk.bf16.mxu1 %vm6466_vm1, %v7814_v52  ;;  %v4254_v3 = vrot.slane %v4253_v41, 1 }
 0xacf   : > { %6092 = vmatprep.subr.bf16.mxu1 %v7814_v52 }
 0xad0   : > { %v6346_v26 = vpop.eup %6345  ;;  %v4255_v19 = vadd.f32 %v4254_v3, %v4253_v41 }
 0xad1   : > { %v4286_v20 = vmul.f32 %v6346_v26, %v7564_v36 }
 0xad2   : > { %6349 = vrcp.f32 %v4255_v19 }
 0xad3   : > { %v4294_v50 = vpack.c.bf16 %v4286_v20, %v4286_v20 }
 0xad5   : > { %6077 = vmatmul.mubr.msk.bf16.vlgmr.msra.gmra.mrb[124].mxu0 %vm684_vm2, %v4294_v50  ;;  %6083 = vmatmul.mubr.msk.bf16.vlgmr.msra.gmra.mrb[124].mxu1 %vm684_vm2, %v4295_v2 }
 0xad6   : > { %6087 = vmatpush3.bf16.msra.mxu0 %v4451_v6  ;;  %6088 = vmatprep.mubr.msk.bf16.mxu0 %vm6466_vm1, %v7814_v52 }
 0xad7   : > { %6094 = vmatprep.mubr.msk.bf16.mxu1 %vm6466_vm1, %v7814_v52  ;;  %6098 = vmatprep.subr.bf16.mxu0 %v7814_v52 }
 0xad8   : > { %v6348_v36 = vpop.eup %6347 }
 0xad9   : > { %v4288_v38 = vmul.f32 %v6348_v36, %v7568_v44 }
 0xadb   : > { %v4296_v22 = vpack.c.bf16 %v4288_v38, %v4288_v38  ;;  %v6228_v38 = vld [vmem:[%s7807_s6 + $0x8] sm:$0xff]  }
 0xadc   : > { %v6350_v1 = vpop.eup %6349 }
 0xadd   : > { %6089 = vmatmul.mubr.msk.bf16.vlgmr.msra.gmra.mrb[128].mxu0 %vm684_vm2, %v4296_v22  ;;  %v4289_v25 = vmul.f32 %v6350_v1, %v7572_v46 }
 0xade   : > { %6100 = vmatprep.mubr.msk.bf16.mxu0 %vm6466_vm1, %v7814_v52 }
 0xadf   : > { %v4297_v10 = vpack.c.bf16 %v4289_v25, %v4289_v25 }
 0xaf9   : > { %v4217_v55 = vpop.xlane.xlu0 %4216 }
 0xafa   : > { %v4263_v24 = vsel %vm1078_vm3, %v4217_v55, 0.0 }
 0xafb   : > { %v4264_v8 = vrot.slane %v4263_v24, 4 }
 0xafd   : > { %v4265_v44 = vadd.f32 %v4264_v8, %v4263_v24  ;;  %v4494_v51 = vpop.permute.xlu0 %4493  ;;  %v4214_v18 = vpop.xlane.xlu1 %4213 }
 0xafe   : > { %v4499_v61 = vsel %vm1078_vm3, %v4494_v51, 0  ;;  %v4256_v32 = vsel %vm1078_vm3, %v4214_v18, 0.0 }
 0xaff   : > { %v4266_v9 = vrot.slane %v4265_v44, 2  ;;  %v4257_v13 = vrot.slane %v4256_v32, 4  ;;  %6093 = vmatpush3.bf16.msra.mxu1 %v4499_v61 }
 0xb00   : > { %6104 = vmatprep.subr.bf16.mxu1 %v7814_v52 }
 0xb01   : > { %v4267_v45 = vadd.f32 %v4266_v9, %v4265_v44  ;;  %v4258_v0 = vadd.f32 %v4257_v13, %v4256_v32  ;;  %v4590_v63 = vpop.permute.xlu0 %4589  ;;  %v4220_v58 = vpop.xlane.xlu1 %4219  ;;  %v6385_v32 = vld [vmem:[%s6589_s17] sm:$0xff] }
 0xb02   : > { %v4595_v27 = vsel %vm1078_vm3, %v4590_v63, 0  ;;  %v4270_v46 = vsel %vm1078_vm3, %v4220_v58, 0.0  ;;  %6095 = vmatmul.mubr.msk.bf16.vlgmr.msra.gmra.mrb[128].mxu1 %vm684_vm2, %v4297_v10  ;;  %v5528_v9 = vpack.c.bf16 %v6385_v32, %v6385_v32 }
 0xb03   : > { %v4268_v34 = vrot.slane %v4267_v45, 1  ;;  %v4259_v4 = vrot.slane %v4258_v0, 2  ;;  %v4271_v53 = vrot.slane %v4270_v46, 4  ;;  %6105 = vmatpush3.bf16.msra.mxu1 %v4595_v27  ;;  %6106 = vmatprep.mubr.msk.bf16.mxu1 %vm6466_vm1, %v7814_v52 }
 0xb04   : > { %v4832_v27 = vsel %vm406_vm0, %v5528_v9, 0 }
 0xb05   : > { %v4269_v5 = vadd.f32 %v4268_v34, %v4267_v45  ;;  %v4260_v39 = vadd.f32 %v4259_v4, %v4258_v0  ;;  %v4272_v28 = vadd.f32 %v4271_v53, %v4270_v46  ;;  %v4542_v23 = vpop.permute.xlu1 %4541 }
 0xb06   : > { %v4547_v12 = vsel %vm1078_vm3, %v4542_v23, 0 }
 0xb07   : > { %6351 = vrcp.f32 %v4269_v5  ;;  %v4261_v56 = vrot.slane %v4260_v39, 1  ;;  %v4273_v17 = vrot.slane %v4272_v28, 2  ;;  %6099 = vmatpush3.bf16.msra.mxu0 %v4547_v12  ;;  %v4706_v12 = vpop.permute.xlu0 %4705 }
 0xb08   : > { %6110 = vmatprep.subr.bf16.mxu0 %v7814_v52 }
 0xb09   : > { %v4262_v59 = vadd.f32 %v4261_v56, %v4260_v39  ;;  %v4274_v57 = vadd.f32 %v4273_v17, %v4272_v28  ;;  %v4638_v21 = vpop.permute.xlu1 %4637  ;;  %v4723_v17 = vsel %vm684_vm2, %v7006_v40, %v4706_v12  ;;  %v6386_v40 = vld [vmem:[%s6589_s17 + $0x8] sm:$0xff] }
 0xb0a   : > { %v4643_v60 = vsel %vm1078_vm3, %v4638_v21, 0  ;;  %v5529_v21 = vpack.c.bf16 %v6386_v40, %v6386_v40 }
 0xb0b   : > { %6353 = vrcp.f32 %v4262_v59  ;;  %v4275_v30 = vrot.slane %v4274_v57, 1  ;;  %v4712_v56 = vpop.permute.xlu0 %4711 }
 0xb0c   : > { %v4729_v59 = vsel %vm4727_vm5, %v4723_v17, %v4712_v56 }
 0xb0d   : > { %v4276_v48 = vadd.f32 %v4275_v30, %v4274_v57 }
 0xb0f   : > { %6355 = vrcp.f32 %v4276_v48  ;;  %v4708_v48 = vpop.permute.xlu1 %4707 }
 0xb11   : > { %v6352_v37 = vpop.eup %6351 }
 0xb12   : > { %v4291_v54 = vmul.f32 %v6352_v37, %v7590_v33 }
 0xb13   : > { %v4714_v37 = vpop.permute.xlu1 %4713 }
 0xb14   : > { %v4299_v43 = vpack.c.bf16 %v4291_v54, %v4291_v54  ;;  %v4726_v54 = vsel %vm684_vm2, %v7008_v11, %v4708_v48  ;;  %v5511_v11 = vld [vmem:[%s7808_s7] ss:$0 sm:$0xff] }
 0xb15   : > { %v6354_v49 = vpop.eup %6353 }
 0xb16   : > { %6107 = vmatmul.mubr.msk.bf16.vlgmr.msra.gmra.mrb[132].mxu1 %vm684_vm2, %v4299_v43  ;;  %v4290_v7 = vmul.f32 %v6354_v49, %v7594_v29  ;;  %v4731_v43 = vsel %vm4727_vm5, %v4726_v54, %v4714_v37  ;;  %v6473_v37 = vmov 1983009808  }
 0xb17   : > { %v5222_v54 = vunpack.c.l.s4 %v6473_v37 }
 0xb18   : > { %v4298_v62 = vpack.c.bf16 %v4290_v7, %v4290_v7 }
 0xb19   : > { %v6356_v42 = vpop.eup %6355 }
 0xb1a   : > { %6101 = vmatmul.mubr.msk.bf16.vlgmr.msra.gmra.mrb[132].mxu0 %vm684_vm2, %v4298_v62  ;;  %v4292_v26 = vmul.f32 %v6356_v42, %v7598_v15  ;;  %v6227_v15 = vld [vmem:[%s7807_s6] sm:$0xff]   ;;  %v4878_v62 = vsel %vm406_vm0, %v5529_v21, 0 }
 0xb1b   : > { %6111 = vmatpush3.bf16.msra.mxu0 %v4643_v60  ;;  %6112 = vmatprep.mubr.msk.bf16.mxu0 %vm6466_vm1, %v7814_v52  ;;  %v6387_v60 = vld [vmem:[%s6589_s17 + $0x10] sm:$0xff] }
 0xb1c   : > { %6124 = vmatprep.subr.bf16.mxu0 %v7814_v52  ;;  %v4300_v33 = vpack.c.bf16 %v4292_v26, %v4292_v26  ;;  %6116 = vmatprep.subr.bf16.mxu1 %v6227_v15  ;;  %v5530_v26 = vpack.c.bf16 %v6387_v60, %v6387_v60 }
 0xb1d   : > { %6117 = vmatpush3.bf16.msra.mxu1 %v6227_v15 }
 0xb1e   : > { %6118 = vmatprep.subr.bf16.mxu1 %v6228_v38 }
 0xb21   : > { %6119 = vmatpush3.bf16.msra.mxu1 %v6228_v38 }
 0xb22   : > { %6113 = vmatmul.mubr.msk.bf16.vlgmr.msra.gmra.mrb[136].mxu0 %vm684_vm2, %v4300_v33  ;;  %6130 = vmatprep.subr.bf16.mxu1 %v7814_v52 }
 0xb23   : > { %6126 = vmatprep.mubr.msk.bf16.mxu0 %vm6466_vm1, %v7814_v52 }
 0xb24   : > { %6125 = vmatpush3.bf16.xpose.msra.mxu0 %v4832_v27 }
 0xb25   : > { %6136 = vmatprep.subr.bf16.mxu0 %v7814_v52 }
 0xba0   : > { %v4343_v29 = vpop.f32.mrb[120].mxu1 }
 0xba1   : > { %v6072_v20 = vpop.f32.mrb[121].mxu1 }
 0xba2   : > { %v4346_v35 = vpop.f32.mrb[122].mxu1 }
 0xba3   : > { %v6073_v50 = vpop.f32.mrb[123].mxu1  ;;  %v6388_v35 = vld [vmem:[%s6589_s17 + $0x18] sm:$0xff] }
 0xba4   : > { %v5531_v50 = vpack.c.bf16 %v6388_v35, %v6388_v35 }
 0xba6   : > { %v4970_v38 = vsel %vm406_vm0, %v5531_v50, 0 }
 0xba8   : > { %v4391_v2 = vpop.f32.mrb[124].mxu0  ;;  %v4439_v47 = vpop.f32.mrb[124].mxu1 }
 0xba9   : > { %v4693_v6 = vcombine.low %v4343_v29, %v4391_v2  ;;  %v6078_v14 = vpop.f32.mrb[125].mxu0  ;;  %v6084_v36 = vpop.f32.mrb[125].mxu1 }
 0xbaa   : > { %v4394_v31 = vpop.f32.mrb[126].mxu0  ;;  %v4442_v22 = vpop.f32.mrb[126].mxu1  ;;  %v4924_v14 = vsel %vm406_vm0, %v5530_v26, 0 }
 0xbab   : > { %v6079_v16 = vpop.f32.mrb[127].mxu0  ;;  %v6085_v41 = vpop.f32.mrb[127].mxu1  ;;  %v6389_v31 = vld [vmem:[%s6589_s17 + $0x20] sm:$0xff] }
 0xbac   : > { %v5532_v22 = vpack.c.bf16 %v6389_v31, %v6389_v31  ;;  %v6390_v41 = vld [vmem:[%s6589_s17 + $0x28] sm:$0xff]  ;;  %v6395_v31 = vld [vmem:[%s6738_s18 + $0x4] sm:$0xf] }
 0xbb0   : > { %v4487_v3 = vpop.f32.mrb[128].mxu0 }
 0xbb1   : > { %v4694_v19 = vcombine.low %v4439_v47, %v4487_v3  ;;  %v6090_v1 = vpop.f32.mrb[129].mxu0  ;;  %v5533_v3 = vpack.c.bf16 %v6390_v41, %v6390_v41 }
 0xbb2   : > { %v4490_v55 = vpop.f32.mrb[130].mxu0  ;;  %v5016_v1 = vsel %vm406_vm0, %v5532_v22, 0 }
 0xbb3   : > { %v4701_v24 = vpack.c.bf16 %v4694_v19, %v4693_v6  ;;  %v6091_v8 = vpop.f32.mrb[131].mxu0 }
 0xbb4   : > { %v5062_v8 = vsel %vm406_vm0, %v5533_v3, 0  ;;  %v6396_v3 = vld [vmem:[%s6738_s18 + $0xc] sm:$0xf] }
 0xbb5   : > { %4717 = vrot.lane.b32.xlu0 %v4701_v24, %s6472_s12 }
 0xbd5   : > { %v4535_v25 = vpop.f32.mrb[128].mxu1 }
 0xbd6   : > { %v6096_v44 = vpop.f32.mrb[129].mxu1 }
 0xbd7   : > { %v4538_v51 = vpop.f32.mrb[130].mxu1 }
 0xbd8   : > { %v6097_v18 = vpop.f32.mrb[131].mxu1 }
 0xbd9   : > { %v6392_v18 = vld [vmem:[%s6589_s17 + $0x38] sm:$0xff] }
 0xbe9   : > { %v4631_v61 = vpop.f32.mrb[132].mxu1 }
 0xbea   : > { %v6108_v13 = vpop.f32.mrb[133].mxu1 }
 0xbeb   : > { %v4634_v10 = vpop.f32.mrb[134].mxu1 }
 0xbec   : > { %v6109_v45 = vpop.f32.mrb[135].mxu1 }
 0xbed   : > { %v4583_v0 = vpop.f32.mrb[132].mxu0 }
 0xbee   : > { %v4695_v63 = vcombine.low %v4535_v25, %v4583_v0  ;;  %v6102_v58 = vpop.f32.mrb[133].mxu0  ;;  %v6391_v25 = vld [vmem:[%s6589_s17 + $0x30] sm:$0xff]  ;;  %s329_s17 = sand.u32 1, %s6455_s28  }
 0xbef   : > { %v4586_v46 = vpop.f32.mrb[134].mxu0  ;;  %v5534_v44 = vpack.c.bf16 %v6391_v25, %v6391_v25  ;;  %s5316_s10 = scalar_lea.sflag [#allocation3], %s329_s17 }
 0xbf0   : > { %v6103_v34 = vpop.f32.mrb[135].mxu0 }
 0xbf1   : > { %v5108_v9 = vsel %vm406_vm0, %v5534_v44, 0 }
 0xbf5   : > { %v4679_v4 = vpop.f32.mrb[136].mxu0 }
 0xbf6   : > { %v4696_v53 = vcombine.low %v4631_v61, %v4679_v4  ;;  %v6114_v5 = vpop.f32.mrb[137].mxu0  ;;  %v5535_v61 = vpack.c.bf16 %v6392_v18, %v6392_v18 }
 0xbf7   : > { %v4682_v39 = vpop.f32.mrb[138].mxu0 }
 0xbf8   : > { %v4702_v28 = vpack.c.bf16 %v4696_v53, %v4695_v63  ;;  %v6115_v23 = vpop.f32.mrb[139].mxu0  ;;  %v5154_v45 = vsel %vm406_vm0, %v5535_v61, 0 }
 0xbfa   : > { %4719 = vrot.lane.b32.xlu1 %v4702_v28, %s6472_s12 }
 0xc27   : > { %v4718_v57 = vpop.permute.xlu0 %4717 }
 0xc28   : > { %v4734_v30 = vsel %vm4732_vm6, %v4729_v59, %v4718_v57 }
 0xc29   : > { %6120 = vmatprep.mubr.msk.bf16.mxu1 %vm406_vm0, %v4734_v30 }
 0xc6c   : > { %v4720_v49 = vpop.permute.xlu1 %4719 }
 0xc6d   : > { %v4736_v7 = vsel %vm4732_vm6, %v4731_v43, %v4720_v49  ;;  %v5224_v43 = vlaneseq }
 0xc6e   : > { %6121 = vmatmul.mubr.msk.bf16.vlgmr.msra.gmra.mrb[136].mxu1 %vm406_vm0, %v4736_v7 }
 0xc6f   : > { %6132 = vmatprep.mubr.msk.bf16.mxu1 %vm6466_vm1, %v7814_v52  ;;  %6131 = vmatpush3.bf16.xpose.msra.mxu1 %v4878_v62  ;;  %v5225_v35 = vshrl.u32 %v5224_v43, 7 }
 0xc70   : > { %6142 = vmatprep.subr.bf16.mxu1 %v7814_v52 }
 0xd41   : > { %v6122_v42 = vpop.f32.mrb[136].mxu1 }
 0xd42   : > { %v4793_v33 = vpop.f32.mrb[137].mxu1  ;;  %v4802_v55 = vadd.f32 %v6122_v42, %v5511_v11 }
 0xd43   : > { %v4794_v29 = vadd.f32 %v5511_v11, %v4793_v33  ;;  %v6123_v20 = vpop.f32.mrb[138].mxu1 }
 0xd44   : > { %v4796_v2 = vpop.f32.mrb[139].mxu1  ;;  %v4814_v51 = vcombine.high %v4802_v55, %v4802_v55  ;;  %v4824_v32 = vpack.c.bf16 %v4802_v55, %v4802_v55  ;;  %v4805_v10 = vadd.f32 %v6123_v20, %v5511_v11  ;;  %v5223_v20 = vunpack.c.0.s8 %v5222_v54 }
 0xd45   : > { %v4812_v47 = vcombine.high %v4794_v29, %v4794_v29  ;;  %v4820_v6 = vpack.c.bf16 %v4794_v29, %v4794_v29  ;;  %v4797_v15 = vadd.f32 %v5511_v11, %v4796_v2 }
 0xd46   : > { %v4825_v13 = vpack.c.bf16 %v4814_v51, %v4814_v51  ;;  %v4815_v0 = vcombine.high %v4805_v10, %v4805_v10  ;;  %v4826_v63 = vpack.c.bf16 %v4805_v10, %v4805_v10  ;;  %v5226_v41 = vsub.s32 %v5223_v20, %v5225_v35 }
 0xd47   : > { %v4821_v36 = vpack.c.bf16 %v4812_v47, %v4812_v47  ;;  %6127 = vmatmul.mubr.msk.bf16.vlgmr.msra.gmra.mrb[140].mxu0 %vm406_vm0, %v4820_v6  ;;  %v4813_v16 = vcombine.high %v4797_v15, %v4797_v15  ;;  %v4822_v19 = vpack.c.bf16 %v4797_v15, %v4797_v15  ;;  %v6393_v6 = vld [vmem:[%s6738_s18] sm:$0xf] }
 0xd48   : > { %6137 = vmatpush3.bf16.xpose.msra.mxu0 %v4924_v14  ;;  %6138 = vmatprep.mubr.msk.bf16.mxu0 %vm6466_vm1, %v7814_v52  ;;  %v4827_v58 = vpack.c.bf16 %v4815_v0, %v4815_v0 }
 0xd49   : > { %6133 = vmatmul.mubr.msk.bf16.vlgmr.msra.gmra.mrb[140].mxu1 %vm406_vm0, %v4821_v36  ;;  %6148 = vmatprep.subr.bf16.mxu0 %v7814_v52  ;;  %v4823_v24 = vpack.c.bf16 %v4813_v16, %v4813_v16  ;;  %v6394_v36 = vld [vmem:[%s6738_s18 + $0x8] sm:$0xf] }
 0xd4a   : > { %6143 = vmatpush3.bf16.xpose.msra.mxu1 %v4970_v38  ;;  %6144 = vmatprep.mubr.msk.bf16.mxu1 %vm6466_vm1, %v7814_v52 }
 0xd4b   : > { %6154 = vmatprep.subr.bf16.mxu1 %v7814_v52 }
 0xd4f   : > { %6139 = vmatmul.mubr.msk.bf16.vlgmr.msra.gmra.mrb[144].mxu0 %vm406_vm0, %v4822_v19 }
 0xd50   : > { %6149 = vmatpush3.bf16.xpose.msra.mxu0 %v5016_v1  ;;  %6150 = vmatprep.mubr.msk.bf16.mxu0 %vm6466_vm1, %v7814_v52 }
 0xd51   : > { %6145 = vmatmul.mubr.msk.bf16.vlgmr.msra.gmra.mrb[144].mxu1 %vm406_vm0, %v4823_v24  ;;  %6160 = vmatprep.subr.bf16.mxu0 %v7814_v52 }
 0xd52   : > { %6155 = vmatpush3.bf16.xpose.msra.mxu1 %v5062_v8  ;;  %6156 = vmatprep.mubr.msk.bf16.mxu1 %vm6466_vm1, %v7814_v52 }
 0xd53   : > { %6166 = vmatprep.subr.bf16.mxu1 %v7814_v52 }
 0xd57   : > { %6151 = vmatmul.mubr.msk.bf16.vlgmr.msra.gmra.mrb[148].mxu0 %vm406_vm0, %v4824_v32 }
 0xd58   : > { %6161 = vmatpush3.bf16.xpose.msra.mxu0 %v5108_v9  ;;  %6162 = vmatprep.mubr.msk.bf16.mxu0 %vm6466_vm1, %v7814_v52 }
 0xd59   : > { %6157 = vmatmul.mubr.msk.bf16.vlgmr.msra.gmra.mrb[148].mxu1 %vm406_vm0, %v4825_v13 }
 0xd5a   : > { %6167 = vmatpush3.bf16.xpose.msra.mxu1 %v5154_v45  ;;  %6168 = vmatprep.mubr.msk.bf16.mxu1 %vm6466_vm1, %v7814_v52 }
 0xd5f   : > { %6163 = vmatmul.mubr.msk.bf16.vlgmr.msra.gmra.mrb[152].mxu0 %vm406_vm0, %v4826_v63 }
 0xd61   : > { %6169 = vmatmul.mubr.msk.bf16.vlgmr.msra.gmra.mrb[152].mxu1 %vm406_vm0, %v4827_v58 }
 0xe1a   : > { %v4868_v27 = vpop.f32.mrb[140].mxu0 }
 0xe1b   : > { %v6128_v46 = vpop.f32.mrb[141].mxu0  ;;  %6357 = vtanh.f32 %v4868_v27 }
 0xe1c   : > { %v4871_v34 = vpop.f32.mrb[142].mxu0  ;;  %v4914_v4 = vpop.f32.mrb[140].mxu1 }
 0xe1d   : > { %v6129_v53 = vpop.f32.mrb[143].mxu0  ;;  %v6134_v5 = vpop.f32.mrb[141].mxu1  ;;  %6359 = vtanh.f32 %v4914_v4  ;;  %v6474_v34 = vmov 1934713408  }
 0xe1e   : > { %v4917_v39 = vpop.f32.mrb[142].mxu1  ;;  %v5255_v4 = vunpack.c.l.s4 %v6474_v34  ;;  %v6397_v5 = vld [vmem:[%s6738_s18 + $0x10] sm:$0xf] }
 0xe1f   : > { %v6135_v28 = vpop.f32.mrb[143].mxu1 }
 0xe20   : > { %v6398_v28 = vld [vmem:[%s6738_s18 + $0x18] sm:$0xf] }
 0xe22   : > { %v4960_v23 = vpop.f32.mrb[144].mxu0 }
 0xe23   : > { %6361 = vtanh.f32 %v4960_v23  ;;  %v6140_v52 = vpop.f32.mrb[145].mxu0 }
 0xe24   : > { %v4963_v12 = vpop.f32.mrb[146].mxu0  ;;  %v5006_v56 = vpop.f32.mrb[144].mxu1 }
 0xe25   : > { %6363 = vtanh.f32 %v5006_v56  ;;  %v6141_v17 = vpop.f32.mrb[147].mxu0  ;;  %v6146_v59 = vpop.f32.mrb[145].mxu1  ;;  %v6399_v12 = vld [vmem:[%s6738_s18 + $0x14] sm:$0xf] }
 0xe26   : > { %v5009_v57 = vpop.f32.mrb[146].mxu1  ;;  %v6358_v48 = vpop.eup %6357  ;;  %v6400_v59 = vld [vmem:[%s6738_s18 + $0x1c] sm:$0xf]  ;;  %s5416_s18 = sshll.u32 %s329_s17, 3 }
 0xe27   : > { %v6147_v30 = vpop.f32.mrb[147].mxu1  ;;  %v6360_v7 = vpop.eup %6359  ;;  %v5204_v21 = vmul.f32 10.0, %v6358_v48  ;;  %s331_s21 = scalar_lea.vmem [#allocation2], %s5416_s18 }
 0xe28   : > { %v5205_v33 = vmul.f32 10.0, %v6360_v7  ;;  %v5256_v30 = vunpack.c.0.s8 %v5255_v4 }
 0xe29   : > { %v5212_v14 = vadd.f32 %v6393_v6, %v5204_v21 }
 0xe2a   : > { %v5052_v49 = vpop.f32.mrb[148].mxu0  ;;  %v5213_v22 = vadd.f32 %v6395_v31, %v5205_v33  ;;  %v5259_v43 = vsub.s32 %v5256_v30, %v5225_v35 }
 0xe2b   : > { %v6152_v40 = vpop.f32.mrb[149].mxu0  ;;  %6365 = vtanh.f32 %v5052_v49 }
 0xe2c   : > { %v5055_v62 = vpop.f32.mrb[150].mxu0  ;;  %v5098_v11 = vpop.f32.mrb[148].mxu1 }
 0xe2d   : > { %v6362_v42 = vpop.eup %6361  ;;  %v6153_v60 = vpop.f32.mrb[151].mxu0  ;;  %6367 = vtanh.f32 %v5098_v11 }
 0xe2e   : > { %v6158_v26 = vpop.f32.mrb[149].mxu1  ;;  %v5206_v29 = vmul.f32 10.0, %v6362_v42 }
 0xe2f   : > { %v5101_v50 = vpop.f32.mrb[150].mxu1  ;;  %v6364_v2 = vpop.eup %6363 }
 0xe30   : > { %v6159_v47 = vpop.f32.mrb[151].mxu1  ;;  %v5214_v15 = vadd.f32 %v6394_v36, %v5206_v29  ;;  %v5207_v38 = vmul.f32 10.0, %v6364_v2 }
 0xe32   : > { %v5220_v16 = vcombine.low %v5212_v14, %v5214_v15  ;;  %v5215_v19 = vadd.f32 %v6396_v3, %v5207_v38  ;;  %v5144_v1 = vpop.f32.mrb[152].mxu0 }
 0xe33   : > { %6369 = vtanh.f32 %v5144_v1  ;;  %v6164_v55 = vpop.f32.mrb[153].mxu0 }
 0xe34   : > { %v5228_v24 = vcombine.low %v5213_v22, %v5215_v19  ;;  %v5147_v8 = vpop.f32.mrb[154].mxu0  ;;  %v5190_v25 = vpop.f32.mrb[152].mxu1  ;;  %v5227_v18 = vrot.slane %v5220_v16, %v5226_v41 }
 0xe35   : > { %6371 = vtanh.f32 %v5190_v25  ;;  %v6165_v44 = vpop.f32.mrb[155].mxu0  ;;  %v6170_v51 = vpop.f32.mrb[153].mxu1 }
 0xe36   : > { %v5235_v61 = vrot.slane %v5228_v24, %v5226_v41  ;;  %v5193_v32 = vpop.f32.mrb[154].mxu1  ;;  %v6366_v45 = vpop.eup %6365 }
 0xe37   : > { %v6171_v9 = vpop.f32.mrb[155].mxu1  ;;  %v6368_v0 = vpop.eup %6367  ;;  %v5208_v63 = vmul.f32 10.0, %v6366_v45 }
 0xe38   : > { %v5252_v13 = vcombine.low %v5227_v18, %v5235_v61  ;;  %v5253_v10 = vcombine.high %v5227_v18, %v5235_v61  ;;  %v5209_v27 = vmul.f32 10.0, %v6368_v0 }
 0xe39   : > { %v5216_v39 = vadd.f32 %v6397_v5, %v5208_v63 }
 0xe3a   : > { %v5217_v56 = vadd.f32 %v6399_v12, %v5209_v27  ;;  %v5267_v40 = vrot.slane %v5253_v10, %v5259_v43  ;;  %v5260_v62 = vrot.slane %v5252_v13, %v5259_v43 }
 0xe3d   : > { %v6370_v58 = vpop.eup %6369 }
 0xe3e   : > { %v5210_v46 = vmul.f32 10.0, %v6370_v58 }
 0xe3f   : > { %v6372_v53 = vpop.eup %6371 }
 0xe40   : > { %v5218_v23 = vadd.f32 %v6398_v28, %v5210_v46  ;;  %v5211_v52 = vmul.f32 10.0, %v6372_v53 }
 0xe42   : > { %v5236_v17 = vcombine.low %v5216_v39, %v5218_v23  ;;  %v5219_v57 = vadd.f32 %v6400_v59, %v5211_v52 }
 0xe44   : > { %v5244_v48 = vcombine.low %v5217_v56, %v5219_v57  ;;  %v5243_v37 = vrot.slane %v5236_v17, %v5226_v41 }
 0xe46   : > { %v5251_v54 = vrot.slane %v5244_v48, %v5226_v41 }
 0xe48   : > { %v5268_v49 = vcombine.low %v5243_v37, %v5251_v54  ;;  %v5269_v7 = vcombine.high %v5243_v37, %v5251_v54 }
 0xe4a   : > { %v5283_v21 = vrot.slane %v5269_v7, %v5259_v43  ;;  %v5276_v11 = vrot.slane %v5268_v49, %v5259_v43 }
 0xe4c   : > { %v5286_v42 = vcombine.low %v5267_v40, %v5283_v21  ;;  %v5285_v60 = vcombine.high %v5260_v62, %v5276_v11  ;;  %v5287_v26 = vcombine.high %v5267_v40, %v5283_v21  ;;  %v5284_v33 = vcombine.low %v5260_v62, %v5276_v11 }
 0xe4e   : > { %5293 = vrot.lane.b32.xlu1 %v5286_v42, %s6471_s23  ;;  %5289 = vrot.lane.b32.xlu0 %v5285_v60, %s6470_s22  ;;  %s5329_s22 = sshll.u32 %s331_s21, 4  ;;  %s7760_s22 = int_to_ptr.vmem [resolvable:$true] %s5329_s22 }
 0xe4f   : > { %s6401_s26 = scalar_lea.vmem %s7760_s22, 128 }
 0xe50   : > { %p6402_p12 = scmp.ne.s32.totalorder %s7760_s22, %s6401_s26 }
 0xe52   : > { %5297 = vrot.lane.b32.xlu0 %v5287_v26, %s6472_s12  ;;  %p6403_p13 = pnand %p6402_p12, %p6559_p5  ;;  %s6405_s12 = sshll.u32 %s6475_s9, 4  ;;  %s6406_s12 = int_to_ptr.vmem [resolvable:$false] %s6405_s12 }
 0xe53   : > { %s6407_s13 = scalar_lea.vmem %s6406_s12, 256  ;;  %p6408_p1 = scmp.lt.s32.totalorder %s7760_s22, %s6406_s12 }
 0xe54   : > { %p6404_p0 = pneg %p6403_p13  ;;  %p6409_p2 = scmp.lt.s32.totalorder %s6407_s13, %s6401_s26 }
 0xe56   : > { %p6410_p3 = por %p6409_p2, %p6408_p1 }
 0xe58   : > { %p6411_p4 = pnand %p6410_p3, %p6404_p0 }
 0xec0   : > { %v5290_v29 = vpop.permute.xlu0 %5289  ;;  %v5294_v20 = vpop.permute.xlu1 %5293 }
 0xec1   : > { %v5300_v35 = vsel %vm684_vm2, %v5284_v33, %v5290_v29 }
 0xec2   : > { %v5301_v2 = vsel %vm4727_vm5, %v5300_v35, %v5294_v20 }
 0xec4   : > { %v5298_v50 = vpop.permute.xlu0 %5297 }
 0xec5   : > { %v5302_v47 = vsel %vm4732_vm6, %v5301_v2, %v5298_v50 }
 0xec6   : > { %v5303_v6 = vsel %vm406_vm0, %v5302_v47, -inf }
 0xec7   : > { %5304 = vmax.xlane.f32.xlu1 %v5303_v6 }
 0xf54   : > { %v5305_v14 = vpop.xlane.xlu1 %5304 }
 0xf55   : > { %v5306_v36 = vsub.f32 %v5302_v47, %v5305_v14 }
 0xf57   : > { %v5307_v15 = vmul.f32 1.442695, %v5306_v36 }
 0xf59   : > { %6373 = vpow2.f32 %v5307_v15 }
 0xf63   : > { %v6374_v38 = vpop.eup %6373 }
 0xf64   : > { %v5309_v31 = vsel %vm406_vm0, %v6374_v38, 0.0 }
 0xf65   : > { %5310 = vadd.xlane.f32.xlu0 %v5309_v31 }
 0xff2   : > { %v5311_v22 = vpop.xlane.xlu0 %5310 }
 0xff3   : > { %6375 = vrcp.f32 %v5311_v22 }
 0xffd   : > { %v6376_v16 = vpop.eup %6375 }
 0xffe   : > { %v5313_v41 = vmul.f32 %v6376_v16, %v6374_v38 }
0x1000   : > { %5314 = vst.msk [vmem:[%s331_s21] sm:$0xff] %vm406_vm0, %v5313_v41 }
0x1001   : > { %6414 = shalt.err (!%p6411_p4)
}
0x1002   : > { %s6415_s19 = scalar_lea.hbm %s7758_s25, 128  ;;  %s6419_s20 = scalar_lea.hbm %s7809_s8, 256 }
0x1003   : > { %p6416_p7 = scmp.ne.s32.totalorder %s7758_s25, %s6415_s19  ;;  %p6420_p10 = scmp.lt.u32.totalorder %s7758_s25, %s7809_s8 }
0x1004   : > { %p6421_p11 = scmp.lt.u32.totalorder %s6419_s20, %s6415_s19  ;;  %p6423_p13 = scmp.lt.u32.totalorder %s6415_s19, %s7758_s25 }
0x1005   : > { %p6417_p8 = pnand %p6416_p7, %p6559_p5 }
0x1006   : > { %p6422_p12 = por %p6421_p11, %p6420_p10 }
0x1007   : > { %p6418_p9 = pneg %p6417_p8 }
0x1008   : > { %p6424_p0 = por %p6423_p13, %p6422_p12 }
0x100a   : > { %p6425_p1 = pnand %p6424_p0, %p6418_p9 }
0x100c   : > { %6428 = shalt.err (!%p6425_p1)
}
0x100d   : > { %6172 = dma.vmem_to_hbm [thread:$0]  (%p6559_p5), %s7760_s22, 128, %s7758_s25, %s5316_s10  }
0x100e PF: > { %p6178_p2 = scmp.ge.s32.totalorder %s6463_s30, 2  ;;  %s5341_s24 = sand.u32 1, %s6451_s27  }
0x100f   : > { %s5342_s26 = scalar_lea.sflag [#allocation3], %s5341_s24 }
0x1010   : > { %p6175_p3 = pnand %p6178_p2, %p6563_p6 }
0x1012   : > { %6446 = dma.done.wait (!%p6175_p3), %s5342_s26, 128  }
0x1013   : > { %6448 = vsyncadd (!%p6175_p3), %s5342_s26, 4294967168  ;;  %p18_p4 = scmp.ge.s32.totalorder %s6546_s11, 4   ;;  %s7815_s27 = smov %s6455_s28 }
0x1014   : > { %s7816_s28 = smov %s6459_s29  ;;  %s7817_s29 = smov %s6557_s14 }
0x1015   : > { %s7818_s30 = smov %s6546_s11  ;;  %20 = sbr.rel (!%p18_p4) target bundleno = 3 (0x3), region = 93 }
0x101c   :  { %5347 = vsyncpa [#allocation3], 1 }
0x101d   :  { %5349 = vsyncpa [#allocation3 + $0x1], 1 }

</bundles_post_ra>
